<compile_context>
chip_gen: v7x
topology: tpu7x:2x2x1
jax: 0.10.0
libtpu: 0.0.40
codegen_flags: <defaults>
</compile_context>

<pallas_src>
import functools

import jax
import jax.numpy as jnp
from jax.experimental import pallas as pl
from jax.experimental.pallas import tpu as pltpu


def _pick_tile_rows(H, W, C_in, C_out, max_rows=32, budget_bytes=6 * 1024 * 1024):
    """Largest row-tile th that divides H, satisfies block-shape rules and VMEM budget."""
    def legal(th):
        # (th*W) is the lane dim of the x block, 2*th the sublane dim of the out block.
        return th == H or (th % 4 == 0 and (th * W) % 128 == 0)

    def vmem(th):
        thw = th * W
        # 2x double-buffered x block + 2x double-buffered out block + f32 scratch
        return 4 * thw * (2 * C_in + 2 * 4 * C_out + 4 * C_out)

    legal_divs = [d for d in range(1, H + 1) if H % d == 0 and legal(d)]
    good = [d for d in legal_divs if d <= max_rows and vmem(d) <= budget_bytes]
    if good:
        return max(good)
    return min(legal_divs)


def _upsample_kernel(x_ref, w_ref, b_ref, e_ref, o_ref, y_scr, *, th, W, C_out):
    # x_ref : (1, C_in, th*W)        flattened spatial rows of this tile
    # w_ref : (4*C_out, C_in)        rows ordered (kh, kw, co)
    # b_ref : (4*C_out, 1)           bias replicated per tap
    # e_ref : (2, W, 2*W)            e_ref[kw, j, 2*j+kw] = 1 (lane interleave)
    # o_ref : (1, C_out, 2*th, 2*W)  final NCHW output tile
    # y_scr : (4*C_out, th*W) f32    scratch holding the matmul result

    # Hot path: one MXU matmul for all 4 taps, f32 accumulation, bias fused.
    y = jnp.dot(w_ref[...], x_ref[0], preferred_element_type=jnp.float32)
    y_scr[...] = y + b_ref[...]

    e0 = e_ref[0]  # (W, 2*W)  selects even output columns
    e1 = e_ref[1]  # (W, 2*W)  selects odd  output columns

    # Fused 2x2 scatter: for each input row i and row-parity kh, build the
    # lane-interleaved output row (C_out, 2*W) and store it at row 2*i+kh.
    for i in range(th):
        for kh in range(2):
            a0 = y_scr[(2 * kh + 0) * C_out:(2 * kh + 1) * C_out, i * W:(i + 1) * W]
            a1 = y_scr[(2 * kh + 1) * C_out:(2 * kh + 2) * C_out, i * W:(i + 1) * W]
            row = (jnp.dot(a0, e0, preferred_element_type=jnp.float32)
                   + jnp.dot(a1, e1, preferred_element_type=jnp.float32))
            o_ref[0, :, 2 * i + kh, :] = row.astype(o_ref.dtype)


def _upsample_pallas(x_flat, wk, bk, ek, *, B, C_in, C_out, H, W, th, out_dtype):
    thw = th * W
    kernel = functools.partial(_upsample_kernel, th=th, W=W, C_out=C_out)
    return pl.pallas_call(
        kernel,
        out_shape=jax.ShapeDtypeStruct((B, C_out, 2 * H, 2 * W), out_dtype),
        grid_spec=pltpu.PrefetchScalarGridSpec(
            num_scalar_prefetch=0,
            grid=(B, H // th),
            in_specs=[
                pl.BlockSpec((1, C_in, thw), lambda b, i: (b, 0, i)),
                pl.BlockSpec((4 * C_out, C_in), lambda b, i: (0, 0)),
                pl.BlockSpec((4 * C_out, 1), lambda b, i: (0, 0)),
                pl.BlockSpec((2, W, 2 * W), lambda b, i: (0, 0, 0)),
            ],
            out_specs=pl.BlockSpec((1, C_out, 2 * th, 2 * W),
                                   lambda b, i: (b, 0, i, 0)),
            scratch_shapes=[pltpu.VMEM((4 * C_out, thw), jnp.float32)],
        ),
        compiler_params=pltpu.CompilerParams(
            dimension_semantics=("parallel", "parallel"),
            vmem_limit_bytes=32 * 1024 * 1024,
        ),
    )(x_flat, wk, bk, ek)


@jax.jit
def upsample_forward(x_nchw, weight, bias):
    """ConvTranspose2d(kernel=2, stride=2) forward.

    x_nchw : (B, C_in, H, W)
    weight : (C_in, C_out, 2, 2)   -- PyTorch ConvTranspose2d layout
    bias   : (C_out,)
    returns: (B, C_out, 2H, 2W)
    """
    B, C_in, H, W = x_nchw.shape
    C_out = weight.shape[1]
    th = _pick_tile_rows(H, W, C_in, C_out)

    # Free bitcast: NCHW kept, spatial dims flattened so the matmul lane dim is th*W.
    x_flat = x_nchw.reshape(B, C_in, H * W)

    # (C_in, C_out, kh, kw) -> rows ordered (kh, kw, co), cols = ci.
    wk = jnp.transpose(weight, (2, 3, 1, 0)).reshape(4 * C_out, C_in)
    # Bias replicated per tap in the same (kh, kw, co) order.
    bk = jnp.tile(bias, (4,)).reshape(4 * C_out, 1)

    # Constant lane-interleave selection matrices: e[kw, j, 2j+kw] = 1.
    j = jnp.arange(W)
    c = jnp.arange(2 * W)
    e0 = (c[None, :] == 2 * j[:, None]).astype(jnp.float32)
    e1 = (c[None, :] == 2 * j[:, None] + 1).astype(jnp.float32)
    ek = jnp.stack([e0, e1], axis=0)

    return _upsample_pallas(x_flat, wk, bk, ek, B=B, C_in=C_in, C_out=C_out,
                            H=H, W=W, th=th, out_dtype=x_nchw.dtype)


def _reference_forward(x_nchw, weight, bias):
    # Pure-JAX reference of ConvTranspose2d(kernel=2, stride=2), no Pallas.
    out = jnp.einsum("bihw,iokl->bohwkl", x_nchw, weight)
    B, C_out, H, W, _, _ = out.shape
    out = jnp.transpose(out, (0, 1, 2, 4, 3, 5)).reshape(B, C_out, 2 * H, 2 * W)
    return out + bias[None, :, None, None]


if __name__ == "__main__":
    key = jax.random.PRNGKey(0)
    k_x, k_w, k_b = jax.random.split(key, 3)

    B, C_in, C_out, H, W = 2, 4, 8, 16, 16

    x = jax.random.normal(k_x, (B, C_in, H, W), dtype=jnp.float32)
    # Deterministic synthetic params (PyTorch-ish uniform init scale).
    fan = C_in * 2 * 2
    bound = 1.0 / (fan ** 0.5)
    weight = jax.random.uniform(k_w, (C_in, C_out, 2, 2),
                                minval=-bound, maxval=bound, dtype=jnp.float32)
    bias = jax.random.uniform(k_b, (C_out,),
                              minval=-bound, maxval=bound, dtype=jnp.float32)

    out = jax.block_until_ready(upsample_forward(x, weight, bias))

    ref = _reference_forward(x, weight, bias)
    assert out.shape == (B, C_out, 2 * H, 2 * W), out.shape
    assert jnp.allclose(out, ref, atol=1e-5, rtol=1e-5), "mismatch vs reference"

    print("KERNEL_OK")
</pallas_src>

<mosaic_0001>
module attributes {stable_mosaic.version = 11 : i64} {
  func.func @_upsample_kernel(%arg0: i32, %arg1: i32, %arg2: memref<1x4x256xf32, #tpu.memory_space<vmem>>, %arg3: memref<32x4xf32, #tpu.memory_space<vmem>>, %arg4: memref<32x1xf32, #tpu.memory_space<vmem>>, %arg5: memref<2x16x32xf32, #tpu.memory_space<vmem>>, %arg6: memref<1x8x32x32xf32, #tpu.memory_space<vmem>>, %arg7: memref<32x256xf32, #tpu.memory_space<vmem>>) attributes {dimension_semantics = [#tpu.dimension_semantics<parallel>, #tpu.dimension_semantics<parallel>], iteration_bounds = array<i64: 2, 1>, scalar_prefetch = 0 : i64, scratch_operands = 1 : i64, tpu.core_type = #tpu.core_type<tc>, window_params = [{transform_indices = @transform_0, window_bounds = array<i64: 1, 4, 256>}, {pipeline_mode = #tpu.pipeline_mode<synchronous>, transform_indices = @transform_1, window_bounds = array<i64: 32, 4>}, {pipeline_mode = #tpu.pipeline_mode<synchronous>, transform_indices = @transform_2, window_bounds = array<i64: 32, 1>}, {pipeline_mode = #tpu.pipeline_mode<synchronous>, transform_indices = @transform_3, window_bounds = array<i64: 2, 16, 32>}, {transform_indices = @transform_4, window_bounds = array<i64: 1, 8, 32, 32>}]} {
    %c0 = arith.constant 0 : index
    %c0_0 = arith.constant 0 : index
    %0 = vector.load %arg3[%c0, %c0_0] : memref<32x4xf32, #tpu.memory_space<vmem>>, vector<32x4xf32>
    %c0_1 = arith.constant 0 : index
    %c0_2 = arith.constant 0 : index
    %c0_3 = arith.constant 0 : index
    %1 = vector.load %arg2[%c0_1, %c0_2, %c0_3] : memref<1x4x256xf32, #tpu.memory_space<vmem>>, vector<1x4x256xf32>
    %2 = vector.shape_cast %1 : vector<1x4x256xf32> to vector<4x256xf32>
    %cst = arith.constant dense<0.000000e+00> : vector<32x256xf32>
    %3 = tpu.matmul %0, %2, %cst {dimension_numbers = #tpu.dot_dimension_numbers<[1], [0], [0], [1], [0, 0, 1, 1], [], []>} : vector<32x4xf32>, vector<4x256xf32>, vector<32x256xf32> -> vector<32x256xf32>
    %c0_4 = arith.constant 0 : index
    %c0_5 = arith.constant 0 : index
    %4 = vector.load %arg4[%c0_4, %c0_5] : memref<32x1xf32, #tpu.memory_space<vmem>>, vector<32x1xf32>
    %5 = vector.broadcast %4 : vector<32x1xf32> to vector<32x256xf32>
    %6 = arith.addf %3, %5 : vector<32x256xf32>
    %c0_6 = arith.constant 0 : index
    %c0_7 = arith.constant 0 : index
    %7 = vector.load %arg7[%c0_6, %c0_7] : memref<32x256xf32, #tpu.memory_space<vmem>>, vector<32x256xf32>
    tpu.vector_store %arg7[%c0_6, %c0_7], %6 {strides = array<i32>} : memref<32x256xf32, #tpu.memory_space<vmem>>, vector<32x256xf32>,
    %c0_8 = arith.constant 0 : index
    %c0_9 = arith.constant 0 : index
    %c0_10 = arith.constant 0 : index
    %8 = vector.load %arg5[%c0_8, %c0_9, %c0_10] : memref<2x16x32xf32, #tpu.memory_space<vmem>>, vector<1x16x32xf32>
    %9 = vector.shape_cast %8 : vector<1x16x32xf32> to vector<16x32xf32>
    %c1 = arith.constant 1 : index
    %c0_11 = arith.constant 0 : index
    %c0_12 = arith.constant 0 : index
    %10 = vector.load %arg5[%c1, %c0_11, %c0_12] : memref<2x16x32xf32, #tpu.memory_space<vmem>>, vector<1x16x32xf32>
    %11 = vector.shape_cast %10 : vector<1x16x32xf32> to vector<16x32xf32>
    %c0_13 = arith.constant 0 : index
    %c0_14 = arith.constant 0 : index
    %12 = vector.load %arg7[%c0_13, %c0_14] : memref<32x256xf32, #tpu.memory_space<vmem>>, vector<8x16xf32>
    %c8 = arith.constant 8 : index
    %c0_15 = arith.constant 0 : index
    %13 = vector.load %arg7[%c8, %c0_15] : memref<32x256xf32, #tpu.memory_space<vmem>>, vector<8x16xf32>
    %cst_16 = arith.constant dense<0.000000e+00> : vector<8x32xf32>
    %14 = tpu.matmul %12, %9, %cst_16 {dimension_numbers = #tpu.dot_dimension_numbers<[1], [0], [0], [1], [0, 0, 1, 1], [], []>} : vector<8x16xf32>, vector<16x32xf32>, vector<8x32xf32> -> vector<8x32xf32>
    %cst_17 = arith.constant dense<0.000000e+00> : vector<8x32xf32>
    %15 = tpu.matmul %13, %11, %cst_17 {dimension_numbers = #tpu.dot_dimension_numbers<[1], [0], [0], [1], [0, 0, 1, 1], [], []>} : vector<8x16xf32>, vector<16x32xf32>, vector<8x32xf32> -> vector<8x32xf32>
    %16 = arith.addf %14, %15 : vector<8x32xf32>
    %c0_18 = arith.constant 0 : index
    %c0_19 = arith.constant 0 : index
    %c0_20 = arith.constant 0 : index
    %c0_21 = arith.constant 0 : index
    %17 = vector.load %arg6[%c0_18, %c0_19, %c0_20, %c0_21] : memref<1x8x32x32xf32, #tpu.memory_space<vmem>>, vector<1x8x1x32xf32>
    %18 = vector.shape_cast %17 : vector<1x8x1x32xf32> to vector<8x32xf32>
    %19 = vector.shape_cast %16 : vector<8x32xf32> to vector<1x8x1x32xf32>
    tpu.vector_store %arg6[%c0_18, %c0_19, %c0_20, %c0_21], %19 {strides = array<i32>} : memref<1x8x32x32xf32, #tpu.memory_space<vmem>>, vector<1x8x1x32xf32>,
    %c16 = arith.constant 16 : index
    %c0_22 = arith.constant 0 : index
    %20 = vector.load %arg7[%c16, %c0_22] : memref<32x256xf32, #tpu.memory_space<vmem>>, vector<8x16xf32>
    %c24 = arith.constant 24 : index
    %c0_23 = arith.constant 0 : index
    %21 = vector.load %arg7[%c24, %c0_23] : memref<32x256xf32, #tpu.memory_space<vmem>>, vector<8x16xf32>
    %cst_24 = arith.constant dense<0.000000e+00> : vector<8x32xf32>
    %22 = tpu.matmul %20, %9, %cst_24 {dimension_numbers = #tpu.dot_dimension_numbers<[1], [0], [0], [1], [0, 0, 1, 1], [], []>} : vector<8x16xf32>, vector<16x32xf32>, vector<8x32xf32> -> vector<8x32xf32>
    %cst_25 = arith.constant dense<0.000000e+00> : vector<8x32xf32>
    %23 = tpu.matmul %21, %11, %cst_25 {dimension_numbers = #tpu.dot_dimension_numbers<[1], [0], [0], [1], [0, 0, 1, 1], [], []>} : vector<8x16xf32>, vector<16x32xf32>, vector<8x32xf32> -> vector<8x32xf32>
    %24 = arith.addf %22, %23 : vector<8x32xf32>
    %c0_26 = arith.constant 0 : index
    %c0_27 = arith.constant 0 : index
    %c1_28 = arith.constant 1 : index
    %c0_29 = arith.constant 0 : index
    %25 = vector.load %arg6[%c0_26, %c0_27, %c1_28, %c0_29] : memref<1x8x32x32xf32, #tpu.memory_space<vmem>>, vector<1x8x1x32xf32>
    %26 = vector.shape_cast %25 : vector<1x8x1x32xf32> to vector<8x32xf32>
    %27 = vector.shape_cast %24 : vector<8x32xf32> to vector<1x8x1x32xf32>
    tpu.vector_store %arg6[%c0_26, %c0_27, %c1_28, %c0_29], %27 {strides = array<i32>} : memref<1x8x32x32xf32, #tpu.memory_space<vmem>>, vector<1x8x1x32xf32>,
    %c0_30 = arith.constant 0 : index
    %c16_31 = arith.constant 16 : index
    %28 = vector.load %arg7[%c0_30, %c16_31] : memref<32x256xf32, #tpu.memory_space<vmem>>, vector<8x16xf32>
    %c8_32 = arith.constant 8 : index
    %c16_33 = arith.constant 16 : index
    %29 = vector.load %arg7[%c8_32, %c16_33] : memref<32x256xf32, #tpu.memory_space<vmem>>, vector<8x16xf32>
    %cst_34 = arith.constant dense<0.000000e+00> : vector<8x32xf32>
    %30 = tpu.matmul %28, %9, %cst_34 {dimension_numbers = #tpu.dot_dimension_numbers<[1], [0], [0], [1], [0, 0, 1, 1], [], []>} : vector<8x16xf32>, vector<16x32xf32>, vector<8x32xf32> -> vector<8x32xf32>
    %cst_35 = arith.constant dense<0.000000e+00> : vector<8x32xf32>
    %31 = tpu.matmul %29, %11, %cst_35 {dimension_numbers = #tpu.dot_dimension_numbers<[1], [0], [0], [1], [0, 0, 1, 1], [], []>} : vector<8x16xf32>, vector<16x32xf32>, vector<8x32xf32> -> vector<8x32xf32>
    %32 = arith.addf %30, %31 : vector<8x32xf32>
    %c0_36 = arith.constant 0 : index
    %c0_37 = arith.constant 0 : index
    %c2 = arith.constant 2 : index
    %c0_38 = arith.constant 0 : index
    %33 = vector.load %arg6[%c0_36, %c0_37, %c2, %c0_38] : memref<1x8x32x32xf32, #tpu.memory_space<vmem>>, vector<1x8x1x32xf32>
    %34 = vector.shape_cast %33 : vector<1x8x1x32xf32> to vector<8x32xf32>
    %35 = vector.shape_cast %32 : vector<8x32xf32> to vector<1x8x1x32xf32>
    tpu.vector_store %arg6[%c0_36, %c0_37, %c2, %c0_38], %35 {strides = array<i32>} : memref<1x8x32x32xf32, #tpu.memory_space<vmem>>, vector<1x8x1x32xf32>,
    %c16_39 = arith.constant 16 : index
    %c16_40 = arith.constant 16 : index
    %36 = vector.load %arg7[%c16_39, %c16_40] : memref<32x256xf32, #tpu.memory_space<vmem>>, vector<8x16xf32>
    %c24_41 = arith.constant 24 : index
    %c16_42 = arith.constant 16 : index
    %37 = vector.load %arg7[%c24_41, %c16_42] : memref<32x256xf32, #tpu.memory_space<vmem>>, vector<8x16xf32>
    %cst_43 = arith.constant dense<0.000000e+00> : vector<8x32xf32>
    %38 = tpu.matmul %36, %9, %cst_43 {dimension_numbers = #tpu.dot_dimension_numbers<[1], [0], [0], [1], [0, 0, 1, 1], [], []>} : vector<8x16xf32>, vector<16x32xf32>, vector<8x32xf32> -> vector<8x32xf32>
    %cst_44 = arith.constant dense<0.000000e+00> : vector<8x32xf32>
    %39 = tpu.matmul %37, %11, %cst_44 {dimension_numbers = #tpu.dot_dimension_numbers<[1], [0], [0], [1], [0, 0, 1, 1], [], []>} : vector<8x16xf32>, vector<16x32xf32>, vector<8x32xf32> -> vector<8x32xf32>
    %40 = arith.addf %38, %39 : vector<8x32xf32>
    %c0_45 = arith.constant 0 : index
    %c0_46 = arith.constant 0 : index
    %c3 = arith.constant 3 : index
    %c0_47 = arith.constant 0 : index
    %41 = vector.load %arg6[%c0_45, %c0_46, %c3, %c0_47] : memref<1x8x32x32xf32, #tpu.memory_space<vmem>>, vector<1x8x1x32xf32>
    %42 = vector.shape_cast %41 : vector<1x8x1x32xf32> to vector<8x32xf32>
    %43 = vector.shape_cast %40 : vector<8x32xf32> to vector<1x8x1x32xf32>
    tpu.vector_store %arg6[%c0_45, %c0_46, %c3, %c0_47], %43 {strides = array<i32>} : memref<1x8x32x32xf32, #tpu.memory_space<vmem>>, vector<1x8x1x32xf32>,
    %c0_48 = arith.constant 0 : index
    %c32 = arith.constant 32 : index
    %44 = vector.load %arg7[%c0_48, %c32] : memref<32x256xf32, #tpu.memory_space<vmem>>, vector<8x16xf32>
    %c8_49 = arith.constant 8 : index
    %c32_50 = arith.constant 32 : index
    %45 = vector.load %arg7[%c8_49, %c32_50] : memref<32x256xf32, #tpu.memory_space<vmem>>, vector<8x16xf32>
    %cst_51 = arith.constant dense<0.000000e+00> : vector<8x32xf32>
    %46 = tpu.matmul %44, %9, %cst_51 {dimension_numbers = #tpu.dot_dimension_numbers<[1], [0], [0], [1], [0, 0, 1, 1], [], []>} : vector<8x16xf32>, vector<16x32xf32>, vector<8x32xf32> -> vector<8x32xf32>
    %cst_52 = arith.constant dense<0.000000e+00> : vector<8x32xf32>
    %47 = tpu.matmul %45, %11, %cst_52 {dimension_numbers = #tpu.dot_dimension_numbers<[1], [0], [0], [1], [0, 0, 1, 1], [], []>} : vector<8x16xf32>, vector<16x32xf32>, vector<8x32xf32> -> vector<8x32xf32>
    %48 = arith.addf %46, %47 : vector<8x32xf32>
    %c0_53 = arith.constant 0 : index
    %c0_54 = arith.constant 0 : index
    %c4 = arith.constant 4 : index
    %c0_55 = arith.constant 0 : index
    %49 = vector.load %arg6[%c0_53, %c0_54, %c4, %c0_55] : memref<1x8x32x32xf32, #tpu.memory_space<vmem>>, vector<1x8x1x32xf32>
    %50 = vector.shape_cast %49 : vector<1x8x1x32xf32> to vector<8x32xf32>
    %51 = vector.shape_cast %48 : vector<8x32xf32> to vector<1x8x1x32xf32>
    tpu.vector_store %arg6[%c0_53, %c0_54, %c4, %c0_55], %51 {strides = array<i32>} : memref<1x8x32x32xf32, #tpu.memory_space<vmem>>, vector<1x8x1x32xf32>,
    %c16_56 = arith.constant 16 : index
    %c32_57 = arith.constant 32 : index
    %52 = vector.load %arg7[%c16_56, %c32_57] : memref<32x256xf32, #tpu.memory_space<vmem>>, vector<8x16xf32>
    %c24_58 = arith.constant 24 : index
    %c32_59 = arith.constant 32 : index
    %53 = vector.load %arg7[%c24_58, %c32_59] : memref<32x256xf32, #tpu.memory_space<vmem>>, vector<8x16xf32>
    %cst_60 = arith.constant dense<0.000000e+00> : vector<8x32xf32>
    %54 = tpu.matmul %52, %9, %cst_60 {dimension_numbers = #tpu.dot_dimension_numbers<[1], [0], [0], [1], [0, 0, 1, 1], [], []>} : vector<8x16xf32>, vector<16x32xf32>, vector<8x32xf32> -> vector<8x32xf32>
    %cst_61 = arith.constant dense<0.000000e+00> : vector<8x32xf32>
    %55 = tpu.matmul %53, %11, %cst_61 {dimension_numbers = #tpu.dot_dimension_numbers<[1], [0], [0], [1], [0, 0, 1, 1], [], []>} : vector<8x16xf32>, vector<16x32xf32>, vector<8x32xf32> -> vector<8x32xf32>
    %56 = arith.addf %54, %55 : vector<8x32xf32>
    %c0_62 = arith.constant 0 : index
    %c0_63 = arith.constant 0 : index
    %c5 = arith.constant 5 : index
    %c0_64 = arith.constant 0 : index
    %57 = vector.load %arg6[%c0_62, %c0_63, %c5, %c0_64] : memref<1x8x32x32xf32, #tpu.memory_space<vmem>>, vector<1x8x1x32xf32>
    %58 = vector.shape_cast %57 : vector<1x8x1x32xf32> to vector<8x32xf32>
    %59 = vector.shape_cast %56 : vector<8x32xf32> to vector<1x8x1x32xf32>
    tpu.vector_store %arg6[%c0_62, %c0_63, %c5, %c0_64], %59 {strides = array<i32>} : memref<1x8x32x32xf32, #tpu.memory_space<vmem>>, vector<1x8x1x32xf32>,
    %c0_65 = arith.constant 0 : index
    %c48 = arith.constant 48 : index
    %60 = vector.load %arg7[%c0_65, %c48] : memref<32x256xf32, #tpu.memory_space<vmem>>, vector<8x16xf32>
    %c8_66 = arith.constant 8 : index
    %c48_67 = arith.constant 48 : index
    %61 = vector.load %arg7[%c8_66, %c48_67] : memref<32x256xf32, #tpu.memory_space<vmem>>, vector<8x16xf32>
    %cst_68 = arith.constant dense<0.000000e+00> : vector<8x32xf32>
    %62 = tpu.matmul %60, %9, %cst_68 {dimension_numbers = #tpu.dot_dimension_numbers<[1], [0], [0], [1], [0, 0, 1, 1], [], []>} : vector<8x16xf32>, vector<16x32xf32>, vector<8x32xf32> -> vector<8x32xf32>
    %cst_69 = arith.constant dense<0.000000e+00> : vector<8x32xf32>
    %63 = tpu.matmul %61, %11, %cst_69 {dimension_numbers = #tpu.dot_dimension_numbers<[1], [0], [0], [1], [0, 0, 1, 1], [], []>} : vector<8x16xf32>, vector<16x32xf32>, vector<8x32xf32> -> vector<8x32xf32>
    %64 = arith.addf %62, %63 : vector<8x32xf32>
    %c0_70 = arith.constant 0 : index
    %c0_71 = arith.constant 0 : index
    %c6 = arith.constant 6 : index
    %c0_72 = arith.constant 0 : index
    %65 = vector.load %arg6[%c0_70, %c0_71, %c6, %c0_72] : memref<1x8x32x32xf32, #tpu.memory_space<vmem>>, vector<1x8x1x32xf32>
    %66 = vector.shape_cast %65 : vector<1x8x1x32xf32> to vector<8x32xf32>
    %67 = vector.shape_cast %64 : vector<8x32xf32> to vector<1x8x1x32xf32>
    tpu.vector_store %arg6[%c0_70, %c0_71, %c6, %c0_72], %67 {strides = array<i32>} : memref<1x8x32x32xf32, #tpu.memory_space<vmem>>, vector<1x8x1x32xf32>,
    %c16_73 = arith.constant 16 : index
    %c48_74 = arith.constant 48 : index
    %68 = vector.load %arg7[%c16_73, %c48_74] : memref<32x256xf32, #tpu.memory_space<vmem>>, vector<8x16xf32>
    %c24_75 = arith.constant 24 : index
    %c48_76 = arith.constant 48 : index
    %69 = vector.load %arg7[%c24_75, %c48_76] : memref<32x256xf32, #tpu.memory_space<vmem>>, vector<8x16xf32>
    %cst_77 = arith.constant dense<0.000000e+00> : vector<8x32xf32>
    %70 = tpu.matmul %68, %9, %cst_77 {dimension_numbers = #tpu.dot_dimension_numbers<[1], [0], [0], [1], [0, 0, 1, 1], [], []>} : vector<8x16xf32>, vector<16x32xf32>, vector<8x32xf32> -> vector<8x32xf32>
    %cst_78 = arith.constant dense<0.000000e+00> : vector<8x32xf32>
    %71 = tpu.matmul %69, %11, %cst_78 {dimension_numbers = #tpu.dot_dimension_numbers<[1], [0], [0], [1], [0, 0, 1, 1], [], []>} : vector<8x16xf32>, vector<16x32xf32>, vector<8x32xf32> -> vector<8x32xf32>
    %72 = arith.addf %70, %71 : vector<8x32xf32>
    %c0_79 = arith.constant 0 : index
    %c0_80 = arith.constant 0 : index
    %c7 = arith.constant 7 : index
    %c0_81 = arith.constant 0 : index
    %73 = vector.load %arg6[%c0_79, %c0_80, %c7, %c0_81] : memref<1x8x32x32xf32, #tpu.memory_space<vmem>>, vector<1x8x1x32xf32>
    %74 = vector.shape_cast %73 : vector<1x8x1x32xf32> to vector<8x32xf32>
    %75 = vector.shape_cast %72 : vector<8x32xf32> to vector<1x8x1x32xf32>
    tpu.vector_store %arg6[%c0_79, %c0_80, %c7, %c0_81], %75 {strides = array<i32>} : memref<1x8x32x32xf32, #tpu.memory_space<vmem>>, vector<1x8x1x32xf32>,
    %c0_82 = arith.constant 0 : index
    %c64 = arith.constant 64 : index
    %76 = vector.load %arg7[%c0_82, %c64] : memref<32x256xf32, #tpu.memory_space<vmem>>, vector<8x16xf32>
    %c8_83 = arith.constant 8 : index
    %c64_84 = arith.constant 64 : index
    %77 = vector.load %arg7[%c8_83, %c64_84] : memref<32x256xf32, #tpu.memory_space<vmem>>, vector<8x16xf32>
    %cst_85 = arith.constant dense<0.000000e+00> : vector<8x32xf32>
    %78 = tpu.matmul %76, %9, %cst_85 {dimension_numbers = #tpu.dot_dimension_numbers<[1], [0], [0], [1], [0, 0, 1, 1], [], []>} : vector<8x16xf32>, vector<16x32xf32>, vector<8x32xf32> -> vector<8x32xf32>
    %cst_86 = arith.constant dense<0.000000e+00> : vector<8x32xf32>
    %79 = tpu.matmul %77, %11, %cst_86 {dimension_numbers = #tpu.dot_dimension_numbers<[1], [0], [0], [1], [0, 0, 1, 1], [], []>} : vector<8x16xf32>, vector<16x32xf32>, vector<8x32xf32> -> vector<8x32xf32>
    %80 = arith.addf %78, %79 : vector<8x32xf32>
    %c0_87 = arith.constant 0 : index
    %c0_88 = arith.constant 0 : index
    %c8_89 = arith.constant 8 : index
    %c0_90 = arith.constant 0 : index
    %81 = vector.load %arg6[%c0_87, %c0_88, %c8_89, %c0_90] : memref<1x8x32x32xf32, #tpu.memory_space<vmem>>, vector<1x8x1x32xf32>
    %82 = vector.shape_cast %81 : vector<1x8x1x32xf32> to vector<8x32xf32>
    %83 = vector.shape_cast %80 : vector<8x32xf32> to vector<1x8x1x32xf32>
    tpu.vector_store %arg6[%c0_87, %c0_88, %c8_89, %c0_90], %83 {strides = array<i32>} : memref<1x8x32x32xf32, #tpu.memory_space<vmem>>, vector<1x8x1x32xf32>,
    %c16_91 = arith.constant 16 : index
    %c64_92 = arith.constant 64 : index
    %84 = vector.load %arg7[%c16_91, %c64_92] : memref<32x256xf32, #tpu.memory_space<vmem>>, vector<8x16xf32>
    %c24_93 = arith.constant 24 : index
    %c64_94 = arith.constant 64 : index
    %85 = vector.load %arg7[%c24_93, %c64_94] : memref<32x256xf32, #tpu.memory_space<vmem>>, vector<8x16xf32>
    %cst_95 = arith.constant dense<0.000000e+00> : vector<8x32xf32>
    %86 = tpu.matmul %84, %9, %cst_95 {dimension_numbers = #tpu.dot_dimension_numbers<[1], [0], [0], [1], [0, 0, 1, 1], [], []>} : vector<8x16xf32>, vector<16x32xf32>, vector<8x32xf32> -> vector<8x32xf32>
    %cst_96 = arith.constant dense<0.000000e+00> : vector<8x32xf32>
    %87 = tpu.matmul %85, %11, %cst_96 {dimension_numbers = #tpu.dot_dimension_numbers<[1], [0], [0], [1], [0, 0, 1, 1], [], []>} : vector<8x16xf32>, vector<16x32xf32>, vector<8x32xf32> -> vector<8x32xf32>
    %88 = arith.addf %86, %87 : vector<8x32xf32>
    %c0_97 = arith.constant 0 : index
    %c0_98 = arith.constant 0 : index
    %c9 = arith.constant 9 : index
    %c0_99 = arith.constant 0 : index
    %89 = vector.load %arg6[%c0_97, %c0_98, %c9, %c0_99] : memref<1x8x32x32xf32, #tpu.memory_space<vmem>>, vector<1x8x1x32xf32>
    %90 = vector.shape_cast %89 : vector<1x8x1x32xf32> to vector<8x32xf32>
    %91 = vector.shape_cast %88 : vector<8x32xf32> to vector<1x8x1x32xf32>
    tpu.vector_store %arg6[%c0_97, %c0_98, %c9, %c0_99], %91 {strides = array<i32>} : memref<1x8x32x32xf32, #tpu.memory_space<vmem>>, vector<1x8x1x32xf32>,
    %c0_100 = arith.constant 0 : index
    %c80 = arith.constant 80 : index
    %92 = vector.load %arg7[%c0_100, %c80] : memref<32x256xf32, #tpu.memory_space<vmem>>, vector<8x16xf32>
    %c8_101 = arith.constant 8 : index
    %c80_102 = arith.constant 80 : index
    %93 = vector.load %arg7[%c8_101, %c80_102] : memref<32x256xf32, #tpu.memory_space<vmem>>, vector<8x16xf32>
    %cst_103 = arith.constant dense<0.000000e+00> : vector<8x32xf32>
    %94 = tpu.matmul %92, %9, %cst_103 {dimension_numbers = #tpu.dot_dimension_numbers<[1], [0], [0], [1], [0, 0, 1, 1], [], []>} : vector<8x16xf32>, vector<16x32xf32>, vector<8x32xf32> -> vector<8x32xf32>
    %cst_104 = arith.constant dense<0.000000e+00> : vector<8x32xf32>
    %95 = tpu.matmul %93, %11, %cst_104 {dimension_numbers = #tpu.dot_dimension_numbers<[1], [0], [0], [1], [0, 0, 1, 1], [], []>} : vector<8x16xf32>, vector<16x32xf32>, vector<8x32xf32> -> vector<8x32xf32>
    %96 = arith.addf %94, %95 : vector<8x32xf32>
    %c0_105 = arith.constant 0 : index
    %c0_106 = arith.constant 0 : index
    %c10 = arith.constant 10 : index
    %c0_107 = arith.constant 0 : index
    %97 = vector.load %arg6[%c0_105, %c0_106, %c10, %c0_107] : memref<1x8x32x32xf32, #tpu.memory_space<vmem>>, vector<1x8x1x32xf32>
    %98 = vector.shape_cast %97 : vector<1x8x1x32xf32> to vector<8x32xf32>
    %99 = vector.shape_cast %96 : vector<8x32xf32> to vector<1x8x1x32xf32>
    tpu.vector_store %arg6[%c0_105, %c0_106, %c10, %c0_107], %99 {strides = array<i32>} : memref<1x8x32x32xf32, #tpu.memory_space<vmem>>, vector<1x8x1x32xf32>,
    %c16_108 = arith.constant 16 : index
    %c80_109 = arith.constant 80 : index
    %100 = vector.load %arg7[%c16_108, %c80_109] : memref<32x256xf32, #tpu.memory_space<vmem>>, vector<8x16xf32>
    %c24_110 = arith.constant 24 : index
    %c80_111 = arith.constant 80 : index
    %101 = vector.load %arg7[%c24_110, %c80_111] : memref<32x256xf32, #tpu.memory_space<vmem>>, vector<8x16xf32>
    %cst_112 = arith.constant dense<0.000000e+00> : vector<8x32xf32>
    %102 = tpu.matmul %100, %9, %cst_112 {dimension_numbers = #tpu.dot_dimension_numbers<[1], [0], [0], [1], [0, 0, 1, 1], [], []>} : vector<8x16xf32>, vector<16x32xf32>, vector<8x32xf32> -> vector<8x32xf32>
    %cst_113 = arith.constant dense<0.000000e+00> : vector<8x32xf32>
    %103 = tpu.matmul %101, %11, %cst_113 {dimension_numbers = #tpu.dot_dimension_numbers<[1], [0], [0], [1], [0, 0, 1, 1], [], []>} : vector<8x16xf32>, vector<16x32xf32>, vector<8x32xf32> -> vector<8x32xf32>
    %104 = arith.addf %102, %103 : vector<8x32xf32>
    %c0_114 = arith.constant 0 : index
    %c0_115 = arith.constant 0 : index
    %c11 = arith.constant 11 : index
    %c0_116 = arith.constant 0 : index
    %105 = vector.load %arg6[%c0_114, %c0_115, %c11, %c0_116] : memref<1x8x32x32xf32, #tpu.memory_space<vmem>>, vector<1x8x1x32xf32>
    %106 = vector.shape_cast %105 : vector<1x8x1x32xf32> to vector<8x32xf32>
    %107 = vector.shape_cast %104 : vector<8x32xf32> to vector<1x8x1x32xf32>
    tpu.vector_store %arg6[%c0_114, %c0_115, %c11, %c0_116], %107 {strides = array<i32>} : memref<1x8x32x32xf32, #tpu.memory_space<vmem>>, vector<1x8x1x32xf32>,
    %c0_117 = arith.constant 0 : index
    %c96 = arith.constant 96 : index
    %108 = vector.load %arg7[%c0_117, %c96] : memref<32x256xf32, #tpu.memory_space<vmem>>, vector<8x16xf32>
    %c8_118 = arith.constant 8 : index
    %c96_119 = arith.constant 96 : index
    %109 = vector.load %arg7[%c8_118, %c96_119] : memref<32x256xf32, #tpu.memory_space<vmem>>, vector<8x16xf32>
    %cst_120 = arith.constant dense<0.000000e+00> : vector<8x32xf32>
    %110 = tpu.matmul %108, %9, %cst_120 {dimension_numbers = #tpu.dot_dimension_numbers<[1], [0], [0], [1], [0, 0, 1, 1], [], []>} : vector<8x16xf32>, vector<16x32xf32>, vector<8x32xf32> -> vector<8x32xf32>
    %cst_121 = arith.constant dense<0.000000e+00> : vector<8x32xf32>
    %111 = tpu.matmul %109, %11, %cst_121 {dimension_numbers = #tpu.dot_dimension_numbers<[1], [0], [0], [1], [0, 0, 1, 1], [], []>} : vector<8x16xf32>, vector<16x32xf32>, vector<8x32xf32> -> vector<8x32xf32>
    %112 = arith.addf %110, %111 : vector<8x32xf32>
    %c0_122 = arith.constant 0 : index
    %c0_123 = arith.constant 0 : index
    %c12 = arith.constant 12 : index
    %c0_124 = arith.constant 0 : index
    %113 = vector.load %arg6[%c0_122, %c0_123, %c12, %c0_124] : memref<1x8x32x32xf32, #tpu.memory_space<vmem>>, vector<1x8x1x32xf32>
    %114 = vector.shape_cast %113 : vector<1x8x1x32xf32> to vector<8x32xf32>
    %115 = vector.shape_cast %112 : vector<8x32xf32> to vector<1x8x1x32xf32>
    tpu.vector_store %arg6[%c0_122, %c0_123, %c12, %c0_124], %115 {strides = array<i32>} : memref<1x8x32x32xf32, #tpu.memory_space<vmem>>, vector<1x8x1x32xf32>,
    %c16_125 = arith.constant 16 : index
    %c96_126 = arith.constant 96 : index
    %116 = vector.load %arg7[%c16_125, %c96_126] : memref<32x256xf32, #tpu.memory_space<vmem>>, vector<8x16xf32>
    %c24_127 = arith.constant 24 : index
    %c96_128 = arith.constant 96 : index
    %117 = vector.load %arg7[%c24_127, %c96_128] : memref<32x256xf32, #tpu.memory_space<vmem>>, vector<8x16xf32>
    %cst_129 = arith.constant dense<0.000000e+00> : vector<8x32xf32>
    %118 = tpu.matmul %116, %9, %cst_129 {dimension_numbers = #tpu.dot_dimension_numbers<[1], [0], [0], [1], [0, 0, 1, 1], [], []>} : vector<8x16xf32>, vector<16x32xf32>, vector<8x32xf32> -> vector<8x32xf32>
    %cst_130 = arith.constant dense<0.000000e+00> : vector<8x32xf32>
    %119 = tpu.matmul %117, %11, %cst_130 {dimension_numbers = #tpu.dot_dimension_numbers<[1], [0], [0], [1], [0, 0, 1, 1], [], []>} : vector<8x16xf32>, vector<16x32xf32>, vector<8x32xf32> -> vector<8x32xf32>
    %120 = arith.addf %118, %119 : vector<8x32xf32>
    %c0_131 = arith.constant 0 : index
    %c0_132 = arith.constant 0 : index
    %c13 = arith.constant 13 : index
    %c0_133 = arith.constant 0 : index
    %121 = vector.load %arg6[%c0_131, %c0_132, %c13, %c0_133] : memref<1x8x32x32xf32, #tpu.memory_space<vmem>>, vector<1x8x1x32xf32>
    %122 = vector.shape_cast %121 : vector<1x8x1x32xf32> to vector<8x32xf32>
    %123 = vector.shape_cast %120 : vector<8x32xf32> to vector<1x8x1x32xf32>
    tpu.vector_store %arg6[%c0_131, %c0_132, %c13, %c0_133], %123 {strides = array<i32>} : memref<1x8x32x32xf32, #tpu.memory_space<vmem>>, vector<1x8x1x32xf32>,
    %c0_134 = arith.constant 0 : index
    %c112 = arith.constant 112 : index
    %124 = vector.load %arg7[%c0_134, %c112] : memref<32x256xf32, #tpu.memory_space<vmem>>, vector<8x16xf32>
    %c8_135 = arith.constant 8 : index
    %c112_136 = arith.constant 112 : index
    %125 = vector.load %arg7[%c8_135, %c112_136] : memref<32x256xf32, #tpu.memory_space<vmem>>, vector<8x16xf32>
    %cst_137 = arith.constant dense<0.000000e+00> : vector<8x32xf32>
    %126 = tpu.matmul %124, %9, %cst_137 {dimension_numbers = #tpu.dot_dimension_numbers<[1], [0], [0], [1], [0, 0, 1, 1], [], []>} : vector<8x16xf32>, vector<16x32xf32>, vector<8x32xf32> -> vector<8x32xf32>
    %cst_138 = arith.constant dense<0.000000e+00> : vector<8x32xf32>
    %127 = tpu.matmul %125, %11, %cst_138 {dimension_numbers = #tpu.dot_dimension_numbers<[1], [0], [0], [1], [0, 0, 1, 1], [], []>} : vector<8x16xf32>, vector<16x32xf32>, vector<8x32xf32> -> vector<8x32xf32>
    %128 = arith.addf %126, %127 : vector<8x32xf32>
    %c0_139 = arith.constant 0 : index
    %c0_140 = arith.constant 0 : index
    %c14 = arith.constant 14 : index
    %c0_141 = arith.constant 0 : index
    %129 = vector.load %arg6[%c0_139, %c0_140, %c14, %c0_141] : memref<1x8x32x32xf32, #tpu.memory_space<vmem>>, vector<1x8x1x32xf32>
    %130 = vector.shape_cast %129 : vector<1x8x1x32xf32> to vector<8x32xf32>
    %131 = vector.shape_cast %128 : vector<8x32xf32> to vector<1x8x1x32xf32>
    tpu.vector_store %arg6[%c0_139, %c0_140, %c14, %c0_141], %131 {strides = array<i32>} : memref<1x8x32x32xf32, #tpu.memory_space<vmem>>, vector<1x8x1x32xf32>,
    %c16_142 = arith.constant 16 : index
    %c112_143 = arith.constant 112 : index
    %132 = vector.load %arg7[%c16_142, %c112_143] : memref<32x256xf32, #tpu.memory_space<vmem>>, vector<8x16xf32>
    %c24_144 = arith.constant 24 : index
    %c112_145 = arith.constant 112 : index
    %133 = vector.load %arg7[%c24_144, %c112_145] : memref<32x256xf32, #tpu.memory_space<vmem>>, vector<8x16xf32>
    %cst_146 = arith.constant dense<0.000000e+00> : vector<8x32xf32>
    %134 = tpu.matmul %132, %9, %cst_146 {dimension_numbers = #tpu.dot_dimension_numbers<[1], [0], [0], [1], [0, 0, 1, 1], [], []>} : vector<8x16xf32>, vector<16x32xf32>, vector<8x32xf32> -> vector<8x32xf32>
    %cst_147 = arith.constant dense<0.000000e+00> : vector<8x32xf32>
    %135 = tpu.matmul %133, %11, %cst_147 {dimension_numbers = #tpu.dot_dimension_numbers<[1], [0], [0], [1], [0, 0, 1, 1], [], []>} : vector<8x16xf32>, vector<16x32xf32>, vector<8x32xf32> -> vector<8x32xf32>
    %136 = arith.addf %134, %135 : vector<8x32xf32>
    %c0_148 = arith.constant 0 : index
    %c0_149 = arith.constant 0 : index
    %c15 = arith.constant 15 : index
    %c0_150 = arith.constant 0 : index
    %137 = vector.load %arg6[%c0_148, %c0_149, %c15, %c0_150] : memref<1x8x32x32xf32, #tpu.memory_space<vmem>>, vector<1x8x1x32xf32>
    %138 = vector.shape_cast %137 : vector<1x8x1x32xf32> to vector<8x32xf32>
    %139 = vector.shape_cast %136 : vector<8x32xf32> to vector<1x8x1x32xf32>
    tpu.vector_store %arg6[%c0_148, %c0_149, %c15, %c0_150], %139 {strides = array<i32>} : memref<1x8x32x32xf32, #tpu.memory_space<vmem>>, vector<1x8x1x32xf32>,
    %c0_151 = arith.constant 0 : index
    %c128 = arith.constant 128 : index
    %140 = vector.load %arg7[%c0_151, %c128] : memref<32x256xf32, #tpu.memory_space<vmem>>, vector<8x16xf32>
    %c8_152 = arith.constant 8 : index
    %c128_153 = arith.constant 128 : index
    %141 = vector.load %arg7[%c8_152, %c128_153] : memref<32x256xf32, #tpu.memory_space<vmem>>, vector<8x16xf32>
    %cst_154 = arith.constant dense<0.000000e+00> : vector<8x32xf32>
    %142 = tpu.matmul %140, %9, %cst_154 {dimension_numbers = #tpu.dot_dimension_numbers<[1], [0], [0], [1], [0, 0, 1, 1], [], []>} : vector<8x16xf32>, vector<16x32xf32>, vector<8x32xf32> -> vector<8x32xf32>
    %cst_155 = arith.constant dense<0.000000e+00> : vector<8x32xf32>
    %143 = tpu.matmul %141, %11, %cst_155 {dimension_numbers = #tpu.dot_dimension_numbers<[1], [0], [0], [1], [0, 0, 1, 1], [], []>} : vector<8x16xf32>, vector<16x32xf32>, vector<8x32xf32> -> vector<8x32xf32>
    %144 = arith.addf %142, %143 : vector<8x32xf32>
    %c0_156 = arith.constant 0 : index
    %c0_157 = arith.constant 0 : index
    %c16_158 = arith.constant 16 : index
    %c0_159 = arith.constant 0 : index
    %145 = vector.load %arg6[%c0_156, %c0_157, %c16_158, %c0_159] : memref<1x8x32x32xf32, #tpu.memory_space<vmem>>, vector<1x8x1x32xf32>
    %146 = vector.shape_cast %145 : vector<1x8x1x32xf32> to vector<8x32xf32>
    %147 = vector.shape_cast %144 : vector<8x32xf32> to vector<1x8x1x32xf32>
    tpu.vector_store %arg6[%c0_156, %c0_157, %c16_158, %c0_159], %147 {strides = array<i32>} : memref<1x8x32x32xf32, #tpu.memory_space<vmem>>, vector<1x8x1x32xf32>,
    %c16_160 = arith.constant 16 : index
    %c128_161 = arith.constant 128 : index
    %148 = vector.load %arg7[%c16_160, %c128_161] : memref<32x256xf32, #tpu.memory_space<vmem>>, vector<8x16xf32>
    %c24_162 = arith.constant 24 : index
    %c128_163 = arith.constant 128 : index
    %149 = vector.load %arg7[%c24_162, %c128_163] : memref<32x256xf32, #tpu.memory_space<vmem>>, vector<8x16xf32>
    %cst_164 = arith.constant dense<0.000000e+00> : vector<8x32xf32>
    %150 = tpu.matmul %148, %9, %cst_164 {dimension_numbers = #tpu.dot_dimension_numbers<[1], [0], [0], [1], [0, 0, 1, 1], [], []>} : vector<8x16xf32>, vector<16x32xf32>, vector<8x32xf32> -> vector<8x32xf32>
    %cst_165 = arith.constant dense<0.000000e+00> : vector<8x32xf32>
    %151 = tpu.matmul %149, %11, %cst_165 {dimension_numbers = #tpu.dot_dimension_numbers<[1], [0], [0], [1], [0, 0, 1, 1], [], []>} : vector<8x16xf32>, vector<16x32xf32>, vector<8x32xf32> -> vector<8x32xf32>
    %152 = arith.addf %150, %151 : vector<8x32xf32>
    %c0_166 = arith.constant 0 : index
    %c0_167 = arith.constant 0 : index
    %c17 = arith.constant 17 : index
    %c0_168 = arith.constant 0 : index
    %153 = vector.load %arg6[%c0_166, %c0_167, %c17, %c0_168] : memref<1x8x32x32xf32, #tpu.memory_space<vmem>>, vector<1x8x1x32xf32>
    %154 = vector.shape_cast %153 : vector<1x8x1x32xf32> to vector<8x32xf32>
    %155 = vector.shape_cast %152 : vector<8x32xf32> to vector<1x8x1x32xf32>
    tpu.vector_store %arg6[%c0_166, %c0_167, %c17, %c0_168], %155 {strides = array<i32>} : memref<1x8x32x32xf32, #tpu.memory_space<vmem>>, vector<1x8x1x32xf32>,
    %c0_169 = arith.constant 0 : index
    %c144 = arith.constant 144 : index
    %156 = vector.load %arg7[%c0_169, %c144] : memref<32x256xf32, #tpu.memory_space<vmem>>, vector<8x16xf32>
    %c8_170 = arith.constant 8 : index
    %c144_171 = arith.constant 144 : index
    %157 = vector.load %arg7[%c8_170, %c144_171] : memref<32x256xf32, #tpu.memory_space<vmem>>, vector<8x16xf32>
    %cst_172 = arith.constant dense<0.000000e+00> : vector<8x32xf32>
    %158 = tpu.matmul %156, %9, %cst_172 {dimension_numbers = #tpu.dot_dimension_numbers<[1], [0], [0], [1], [0, 0, 1, 1], [], []>} : vector<8x16xf32>, vector<16x32xf32>, vector<8x32xf32> -> vector<8x32xf32>
    %cst_173 = arith.constant dense<0.000000e+00> : vector<8x32xf32>
    %159 = tpu.matmul %157, %11, %cst_173 {dimension_numbers = #tpu.dot_dimension_numbers<[1], [0], [0], [1], [0, 0, 1, 1], [], []>} : vector<8x16xf32>, vector<16x32xf32>, vector<8x32xf32> -> vector<8x32xf32>
    %160 = arith.addf %158, %159 : vector<8x32xf32>
    %c0_174 = arith.constant 0 : index
    %c0_175 = arith.constant 0 : index
    %c18 = arith.constant 18 : index
    %c0_176 = arith.constant 0 : index
    %161 = vector.load %arg6[%c0_174, %c0_175, %c18, %c0_176] : memref<1x8x32x32xf32, #tpu.memory_space<vmem>>, vector<1x8x1x32xf32>
    %162 = vector.shape_cast %161 : vector<1x8x1x32xf32> to vector<8x32xf32>
    %163 = vector.shape_cast %160 : vector<8x32xf32> to vector<1x8x1x32xf32>
    tpu.vector_store %arg6[%c0_174, %c0_175, %c18, %c0_176], %163 {strides = array<i32>} : memref<1x8x32x32xf32, #tpu.memory_space<vmem>>, vector<1x8x1x32xf32>,
    %c16_177 = arith.constant 16 : index
    %c144_178 = arith.constant 144 : index
    %164 = vector.load %arg7[%c16_177, %c144_178] : memref<32x256xf32, #tpu.memory_space<vmem>>, vector<8x16xf32>
    %c24_179 = arith.constant 24 : index
    %c144_180 = arith.constant 144 : index
    %165 = vector.load %arg7[%c24_179, %c144_180] : memref<32x256xf32, #tpu.memory_space<vmem>>, vector<8x16xf32>
    %cst_181 = arith.constant dense<0.000000e+00> : vector<8x32xf32>
    %166 = tpu.matmul %164, %9, %cst_181 {dimension_numbers = #tpu.dot_dimension_numbers<[1], [0], [0], [1], [0, 0, 1, 1], [], []>} : vector<8x16xf32>, vector<16x32xf32>, vector<8x32xf32> -> vector<8x32xf32>
    %cst_182 = arith.constant dense<0.000000e+00> : vector<8x32xf32>
    %167 = tpu.matmul %165, %11, %cst_182 {dimension_numbers = #tpu.dot_dimension_numbers<[1], [0], [0], [1], [0, 0, 1, 1], [], []>} : vector<8x16xf32>, vector<16x32xf32>, vector<8x32xf32> -> vector<8x32xf32>
    %168 = arith.addf %166, %167 : vector<8x32xf32>
    %c0_183 = arith.constant 0 : index
    %c0_184 = arith.constant 0 : index
    %c19 = arith.constant 19 : index
    %c0_185 = arith.constant 0 : index
    %169 = vector.load %arg6[%c0_183, %c0_184, %c19, %c0_185] : memref<1x8x32x32xf32, #tpu.memory_space<vmem>>, vector<1x8x1x32xf32>
    %170 = vector.shape_cast %169 : vector<1x8x1x32xf32> to vector<8x32xf32>
    %171 = vector.shape_cast %168 : vector<8x32xf32> to vector<1x8x1x32xf32>
    tpu.vector_store %arg6[%c0_183, %c0_184, %c19, %c0_185], %171 {strides = array<i32>} : memref<1x8x32x32xf32, #tpu.memory_space<vmem>>, vector<1x8x1x32xf32>,
    %c0_186 = arith.constant 0 : index
    %c160 = arith.constant 160 : index
    %172 = vector.load %arg7[%c0_186, %c160] : memref<32x256xf32, #tpu.memory_space<vmem>>, vector<8x16xf32>
    %c8_187 = arith.constant 8 : index
    %c160_188 = arith.constant 160 : index
    %173 = vector.load %arg7[%c8_187, %c160_188] : memref<32x256xf32, #tpu.memory_space<vmem>>, vector<8x16xf32>
    %cst_189 = arith.constant dense<0.000000e+00> : vector<8x32xf32>
    %174 = tpu.matmul %172, %9, %cst_189 {dimension_numbers = #tpu.dot_dimension_numbers<[1], [0], [0], [1], [0, 0, 1, 1], [], []>} : vector<8x16xf32>, vector<16x32xf32>, vector<8x32xf32> -> vector<8x32xf32>
    %cst_190 = arith.constant dense<0.000000e+00> : vector<8x32xf32>
    %175 = tpu.matmul %173, %11, %cst_190 {dimension_numbers = #tpu.dot_dimension_numbers<[1], [0], [0], [1], [0, 0, 1, 1], [], []>} : vector<8x16xf32>, vector<16x32xf32>, vector<8x32xf32> -> vector<8x32xf32>
    %176 = arith.addf %174, %175 : vector<8x32xf32>
    %c0_191 = arith.constant 0 : index
    %c0_192 = arith.constant 0 : index
    %c20 = arith.constant 20 : index
    %c0_193 = arith.constant 0 : index
    %177 = vector.load %arg6[%c0_191, %c0_192, %c20, %c0_193] : memref<1x8x32x32xf32, #tpu.memory_space<vmem>>, vector<1x8x1x32xf32>
    %178 = vector.shape_cast %177 : vector<1x8x1x32xf32> to vector<8x32xf32>
    %179 = vector.shape_cast %176 : vector<8x32xf32> to vector<1x8x1x32xf32>
    tpu.vector_store %arg6[%c0_191, %c0_192, %c20, %c0_193], %179 {strides = array<i32>} : memref<1x8x32x32xf32, #tpu.memory_space<vmem>>, vector<1x8x1x32xf32>,
    %c16_194 = arith.constant 16 : index
    %c160_195 = arith.constant 160 : index
    %180 = vector.load %arg7[%c16_194, %c160_195] : memref<32x256xf32, #tpu.memory_space<vmem>>, vector<8x16xf32>
    %c24_196 = arith.constant 24 : index
    %c160_197 = arith.constant 160 : index
    %181 = vector.load %arg7[%c24_196, %c160_197] : memref<32x256xf32, #tpu.memory_space<vmem>>, vector<8x16xf32>
    %cst_198 = arith.constant dense<0.000000e+00> : vector<8x32xf32>
    %182 = tpu.matmul %180, %9, %cst_198 {dimension_numbers = #tpu.dot_dimension_numbers<[1], [0], [0], [1], [0, 0, 1, 1], [], []>} : vector<8x16xf32>, vector<16x32xf32>, vector<8x32xf32> -> vector<8x32xf32>
    %cst_199 = arith.constant dense<0.000000e+00> : vector<8x32xf32>
    %183 = tpu.matmul %181, %11, %cst_199 {dimension_numbers = #tpu.dot_dimension_numbers<[1], [0], [0], [1], [0, 0, 1, 1], [], []>} : vector<8x16xf32>, vector<16x32xf32>, vector<8x32xf32> -> vector<8x32xf32>
    %184 = arith.addf %182, %183 : vector<8x32xf32>
    %c0_200 = arith.constant 0 : index
    %c0_201 = arith.constant 0 : index
    %c21 = arith.constant 21 : index
    %c0_202 = arith.constant 0 : index
    %185 = vector.load %arg6[%c0_200, %c0_201, %c21, %c0_202] : memref<1x8x32x32xf32, #tpu.memory_space<vmem>>, vector<1x8x1x32xf32>
    %186 = vector.shape_cast %185 : vector<1x8x1x32xf32> to vector<8x32xf32>
    %187 = vector.shape_cast %184 : vector<8x32xf32> to vector<1x8x1x32xf32>
    tpu.vector_store %arg6[%c0_200, %c0_201, %c21, %c0_202], %187 {strides = array<i32>} : memref<1x8x32x32xf32, #tpu.memory_space<vmem>>, vector<1x8x1x32xf32>,
    %c0_203 = arith.constant 0 : index
    %c176 = arith.constant 176 : index
    %188 = vector.load %arg7[%c0_203, %c176] : memref<32x256xf32, #tpu.memory_space<vmem>>, vector<8x16xf32>
    %c8_204 = arith.constant 8 : index
    %c176_205 = arith.constant 176 : index
    %189 = vector.load %arg7[%c8_204, %c176_205] : memref<32x256xf32, #tpu.memory_space<vmem>>, vector<8x16xf32>
    %cst_206 = arith.constant dense<0.000000e+00> : vector<8x32xf32>
    %190 = tpu.matmul %188, %9, %cst_206 {dimension_numbers = #tpu.dot_dimension_numbers<[1], [0], [0], [1], [0, 0, 1, 1], [], []>} : vector<8x16xf32>, vector<16x32xf32>, vector<8x32xf32> -> vector<8x32xf32>
    %cst_207 = arith.constant dense<0.000000e+00> : vector<8x32xf32>
    %191 = tpu.matmul %189, %11, %cst_207 {dimension_numbers = #tpu.dot_dimension_numbers<[1], [0], [0], [1], [0, 0, 1, 1], [], []>} : vector<8x16xf32>, vector<16x32xf32>, vector<8x32xf32> -> vector<8x32xf32>
    %192 = arith.addf %190, %191 : vector<8x32xf32>
    %c0_208 = arith.constant 0 : index
    %c0_209 = arith.constant 0 : index
    %c22 = arith.constant 22 : index
    %c0_210 = arith.constant 0 : index
    %193 = vector.load %arg6[%c0_208, %c0_209, %c22, %c0_210] : memref<1x8x32x32xf32, #tpu.memory_space<vmem>>, vector<1x8x1x32xf32>
    %194 = vector.shape_cast %193 : vector<1x8x1x32xf32> to vector<8x32xf32>
    %195 = vector.shape_cast %192 : vector<8x32xf32> to vector<1x8x1x32xf32>
    tpu.vector_store %arg6[%c0_208, %c0_209, %c22, %c0_210], %195 {strides = array<i32>} : memref<1x8x32x32xf32, #tpu.memory_space<vmem>>, vector<1x8x1x32xf32>,
    %c16_211 = arith.constant 16 : index
    %c176_212 = arith.constant 176 : index
    %196 = vector.load %arg7[%c16_211, %c176_212] : memref<32x256xf32, #tpu.memory_space<vmem>>, vector<8x16xf32>
    %c24_213 = arith.constant 24 : index
    %c176_214 = arith.constant 176 : index
    %197 = vector.load %arg7[%c24_213, %c176_214] : memref<32x256xf32, #tpu.memory_space<vmem>>, vector<8x16xf32>
    %cst_215 = arith.constant dense<0.000000e+00> : vector<8x32xf32>
    %198 = tpu.matmul %196, %9, %cst_215 {dimension_numbers = #tpu.dot_dimension_numbers<[1], [0], [0], [1], [0, 0, 1, 1], [], []>} : vector<8x16xf32>, vector<16x32xf32>, vector<8x32xf32> -> vector<8x32xf32>
    %cst_216 = arith.constant dense<0.000000e+00> : vector<8x32xf32>
    %199 = tpu.matmul %197, %11, %cst_216 {dimension_numbers = #tpu.dot_dimension_numbers<[1], [0], [0], [1], [0, 0, 1, 1], [], []>} : vector<8x16xf32>, vector<16x32xf32>, vector<8x32xf32> -> vector<8x32xf32>
    %200 = arith.addf %198, %199 : vector<8x32xf32>
    %c0_217 = arith.constant 0 : index
    %c0_218 = arith.constant 0 : index
    %c23 = arith.constant 23 : index
    %c0_219 = arith.constant 0 : index
    %201 = vector.load %arg6[%c0_217, %c0_218, %c23, %c0_219] : memref<1x8x32x32xf32, #tpu.memory_space<vmem>>, vector<1x8x1x32xf32>
    %202 = vector.shape_cast %201 : vector<1x8x1x32xf32> to vector<8x32xf32>
    %203 = vector.shape_cast %200 : vector<8x32xf32> to vector<1x8x1x32xf32>
    tpu.vector_store %arg6[%c0_217, %c0_218, %c23, %c0_219], %203 {strides = array<i32>} : memref<1x8x32x32xf32, #tpu.memory_space<vmem>>, vector<1x8x1x32xf32>,
    %c0_220 = arith.constant 0 : index
    %c192 = arith.constant 192 : index
    %204 = vector.load %arg7[%c0_220, %c192] : memref<32x256xf32, #tpu.memory_space<vmem>>, vector<8x16xf32>
    %c8_221 = arith.constant 8 : index
    %c192_222 = arith.constant 192 : index
    %205 = vector.load %arg7[%c8_221, %c192_222] : memref<32x256xf32, #tpu.memory_space<vmem>>, vector<8x16xf32>
    %cst_223 = arith.constant dense<0.000000e+00> : vector<8x32xf32>
    %206 = tpu.matmul %204, %9, %cst_223 {dimension_numbers = #tpu.dot_dimension_numbers<[1], [0], [0], [1], [0, 0, 1, 1], [], []>} : vector<8x16xf32>, vector<16x32xf32>, vector<8x32xf32> -> vector<8x32xf32>
    %cst_224 = arith.constant dense<0.000000e+00> : vector<8x32xf32>
    %207 = tpu.matmul %205, %11, %cst_224 {dimension_numbers = #tpu.dot_dimension_numbers<[1], [0], [0], [1], [0, 0, 1, 1], [], []>} : vector<8x16xf32>, vector<16x32xf32>, vector<8x32xf32> -> vector<8x32xf32>
    %208 = arith.addf %206, %207 : vector<8x32xf32>
    %c0_225 = arith.constant 0 : index
    %c0_226 = arith.constant 0 : index
    %c24_227 = arith.constant 24 : index
    %c0_228 = arith.constant 0 : index
    %209 = vector.load %arg6[%c0_225, %c0_226, %c24_227, %c0_228] : memref<1x8x32x32xf32, #tpu.memory_space<vmem>>, vector<1x8x1x32xf32>
    %210 = vector.shape_cast %209 : vector<1x8x1x32xf32> to vector<8x32xf32>
    %211 = vector.shape_cast %208 : vector<8x32xf32> to vector<1x8x1x32xf32>
    tpu.vector_store %arg6[%c0_225, %c0_226, %c24_227, %c0_228], %211 {strides = array<i32>} : memref<1x8x32x32xf32, #tpu.memory_space<vmem>>, vector<1x8x1x32xf32>,
    %c16_229 = arith.constant 16 : index
    %c192_230 = arith.constant 192 : index
    %212 = vector.load %arg7[%c16_229, %c192_230] : memref<32x256xf32, #tpu.memory_space<vmem>>, vector<8x16xf32>
    %c24_231 = arith.constant 24 : index
    %c192_232 = arith.constant 192 : index
    %213 = vector.load %arg7[%c24_231, %c192_232] : memref<32x256xf32, #tpu.memory_space<vmem>>, vector<8x16xf32>
    %cst_233 = arith.constant dense<0.000000e+00> : vector<8x32xf32>
    %214 = tpu.matmul %212, %9, %cst_233 {dimension_numbers = #tpu.dot_dimension_numbers<[1], [0], [0], [1], [0, 0, 1, 1], [], []>} : vector<8x16xf32>, vector<16x32xf32>, vector<8x32xf32> -> vector<8x32xf32>
    %cst_234 = arith.constant dense<0.000000e+00> : vector<8x32xf32>
    %215 = tpu.matmul %213, %11, %cst_234 {dimension_numbers = #tpu.dot_dimension_numbers<[1], [0], [0], [1], [0, 0, 1, 1], [], []>} : vector<8x16xf32>, vector<16x32xf32>, vector<8x32xf32> -> vector<8x32xf32>
    %216 = arith.addf %214, %215 : vector<8x32xf32>
    %c0_235 = arith.constant 0 : index
    %c0_236 = arith.constant 0 : index
    %c25 = arith.constant 25 : index
    %c0_237 = arith.constant 0 : index
    %217 = vector.load %arg6[%c0_235, %c0_236, %c25, %c0_237] : memref<1x8x32x32xf32, #tpu.memory_space<vmem>>, vector<1x8x1x32xf32>
    %218 = vector.shape_cast %217 : vector<1x8x1x32xf32> to vector<8x32xf32>
    %219 = vector.shape_cast %216 : vector<8x32xf32> to vector<1x8x1x32xf32>
    tpu.vector_store %arg6[%c0_235, %c0_236, %c25, %c0_237], %219 {strides = array<i32>} : memref<1x8x32x32xf32, #tpu.memory_space<vmem>>, vector<1x8x1x32xf32>,
    %c0_238 = arith.constant 0 : index
    %c208 = arith.constant 208 : index
    %220 = vector.load %arg7[%c0_238, %c208] : memref<32x256xf32, #tpu.memory_space<vmem>>, vector<8x16xf32>
    %c8_239 = arith.constant 8 : index
    %c208_240 = arith.constant 208 : index
    %221 = vector.load %arg7[%c8_239, %c208_240] : memref<32x256xf32, #tpu.memory_space<vmem>>, vector<8x16xf32>
    %cst_241 = arith.constant dense<0.000000e+00> : vector<8x32xf32>
    %222 = tpu.matmul %220, %9, %cst_241 {dimension_numbers = #tpu.dot_dimension_numbers<[1], [0], [0], [1], [0, 0, 1, 1], [], []>} : vector<8x16xf32>, vector<16x32xf32>, vector<8x32xf32> -> vector<8x32xf32>
    %cst_242 = arith.constant dense<0.000000e+00> : vector<8x32xf32>
    %223 = tpu.matmul %221, %11, %cst_242 {dimension_numbers = #tpu.dot_dimension_numbers<[1], [0], [0], [1], [0, 0, 1, 1], [], []>} : vector<8x16xf32>, vector<16x32xf32>, vector<8x32xf32> -> vector<8x32xf32>
    %224 = arith.addf %222, %223 : vector<8x32xf32>
    %c0_243 = arith.constant 0 : index
    %c0_244 = arith.constant 0 : index
    %c26 = arith.constant 26 : index
    %c0_245 = arith.constant 0 : index
    %225 = vector.load %arg6[%c0_243, %c0_244, %c26, %c0_245] : memref<1x8x32x32xf32, #tpu.memory_space<vmem>>, vector<1x8x1x32xf32>
    %226 = vector.shape_cast %225 : vector<1x8x1x32xf32> to vector<8x32xf32>
    %227 = vector.shape_cast %224 : vector<8x32xf32> to vector<1x8x1x32xf32>
    tpu.vector_store %arg6[%c0_243, %c0_244, %c26, %c0_245], %227 {strides = array<i32>} : memref<1x8x32x32xf32, #tpu.memory_space<vmem>>, vector<1x8x1x32xf32>,
    %c16_246 = arith.constant 16 : index
    %c208_247 = arith.constant 208 : index
    %228 = vector.load %arg7[%c16_246, %c208_247] : memref<32x256xf32, #tpu.memory_space<vmem>>, vector<8x16xf32>
    %c24_248 = arith.constant 24 : index
    %c208_249 = arith.constant 208 : index
    %229 = vector.load %arg7[%c24_248, %c208_249] : memref<32x256xf32, #tpu.memory_space<vmem>>, vector<8x16xf32>
    %cst_250 = arith.constant dense<0.000000e+00> : vector<8x32xf32>
    %230 = tpu.matmul %228, %9, %cst_250 {dimension_numbers = #tpu.dot_dimension_numbers<[1], [0], [0], [1], [0, 0, 1, 1], [], []>} : vector<8x16xf32>, vector<16x32xf32>, vector<8x32xf32> -> vector<8x32xf32>
    %cst_251 = arith.constant dense<0.000000e+00> : vector<8x32xf32>
    %231 = tpu.matmul %229, %11, %cst_251 {dimension_numbers = #tpu.dot_dimension_numbers<[1], [0], [0], [1], [0, 0, 1, 1], [], []>} : vector<8x16xf32>, vector<16x32xf32>, vector<8x32xf32> -> vector<8x32xf32>
    %232 = arith.addf %230, %231 : vector<8x32xf32>
    %c0_252 = arith.constant 0 : index
    %c0_253 = arith.constant 0 : index
    %c27 = arith.constant 27 : index
    %c0_254 = arith.constant 0 : index
    %233 = vector.load %arg6[%c0_252, %c0_253, %c27, %c0_254] : memref<1x8x32x32xf32, #tpu.memory_space<vmem>>, vector<1x8x1x32xf32>
    %234 = vector.shape_cast %233 : vector<1x8x1x32xf32> to vector<8x32xf32>
    %235 = vector.shape_cast %232 : vector<8x32xf32> to vector<1x8x1x32xf32>
    tpu.vector_store %arg6[%c0_252, %c0_253, %c27, %c0_254], %235 {strides = array<i32>} : memref<1x8x32x32xf32, #tpu.memory_space<vmem>>, vector<1x8x1x32xf32>,
    %c0_255 = arith.constant 0 : index
    %c224 = arith.constant 224 : index
    %236 = vector.load %arg7[%c0_255, %c224] : memref<32x256xf32, #tpu.memory_space<vmem>>, vector<8x16xf32>
    %c8_256 = arith.constant 8 : index
    %c224_257 = arith.constant 224 : index
    %237 = vector.load %arg7[%c8_256, %c224_257] : memref<32x256xf32, #tpu.memory_space<vmem>>, vector<8x16xf32>
    %cst_258 = arith.constant dense<0.000000e+00> : vector<8x32xf32>
    %238 = tpu.matmul %236, %9, %cst_258 {dimension_numbers = #tpu.dot_dimension_numbers<[1], [0], [0], [1], [0, 0, 1, 1], [], []>} : vector<8x16xf32>, vector<16x32xf32>, vector<8x32xf32> -> vector<8x32xf32>
    %cst_259 = arith.constant dense<0.000000e+00> : vector<8x32xf32>
    %239 = tpu.matmul %237, %11, %cst_259 {dimension_numbers = #tpu.dot_dimension_numbers<[1], [0], [0], [1], [0, 0, 1, 1], [], []>} : vector<8x16xf32>, vector<16x32xf32>, vector<8x32xf32> -> vector<8x32xf32>
    %240 = arith.addf %238, %239 : vector<8x32xf32>
    %c0_260 = arith.constant 0 : index
    %c0_261 = arith.constant 0 : index
    %c28 = arith.constant 28 : index
    %c0_262 = arith.constant 0 : index
    %241 = vector.load %arg6[%c0_260, %c0_261, %c28, %c0_262] : memref<1x8x32x32xf32, #tpu.memory_space<vmem>>, vector<1x8x1x32xf32>
    %242 = vector.shape_cast %241 : vector<1x8x1x32xf32> to vector<8x32xf32>
    %243 = vector.shape_cast %240 : vector<8x32xf32> to vector<1x8x1x32xf32>
    tpu.vector_store %arg6[%c0_260, %c0_261, %c28, %c0_262], %243 {strides = array<i32>} : memref<1x8x32x32xf32, #tpu.memory_space<vmem>>, vector<1x8x1x32xf32>,
    %c16_263 = arith.constant 16 : index
    %c224_264 = arith.constant 224 : index
    %244 = vector.load %arg7[%c16_263, %c224_264] : memref<32x256xf32, #tpu.memory_space<vmem>>, vector<8x16xf32>
    %c24_265 = arith.constant 24 : index
    %c224_266 = arith.constant 224 : index
    %245 = vector.load %arg7[%c24_265, %c224_266] : memref<32x256xf32, #tpu.memory_space<vmem>>, vector<8x16xf32>
    %cst_267 = arith.constant dense<0.000000e+00> : vector<8x32xf32>
    %246 = tpu.matmul %244, %9, %cst_267 {dimension_numbers = #tpu.dot_dimension_numbers<[1], [0], [0], [1], [0, 0, 1, 1], [], []>} : vector<8x16xf32>, vector<16x32xf32>, vector<8x32xf32> -> vector<8x32xf32>
    %cst_268 = arith.constant dense<0.000000e+00> : vector<8x32xf32>
    %247 = tpu.matmul %245, %11, %cst_268 {dimension_numbers = #tpu.dot_dimension_numbers<[1], [0], [0], [1], [0, 0, 1, 1], [], []>} : vector<8x16xf32>, vector<16x32xf32>, vector<8x32xf32> -> vector<8x32xf32>
    %248 = arith.addf %246, %247 : vector<8x32xf32>
    %c0_269 = arith.constant 0 : index
    %c0_270 = arith.constant 0 : index
    %c29 = arith.constant 29 : index
    %c0_271 = arith.constant 0 : index
    %249 = vector.load %arg6[%c0_269, %c0_270, %c29, %c0_271] : memref<1x8x32x32xf32, #tpu.memory_space<vmem>>, vector<1x8x1x32xf32>
    %250 = vector.shape_cast %249 : vector<1x8x1x32xf32> to vector<8x32xf32>
    %251 = vector.shape_cast %248 : vector<8x32xf32> to vector<1x8x1x32xf32>
    tpu.vector_store %arg6[%c0_269, %c0_270, %c29, %c0_271], %251 {strides = array<i32>} : memref<1x8x32x32xf32, #tpu.memory_space<vmem>>, vector<1x8x1x32xf32>,
    %c0_272 = arith.constant 0 : index
    %c240 = arith.constant 240 : index
    %252 = vector.load %arg7[%c0_272, %c240] : memref<32x256xf32, #tpu.memory_space<vmem>>, vector<8x16xf32>
    %c8_273 = arith.constant 8 : index
    %c240_274 = arith.constant 240 : index
    %253 = vector.load %arg7[%c8_273, %c240_274] : memref<32x256xf32, #tpu.memory_space<vmem>>, vector<8x16xf32>
    %cst_275 = arith.constant dense<0.000000e+00> : vector<8x32xf32>
    %254 = tpu.matmul %252, %9, %cst_275 {dimension_numbers = #tpu.dot_dimension_numbers<[1], [0], [0], [1], [0, 0, 1, 1], [], []>} : vector<8x16xf32>, vector<16x32xf32>, vector<8x32xf32> -> vector<8x32xf32>
    %cst_276 = arith.constant dense<0.000000e+00> : vector<8x32xf32>
    %255 = tpu.matmul %253, %11, %cst_276 {dimension_numbers = #tpu.dot_dimension_numbers<[1], [0], [0], [1], [0, 0, 1, 1], [], []>} : vector<8x16xf32>, vector<16x32xf32>, vector<8x32xf32> -> vector<8x32xf32>
    %256 = arith.addf %254, %255 : vector<8x32xf32>
    %c0_277 = arith.constant 0 : index
    %c0_278 = arith.constant 0 : index
    %c30 = arith.constant 30 : index
    %c0_279 = arith.constant 0 : index
    %257 = vector.load %arg6[%c0_277, %c0_278, %c30, %c0_279] : memref<1x8x32x32xf32, #tpu.memory_space<vmem>>, vector<1x8x1x32xf32>
    %258 = vector.shape_cast %257 : vector<1x8x1x32xf32> to vector<8x32xf32>
    %259 = vector.shape_cast %256 : vector<8x32xf32> to vector<1x8x1x32xf32>
    tpu.vector_store %arg6[%c0_277, %c0_278, %c30, %c0_279], %259 {strides = array<i32>} : memref<1x8x32x32xf32, #tpu.memory_space<vmem>>, vector<1x8x1x32xf32>,
    %c16_280 = arith.constant 16 : index
    %c240_281 = arith.constant 240 : index
    %260 = vector.load %arg7[%c16_280, %c240_281] : memref<32x256xf32, #tpu.memory_space<vmem>>, vector<8x16xf32>
    %c24_282 = arith.constant 24 : index
    %c240_283 = arith.constant 240 : index
    %261 = vector.load %arg7[%c24_282, %c240_283] : memref<32x256xf32, #tpu.memory_space<vmem>>, vector<8x16xf32>
    %cst_284 = arith.constant dense<0.000000e+00> : vector<8x32xf32>
    %262 = tpu.matmul %260, %9, %cst_284 {dimension_numbers = #tpu.dot_dimension_numbers<[1], [0], [0], [1], [0, 0, 1, 1], [], []>} : vector<8x16xf32>, vector<16x32xf32>, vector<8x32xf32> -> vector<8x32xf32>
    %cst_285 = arith.constant dense<0.000000e+00> : vector<8x32xf32>
    %263 = tpu.matmul %261, %11, %cst_285 {dimension_numbers = #tpu.dot_dimension_numbers<[1], [0], [0], [1], [0, 0, 1, 1], [], []>} : vector<8x16xf32>, vector<16x32xf32>, vector<8x32xf32> -> vector<8x32xf32>
    %264 = arith.addf %262, %263 : vector<8x32xf32>
    %c0_286 = arith.constant 0 : index
    %c0_287 = arith.constant 0 : index
    %c31 = arith.constant 31 : index
    %c0_288 = arith.constant 0 : index
    %265 = vector.load %arg6[%c0_286, %c0_287, %c31, %c0_288] : memref<1x8x32x32xf32, #tpu.memory_space<vmem>>, vector<1x8x1x32xf32>
    %266 = vector.shape_cast %265 : vector<1x8x1x32xf32> to vector<8x32xf32>
    %267 = vector.shape_cast %264 : vector<8x32xf32> to vector<1x8x1x32xf32>
    tpu.vector_store %arg6[%c0_286, %c0_287, %c31, %c0_288], %267 {strides = array<i32>} : memref<1x8x32x32xf32, #tpu.memory_space<vmem>>, vector<1x8x1x32xf32>,
    return
  }
  func.func @transform_0(%arg0: i32, %arg1: i32) -> (i32, i32, i32) {
    %c0_i32 = arith.constant 0 : i32
    %c0_i32_0 = arith.constant 0 : i32
    return %arg0, %c0_i32, %arg1 : i32, i32, i32
  }
  func.func @transform_1(%arg0: i32, %arg1: i32) -> (i32, i32) {
    %c0_i32 = arith.constant 0 : i32
    %c0_i32_0 = arith.constant 0 : i32
    %c0_i32_1 = arith.constant 0 : i32
    return %c0_i32, %c0_i32_0 : i32, i32
  }
  func.func @transform_2(%arg0: i32, %arg1: i32) -> (i32, i32) {
    %c0_i32 = arith.constant 0 : i32
    %c0_i32_0 = arith.constant 0 : i32
    %c0_i32_1 = arith.constant 0 : i32
    return %c0_i32, %c0_i32_0 : i32, i32
  }
  func.func @transform_3(%arg0: i32, %arg1: i32) -> (i32, i32, i32) {
    %c0_i32 = arith.constant 0 : i32
    %c0_i32_0 = arith.constant 0 : i32
    %c0_i32_1 = arith.constant 0 : i32
    %c0_i32_2 = arith.constant 0 : i32
    return %c0_i32, %c0_i32_0, %c0_i32_1 : i32, i32, i32
  }
  func.func @transform_4(%arg0: i32, %arg1: i32) -> (i32, i32, i32, i32) {
    %c0_i32 = arith.constant 0 : i32
    %c0_i32_0 = arith.constant 0 : i32
    %c0_i32_1 = arith.constant 0 : i32
    return %arg0, %c0_i32, %arg1, %c0_i32_0 : i32, i32, i32, i32
  }
}

</mosaic_0001>

<bundles_post_ra>
// kernel: tile.8
= control target key start
LH: loop header
LB: loop body
LE: loop exit
PB: predicated region body
PF: predicated region fallthrough
CT: control target
= control target key end

     0   :  { %s22_s0 = inlined_call_operand.vmem [shape: f32[8], index: 0, kind: input, shape index: {}]   ;;  %s23_s1 = inlined_call_operand.vmem [shape: f32[4,8], index: 1, kind: output, shape index: {}]  }
   0x1   :  { %v4_v0 = vld [vmem:[%s22_s0] ss:$0 sm:$0xff] }
   0x2   :  { %5 = vst [vmem:[%s23_s1] sm:$0xf] %v4_v0 }

// kernel: tile.0
= control target key start
LH: loop header
LB: loop body
LE: loop exit
PB: predicated region body
PF: predicated region fallthrough
CT: control target
= control target key end

     0   :  { %s66_s8 = smov 125   ;;  %vm7_vm0 = vcmask 7168   ;;  %s67_s11 = smov 126   ;;  %s117_s0 = inlined_call_operand.vmem [shape: f32[4,8], index: 0, kind: input, shape index: {}]   ;;  %s118_s1 = inlined_call_operand.vmem [shape: f32[32,1], index: 1, kind: output, shape index: {}]  }
   0x1   :  { %v4_v0 = vld [vmem:[%s117_s0] sm:$0xf]  ;;  %s65_s0 = smov 127   ;;  %s68_s12 = smov 124  }
   0x2   :  { %5 = vst [vmem:[#allocation0] sm:$0xf] %v4_v0  ;;  %s69_s13 = smov 123   ;;  %s70_s14 = smov 122  }
   0x3   :  { %s71_s15 = smov 121  }
   0x9   :  { %v9_v1 = vld [vmem:[#allocation0] sm:$0xf]  }
   0xa   :  { %v21_v2 = vld [vmem:[#allocation0] sm:$0xf]   ;;  %10 = vrot.lane.b32.xlu0 %v9_v1, %s65_s0 }
   0xb   :  { %22 = vrot.lane.b32.xlu1 %v21_v2, %s66_s8  ;;  %v15_v3 = vld [vmem:[#allocation0] sm:$0xf]  }
   0xc   :  { %v27_v4 = vld [vmem:[#allocation0] sm:$0xf]  }
   0xd   :  { %v6_v5 = vld [vmem:[#allocation0] sm:$0xf]  }
   0xe   :  { %8 = vst.msk [vmem:[%s118_s1] ss:$8 sm:$0xf] %vm7_vm0, %v6_v5   ;;  %16 = vrot.lane.b32.xlu0 %v15_v3, %s67_s11  ;;  %v33_v6 = vld [vmem:[#allocation0] sm:$0xf]  }
   0xf   :  { %28 = vrot.lane.b32.xlu1 %v27_v4, %s68_s12  ;;  %v39_v7 = vld [vmem:[#allocation0] sm:$0xf]  }
  0x10   :  { %v45_v8 = vld [vmem:[#allocation0] sm:$0xf]  }
  0x12   :  { %34 = vrot.lane.b32.xlu0 %v33_v6, %s69_s13 }
  0x13   :  { %40 = vrot.lane.b32.xlu1 %v39_v7, %s70_s14 }
  0x16   :  { %46 = vrot.lane.b32.xlu0 %v45_v8, %s71_s15 }
  0x7c   :  { %v11_v9 = vpop.permute.xlu0 %10  }
  0x7d   :  { %v23_v10 = vpop.permute.xlu1 %22   ;;  %51 = vst.msk [vmem:[%s118_s1 + $0x1] ss:$8 sm:$0xf] %vm7_vm0, %v11_v9  }
  0x7e   :  { %53 = vst.msk [vmem:[%s118_s1 + $0x3] ss:$8 sm:$0xf] %vm7_vm0, %v23_v10  }
  0x80   :  { %v17_v11 = vpop.permute.xlu0 %16  }
  0x81   :  { %v29_v12 = vpop.permute.xlu1 %28   ;;  %52 = vst.msk [vmem:[%s118_s1 + $0x2] ss:$8 sm:$0xf] %vm7_vm0, %v17_v11  }
  0x82   :  { %54 = vst.msk [vmem:[%s118_s1 + $0x4] ss:$8 sm:$0xf] %vm7_vm0, %v29_v12  }
  0x84   :  { %v35_v13 = vpop.permute.xlu0 %34  }
  0x85   :  { %v41_v14 = vpop.permute.xlu1 %40   ;;  %55 = vst.msk [vmem:[%s118_s1 + $0x5] ss:$8 sm:$0xf] %vm7_vm0, %v35_v13  }
  0x86   :  { %56 = vst.msk [vmem:[%s118_s1 + $0x6] ss:$8 sm:$0xf] %vm7_vm0, %v41_v14  }
  0x88   :  { %v47_v15 = vpop.permute.xlu0 %46  }
  0x89   :  { %57 = vst.msk [vmem:[%s118_s1 + $0x7] ss:$8 sm:$0xf] %vm7_vm0, %v47_v15  }

// kernel: upsample_forward.1
= control target key start
LH: loop header
LB: loop body
LE: loop exit
PB: predicated region body
PF: predicated region fallthrough
CT: control target
= control target key end

     0   :  { %9 = vsyncpa [#allocation4], 0  ;;  %s9905_s0 = inlined_call_operand.vmem [shape: f32[2,4,256], index: 0, kind: input, shape index: {}]   ;;  %s9906_s1 = inlined_call_operand.vmem [shape: f32[32,4], index: 1, kind: input, shape index: {}]   ;;  %s9907_s2 = inlined_call_operand.vmem [shape: f32[32,1], index: 2, kind: input, shape index: {}]   ;;  %s9908_s3 = inlined_call_operand.vmem [shape: f32[2,16,32], index: 3, kind: input, shape index: {}]   ;;  %s9909_s4 = inlined_call_operand.hbm [shape: f32[2,8,32,32], index: 4, kind: output, shape index: {}]  }
   0x1   :  { %11 = vsyncpa [#allocation4 + $0x1], 0  ;;  %s8610_s15 = smov 0   ;;  %s8612_s16 = smov 0  }
   0x2   :  { %s8614_s17 = smov 0   ;;  %s8616_s18 = smov 0  }
   0x3   :  { %s8618_s19 = smov 0   ;;  %s8620_s20 = smov 0  }
   0x4 LB: > { %s7435_s21 = sadd.s32 4294967295, %s8568_s20   ;;  %s7436_s22 = sadd.s32 4294967294, %s8568_s20   ;;  %s8568_s20 = sphi %s8620_s20, %s17_s20   ;;  %s8564_s19 = sphi %s8618_s19, %s9916_s19   ;;  %s8560_s18 = sphi %s8616_s18, %s9915_s18   ;;  %s8556_s17 = sphi %s8614_s17, %s9914_s17   ;;  %s8552_s16 = sphi %s8612_s16, %s9913_s16   ;;  %s8548_s15 = sphi %s8610_s15, %s9912_s15  }
   0x5   : > { %s29_s23 = sadd.s32 1, %s8564_s19  ;;  %s129_s24 = sadd.s32 1, %s8556_s17 }
   0x6   : > { %p31_p0 = scmp.ge.s32.totalorder %s29_s23, 2  ;;  %p139_p1 = scmp.ne.s32.totalorder %s8556_s17, %s8552_s16 }
   0x7   : > { %p140_p2 = scmp.eq.s32.totalorder %s7435_s21, 1  ;;  %p145_p3 = scmp.ne.s32.totalorder %s8552_s16, %s8548_s15 }
   0x8   : > { %s9918_s23 = smov (%p31_p0, %s29_s23), 0  ;;  %p146_p5 = scmp.eq.s32.totalorder %s7436_s22, 1 }
   0x9   : > { %p8650_p4 = por %p140_p2, %p139_p1  ;;  %s124_s26 = ssub.s32 %s8564_s19, %s9918_s23 }
   0xa   : > { %p7439_p6 = scmp.ge.s32.totalorder %s8568_s20, 1  ;;  %p127_p7 = scmp.eq.s32.totalorder %s124_s26, 0 }
   0xb   : > { %p8657_p8 = por %p146_p5, %p145_p3  ;;  %p186_p9 = scmp.lt.s32.totalorder %s8568_s20, 3 }
   0xc   : > { %s8663_s28 = scalar_select %p127_p7, %s8556_s17, %s129_s24  }
   0xd   : > { %p187_p10 = pnand %p7439_p6, %p186_p9 }
   0xe   : > { %p217_p11 = scmp.lt.s32.totalorder (!%p187_p10), %s8560_s18, 1  ;;  %v8570_v0 = vmov (!%p187_p10), 0.0   ;;  %v232_v1 = vld [vmem:[%s9907_s2] sm:$0xff] (!%p187_p10)  ;;  %v8571_v2 = vmov (!%p187_p10), 0   ;;  %v233_v3 = vld [vmem:[%s9907_s2 + $0x8] sm:$0xff] (!%p187_p10)  ;;  %v235_v4 = vld [vmem:[%s9907_s2 + $0x18] sm:$0xff] (!%p187_p10) }
   0xf   : > { %190 = sbr.rel (%p187_p10) target bundleno = 785 (0x311), region = 36  ;;  %340 = vmatprep.mubr.f32.mxu0 (!%p187_p10), %v8570_v0  ;;  %8488 = vset.pattern.permute.xlu1 (!%p187_p10), %v8571_v2  ;;  %v234_v5 = vld [vmem:[%s9907_s2 + $0x10] sm:$0xff] (!%p187_p10)  ;;  %vm271_vm0 = vcmask (!%p187_p10), 1043456   ;;  %v227_v8 = vld [vmem:[%s9906_s1] sm:$0xff] (!%p187_p10)  ;;  %vm258_vm1 = vcmask (!%p187_p10), 31744   ;;  %v228_v9 = vld [vmem:[%s9906_s1 + $0x8] sm:$0xff] (!%p187_p10) }
  0x10   : > { %8487 = vset.pattern.permute.xlu0 (!%p187_p10), %v8571_v2  ;;  %238 = vperm.xlu1 (!%p187_p10), %8488, %v232_v1   ;;  %v229_v10 = vld [vmem:[%s9906_s1 + $0x10] sm:$0xff] (!%p187_p10)  ;;  %v230_v11 = vld [vmem:[%s9906_s1 + $0x18] sm:$0xff] (!%p187_p10)  ;;  %v8572_v15 = vmov (!%p187_p10), 0.0|0.0   ;;  %vm8573_vm2 = vmmov (!%p187_p10), 0   ;;  %v373_v18 = vld [vmem:[%s9908_s3] sm:$0xff] (!%p187_p10)  ;;  %vm380_vm3 = vcmask (!%p187_p10), 130048  }
  0x11   : > { %243 = vperm.xlu0 (!%p187_p10), %8487, %v233_v3   ;;  %v7449_v12 = vld [vmem:[%s9908_s3 + $0x10] sm:$0xff] (!%p187_p10)  ;;  %v7450_v13 = vld [vmem:[%s9908_s3 + $0x18] sm:$0xff] (!%p187_p10)  ;;  %8162 = vmatprep.subr.bf16.mxu1 (!%p187_p10), %v8572_v15  ;;  %v374_v19 = vld [vmem:[%s9908_s3 + $0x8] sm:$0xff] (!%p187_p10)  ;;  %s8574_s22 = smov (!%p187_p10), 112   ;;  %s8575_s24 = smov (!%p187_p10), 96   ;;  %vm585_vm4 = vcmask (!%p187_p10), 253952  }
  0x12   : > { %v8704_v14 = vpack.c.bf16 (!%p187_p10), %v7450_v13, %v7449_v12  ;;  %7718 = vmatprep.mubr.msk.f32.mxu1 (!%p187_p10), %vm8573_vm2, %v8570_v0  ;;  %v8726_v22 = vpack.c.bf16 (!%p187_p10), %v374_v19, %v373_v18  ;;  %s8576_s26 = smov (!%p187_p10), 80   ;;  %s8577_s29 = smov (!%p187_p10), 64  }
  0x13   : > { %s8578_s30 = smov (!%p187_p10), 48   ;;  %s8580_s6 = smov (!%p187_p10), 16  }
  0x14   : > { %248 = vperm.xlu1 (!%p187_p10), %8488, %v234_v5   ;;  %8164 = vmatpush3.bf16.msra.mxu1 (!%p187_p10), %v8704_v14  ;;  %s213_s7 = sand.u32 (!%p187_p10), 1, %s8552_s16   ;;  %s7521_s10 = sshll.u32 (!%p187_p10), %s8560_s18, 12 }
  0x15   : > { %253 = vperm.xlu0 (!%p187_p10), %8487, %v235_v4   ;;  %8165 = vmatprep.subr.bf16.mxu1 (!%p187_p10), %v8572_v15  ;;  %v8581_v4 = vmov (!%p187_p10), 1966171168   ;;  %s9845_s14 = scalar_lea.hbm (!%p187_p10), %s9909_s4, %s7521_s10 }
  0x16   : > { %s218_s5 = scalar_select %p217_p11, %s8560_s18, 1  ;;  %v530_v5 = vunpack.c.l.s4 %v8581_v4 }
  0x17   : > { %s9859_s18 = scalar_lea.sflag [#allocation4], %s213_s7 }
  0x18   : > { %s7520_s8 = sshll.u32 %s218_s5, 3  ;;  %s8579_s5 = smov 32  }
  0x19   : > { %s224_s21 = scalar_lea.vmem %s9905_s0, %s7520_s8  ;;  %s7440_s8 = sshll.u32 %s213_s7, 8 }
  0x1a   : > { %v231_v6 = vld [vmem:[%s224_s21] sm:$0xff]  ;;  %s9036_s9 = scalar_lea.vmem [#allocation3], %s7440_s8 }
  0x1b   : > { %v257_v7 = vcombine.high %v231_v6, %v231_v6  ;;  %s7356_s11 = sshll.u32 %s9036_s9, 4  ;;  %s9847_s11 = int_to_ptr.vmem [resolvable:$true] %s7356_s11 }
  0x1c   : > { %s8490_s21 = scalar_lea.vmem %s9847_s11, 4096 }
  0x1d   : > { %7443 = vmatprep.subr.msk.mxu0 %vm271_vm0, %v257_v7  ;;  %p8491_p12 = scmp.ne.s32.totalorder %s9847_s11, %s8490_s21 }
  0x1e   : > { %7444 = vmatpush1.msk.msra.mxu0 %vm271_vm0, %v231_v6  ;;  %v532_v6 = vlaneseq }
  0x1f   : > { %7445 = vmatmul.mubr.msk.f32.vlgmr.msra.gmra.mrb[0].mxu0 %vm258_vm1, %v227_v8  ;;  %8174 = vmatprep.subr.bf16.mxu0 %v8572_v15  ;;  %v531_v8 = vunpack.c.0.s8 %v530_v5  ;;  %p8492_p13 = pnand %p8491_p12, %p8650_p4 }
  0x20   : > { %346 = vmatprep.mubr.f32.mxu0 %v8570_v0  ;;  %8176 = vmatpush3.bf16.msra.mxu0 %v8704_v14 }
  0x21   : > { %8177 = vmatprep.subr.bf16.mxu0 %v8572_v15  ;;  %p8493_p0 = pneg %p8492_p13 }
  0x23   : > { %7446 = vmatmul.mubr.msk.f32.gmra.mrb[2].mxu0 %vm258_vm1, %v228_v9  ;;  %v533_v9 = vshrl.u32 %v532_v6, 7 }
  0x24   : > { %352 = vmatprep.mubr.f32.mxu0 %v8570_v0 }
  0x27   : > { %7447 = vmatmul.mubr.msk.f32.gmra.mrb[4].mxu0 %vm258_vm1, %v229_v10 }
  0x28   : > { %358 = vmatprep.mubr.f32.mxu0 %v8570_v0 }
  0x2b   : > { %7448 = vmatmul.mubr.msk.f32.gmra.mrb[6].mxu0 %vm258_vm1, %v230_v11  ;;  %v9013_v11 = vsub.s32 %v531_v8, %v533_v9 }
  0x2c   : > { %7746 = vmatprep.mubr.msk.f32.mxu0 %vm8573_vm2, %v8570_v0 }
  0x8f   : > { %v239_v25 = vpop.permute.xlu1 %238 }
  0x90   : > { %v8724_v20 = vpop.permute.xlu0 %243 }
  0x93   : > { %v249_v33 = vpop.permute.xlu1 %248 }
  0x94   : > { %v254_v29 = vpop.permute.xlu0 %253 }
  0xf2   : > { %v342_v16 = vpop.f32.mrb[0].mxu0 }
  0xf3   : > { %v8716_v17 = vpop.f32.mrb[1].mxu0  ;;  %v343_v27 = vadd.f32 %v342_v16, %v239_v25 }
  0xf4   : > { %v8782_v36 = vadd.f32 %v8716_v17, %v239_v25 }
  0xf6   : > { %v348_v21 = vpop.f32.mrb[2].mxu0 }
  0xf7   : > { %v349_v23 = vadd.f32 %v348_v21, %v8724_v20  ;;  %v350_v24 = vpop.f32.mrb[3].mxu0 }
  0xf8   : > { %v8776_v35 = vadd.f32 %v350_v24, %v8724_v20 }
  0xf9   : > { %811 = vrot.lane.b32.xlu0 %v349_v23, %s8574_s22  ;;  %7719 = vmatmul.mubr.msk.f32.vlgmr.msra.gmra.mrb[0].mxu1 %vm380_vm3, %v349_v23 }
  0xfa   : > { %v354_v26 = vpop.f32.mrb[4].mxu0  ;;  %8167 = vmatpush3.bf16.msra.mxu1 %v8726_v22  ;;  %7725 = vmatprep.mubr.msk.f32.mxu1 %vm8573_vm2, %v8570_v0 }
  0xfb   : > { %v356_v28 = vpop.f32.mrb[5].mxu0  ;;  %8168 = vmatprep.subr.bf16.mxu1 %v8572_v15  ;;  %v355_v34 = vadd.f32 %v354_v26, %v249_v33 }
  0xfc   : > { %v8793_v38 = vadd.f32 %v356_v28, %v249_v33 }
  0xfd   : > { %886 = vrot.lane.b32.xlu0 %v343_v27, %s8574_s22 }
  0xfe   : > { %v360_v30 = vpop.f32.mrb[6].mxu0 }
  0xff   : > { %v361_v31 = vadd.f32 %v360_v30, %v254_v29  ;;  %v362_v32 = vpop.f32.mrb[7].mxu0 }
 0x100   : > { %v8787_v37 = vadd.f32 %v362_v32, %v254_v29 }
 0x101   : > { %1029 = vrot.lane.b32.xlu1 %v361_v31, %s8574_s22  ;;  %1247 = vrot.lane.b32.xlu0 %v349_v23, %s8575_s24 }
 0x102   : > { %7726 = vmatmul.mubr.msk.f32.vlgmr.msra.gmra.mrb[0].mxu1 %vm380_vm3, %v343_v27 }
 0x103   : > { %8170 = vmatpush3.bf16.msra.mxu1 %v8704_v14  ;;  %7732 = vmatprep.mubr.msk.f32.mxu1 %vm8573_vm2, %v8570_v0 }
 0x104   : > { %8171 = vmatprep.subr.bf16.mxu1 %v8572_v15 }
 0x105   : > { %1104 = vrot.lane.b32.xlu1 %v355_v34, %s8574_s22  ;;  %1322 = vrot.lane.b32.xlu0 %v343_v27, %s8575_s24 }
 0x106   : > { %7733 = vmatmul.mubr.msk.f32.vlgmr.msra.gmra.mrb[2].mxu1 %vm380_vm3, %v361_v31 }
 0x107   : > { %8173 = vmatpush3.bf16.msra.mxu1 %v8726_v22  ;;  %7739 = vmatprep.mubr.msk.f32.mxu1 %vm8573_vm2, %v8570_v0 }
 0x108   : > { %8180 = vmatprep.subr.bf16.mxu1 %v8572_v15 }
 0x109   : > { %1465 = vrot.lane.b32.xlu1 %v361_v31, %s8575_s24  ;;  %1683 = vrot.lane.b32.xlu0 %v349_v23, %s8576_s26 }
 0x10d   : > { %1540 = vrot.lane.b32.xlu1 %v355_v34, %s8575_s24  ;;  %1758 = vrot.lane.b32.xlu0 %v343_v27, %s8576_s26 }
 0x10e   : > { %7740 = vmatmul.mubr.msk.f32.vlgmr.msra.gmra.mrb[2].mxu1 %vm380_vm3, %v355_v34 }
 0x10f   : > { %8182 = vmatpush3.bf16.msra.mxu1 %v8704_v14  ;;  %7760 = vmatprep.mubr.msk.f32.mxu1 %vm8573_vm2, %v8570_v0 }
 0x110   : > { %8183 = vmatprep.subr.bf16.mxu1 %v8572_v15 }
 0x111   : > { %1901 = vrot.lane.b32.xlu1 %v361_v31, %s8576_s26  ;;  %2119 = vrot.lane.b32.xlu0 %v349_v23, %s8577_s29 }
 0x115   : > { %1976 = vrot.lane.b32.xlu1 %v355_v34, %s8576_s26  ;;  %2194 = vrot.lane.b32.xlu0 %v343_v27, %s8577_s29 }
 0x119   : > { %2337 = vrot.lane.b32.xlu1 %v361_v31, %s8577_s29  ;;  %2555 = vrot.lane.b32.xlu0 %v349_v23, %s8578_s30 }
 0x11d   : > { %2412 = vrot.lane.b32.xlu1 %v355_v34, %s8577_s29  ;;  %2630 = vrot.lane.b32.xlu0 %v343_v27, %s8578_s30 }
 0x121   : > { %2773 = vrot.lane.b32.xlu1 %v361_v31, %s8578_s30  ;;  %2991 = vrot.lane.b32.xlu0 %v349_v23, %s8579_s5 }
 0x125   : > { %2848 = vrot.lane.b32.xlu1 %v355_v34, %s8578_s30  ;;  %3066 = vrot.lane.b32.xlu0 %v343_v27, %s8579_s5 }
 0x129   : > { %3209 = vrot.lane.b32.xlu1 %v361_v31, %s8579_s5  ;;  %3427 = vrot.lane.b32.xlu0 %v349_v23, %s8580_s6 }
 0x12d   : > { %3284 = vrot.lane.b32.xlu1 %v355_v34, %s8579_s5  ;;  %3502 = vrot.lane.b32.xlu0 %v343_v27, %s8580_s6 }
 0x131   : > { %3645 = vrot.lane.b32.xlu1 %v361_v31, %s8580_s6  ;;  %4291 = vrot.lane.b32.xlu0 %v8776_v35, %s8574_s22 }
 0x135   : > { %3720 = vrot.lane.b32.xlu1 %v355_v34, %s8580_s6  ;;  %4366 = vrot.lane.b32.xlu0 %v8782_v36, %s8574_s22 }
 0x139   : > { %4509 = vrot.lane.b32.xlu1 %v8787_v37, %s8574_s22  ;;  %4727 = vrot.lane.b32.xlu0 %v8776_v35, %s8575_s24 }
 0x13d   : > { %4584 = vrot.lane.b32.xlu1 %v8793_v38, %s8574_s22  ;;  %4802 = vrot.lane.b32.xlu0 %v8782_v36, %s8575_s24  ;;  %s8582_s22 = smov [#allocation3]  }
 0x141   : > { %4945 = vrot.lane.b32.xlu1 %v8787_v37, %s8575_s24  ;;  %5163 = vrot.lane.b32.xlu0 %v8776_v35, %s8576_s26 }
 0x145   : > { %5020 = vrot.lane.b32.xlu1 %v8793_v38, %s8575_s24  ;;  %5238 = vrot.lane.b32.xlu0 %v8782_v36, %s8576_s26  ;;  %s8494_s24 = sshll.u32 %s8582_s22, 4  ;;  %s8495_s24 = int_to_ptr.vmem [resolvable:$false] %s8494_s24 }
 0x146   : > { %p8497_p1 = scmp.lt.s32.totalorder %s9847_s11, %s8495_s24 }
 0x149   : > { %5381 = vrot.lane.b32.xlu1 %v8787_v37, %s8576_s26  ;;  %5599 = vrot.lane.b32.xlu0 %v8776_v35, %s8577_s29 }
 0x14d   : > { %5456 = vrot.lane.b32.xlu1 %v8793_v38, %s8576_s26  ;;  %5674 = vrot.lane.b32.xlu0 %v8782_v36, %s8577_s29  ;;  %s8496_s26 = scalar_lea.vmem %s8495_s24, 8192 }
 0x14e   : > { %p8498_p2 = scmp.lt.s32.totalorder %s8496_s26, %s8490_s21 }
 0x150   : > { %p8499_p3 = por %p8498_p2, %p8497_p1 }
 0x151   : > { %5817 = vrot.lane.b32.xlu1 %v8787_v37, %s8577_s29  ;;  %6035 = vrot.lane.b32.xlu0 %v8776_v35, %s8578_s30 }
 0x152   : > { %p8500_p5 = pnand %p8499_p3, %p8493_p0 }
 0x155   : > { %5892 = vrot.lane.b32.xlu1 %v8793_v38, %s8577_s29  ;;  %6110 = vrot.lane.b32.xlu0 %v8782_v36, %s8578_s30 }
 0x159   : > { %6253 = vrot.lane.b32.xlu1 %v8787_v37, %s8578_s30  ;;  %6471 = vrot.lane.b32.xlu0 %v8776_v35, %s8579_s5 }
 0x15d   : > { %6328 = vrot.lane.b32.xlu1 %v8793_v38, %s8578_s30  ;;  %6546 = vrot.lane.b32.xlu0 %v8782_v36, %s8579_s5 }
 0x161   : > { %6689 = vrot.lane.b32.xlu1 %v8787_v37, %s8579_s5  ;;  %6907 = vrot.lane.b32.xlu0 %v8776_v35, %s8580_s6 }
 0x165   : > { %6764 = vrot.lane.b32.xlu1 %v8793_v38, %s8579_s5  ;;  %6982 = vrot.lane.b32.xlu0 %v8782_v36, %s8580_s6 }
 0x169   : > { %7125 = vrot.lane.b32.xlu1 %v8787_v37, %s8580_s6 }
 0x16b   : > { %v812_v39 = vpop.permute.xlu0 %811 }
 0x16c   : > { %7747 = vmatmul.mubr.msk.f32.vlgmr.msra.gmra.mrb[8].mxu0 %vm380_vm3, %v812_v39 }
 0x16d   : > { %7200 = vrot.lane.b32.xlu1 %v8793_v38, %s8580_s6  ;;  %8179 = vmatpush3.bf16.msra.mxu0 %v8726_v22 }
 0x16e   : > { %7753 = vmatprep.mubr.msk.f32.mxu0 %vm8573_vm2, %v8570_v0  ;;  %8186 = vmatprep.subr.bf16.mxu0 %v8572_v15 }
 0x16f   : > { %v887_v40 = vpop.permute.xlu0 %886 }
 0x173   : > { %v1030_v41 = vpop.permute.xlu1 %1029  ;;  %v1248_v42 = vpop.permute.xlu0 %1247 }
 0x174   : > { %7754 = vmatmul.mubr.msk.f32.vlgmr.msra.gmra.mrb[8].mxu0 %vm380_vm3, %v887_v40  ;;  %7761 = vmatmul.mubr.msk.f32.vlgmr.msra.gmra.mrb[4].mxu1 %vm380_vm3, %v1030_v41 }
 0x175   : > { %8185 = vmatpush3.bf16.msra.mxu1 %v8726_v22  ;;  %8188 = vmatpush3.bf16.msra.mxu0 %v8704_v14 }
 0x176   : > { %7774 = vmatprep.mubr.msk.f32.mxu0 %vm8573_vm2, %v8570_v0  ;;  %7767 = vmatprep.mubr.msk.f32.mxu1 %vm8573_vm2, %v8570_v0 }
 0x177   : > { %8192 = vmatprep.subr.bf16.mxu1 %v8572_v15  ;;  %8189 = vmatprep.subr.bf16.mxu0 %v8572_v15  ;;  %v1105_v43 = vpop.permute.xlu1 %1104  ;;  %v1323_v44 = vpop.permute.xlu0 %1322 }
 0x178   : > { %7775 = vmatmul.mubr.msk.f32.vlgmr.msra.gmra.mrb[10].mxu0 %vm380_vm3, %v1248_v42 }
 0x179   : > { %8191 = vmatpush3.bf16.msra.mxu0 %v8726_v22  ;;  %7781 = vmatprep.mubr.msk.f32.mxu0 %vm8573_vm2, %v8570_v0 }
 0x17a   : > { %8198 = vmatprep.subr.bf16.mxu0 %v8572_v15 }
 0x17b   : > { %v1466_v45 = vpop.permute.xlu1 %1465  ;;  %v1684_v46 = vpop.permute.xlu0 %1683 }
 0x17c   : > { %7768 = vmatmul.mubr.msk.f32.vlgmr.msra.gmra.mrb[4].mxu1 %vm380_vm3, %v1105_v43 }
 0x17d   : > { %8194 = vmatpush3.bf16.msra.mxu1 %v8704_v14  ;;  %7788 = vmatprep.mubr.msk.f32.mxu1 %vm8573_vm2, %v8570_v0 }
 0x17e   : > { %8195 = vmatprep.subr.bf16.mxu1 %v8572_v15 }
 0x17f   : > { %v1541_v47 = vpop.permute.xlu1 %1540  ;;  %v1759_v48 = vpop.permute.xlu0 %1758 }
 0x180   : > { %7782 = vmatmul.mubr.msk.f32.vlgmr.msra.gmra.mrb[10].mxu0 %vm380_vm3, %v1323_v44  ;;  %7789 = vmatmul.mubr.msk.f32.vlgmr.msra.gmra.mrb[6].mxu1 %vm380_vm3, %v1466_v45 }
 0x181   : > { %8197 = vmatpush3.bf16.msra.mxu1 %v8726_v22  ;;  %8200 = vmatpush3.bf16.msra.mxu0 %v8704_v14 }
 0x182   : > { %7802 = vmatprep.mubr.msk.f32.mxu0 %vm8573_vm2, %v8570_v0  ;;  %7795 = vmatprep.mubr.msk.f32.mxu1 %vm8573_vm2, %v8570_v0 }
 0x183   : > { %8204 = vmatprep.subr.bf16.mxu1 %v8572_v15  ;;  %8201 = vmatprep.subr.bf16.mxu0 %v8572_v15  ;;  %v1902_v49 = vpop.permute.xlu1 %1901  ;;  %v2120_v50 = vpop.permute.xlu0 %2119 }
 0x184   : > { %7803 = vmatmul.mubr.msk.f32.vlgmr.msra.gmra.mrb[12].mxu0 %vm380_vm3, %v1684_v46 }
 0x185   : > { %8203 = vmatpush3.bf16.msra.mxu0 %v8726_v22  ;;  %7809 = vmatprep.mubr.msk.f32.mxu0 %vm8573_vm2, %v8570_v0 }
 0x186   : > { %8210 = vmatprep.subr.bf16.mxu0 %v8572_v15 }
 0x187   : > { %v1977_v51 = vpop.permute.xlu1 %1976  ;;  %v2195_v52 = vpop.permute.xlu0 %2194 }
 0x188   : > { %7796 = vmatmul.mubr.msk.f32.vlgmr.msra.gmra.mrb[6].mxu1 %vm380_vm3, %v1541_v47 }
 0x189   : > { %8206 = vmatpush3.bf16.msra.mxu1 %v8704_v14  ;;  %7816 = vmatprep.mubr.msk.f32.mxu1 %vm8573_vm2, %v8570_v0 }
 0x18a   : > { %8207 = vmatprep.subr.bf16.mxu1 %v8572_v15 }
 0x18b   : > { %v2338_v53 = vpop.permute.xlu1 %2337  ;;  %v2556_v54 = vpop.permute.xlu0 %2555 }
 0x18c   : > { %7810 = vmatmul.mubr.msk.f32.vlgmr.msra.gmra.mrb[12].mxu0 %vm380_vm3, %v1759_v48  ;;  %7817 = vmatmul.mubr.msk.f32.vlgmr.msra.gmra.mrb[8].mxu1 %vm380_vm3, %v1902_v49 }
 0x18d   : > { %8209 = vmatpush3.bf16.msra.mxu1 %v8726_v22  ;;  %8212 = vmatpush3.bf16.msra.mxu0 %v8704_v14 }
 0x18e   : > { %7830 = vmatprep.mubr.msk.f32.mxu0 %vm8573_vm2, %v8570_v0  ;;  %7823 = vmatprep.mubr.msk.f32.mxu1 %vm8573_vm2, %v8570_v0 }
 0x18f   : > { %8216 = vmatprep.subr.bf16.mxu1 %v8572_v15  ;;  %8213 = vmatprep.subr.bf16.mxu0 %v8572_v15  ;;  %v2413_v55 = vpop.permute.xlu1 %2412  ;;  %v2631_v56 = vpop.permute.xlu0 %2630 }
 0x190   : > { %7831 = vmatmul.mubr.msk.f32.vlgmr.msra.gmra.mrb[14].mxu0 %vm380_vm3, %v2120_v50 }
 0x191   : > { %8215 = vmatpush3.bf16.msra.mxu0 %v8726_v22  ;;  %7837 = vmatprep.mubr.msk.f32.mxu0 %vm8573_vm2, %v8570_v0 }
 0x192   : > { %8222 = vmatprep.subr.bf16.mxu0 %v8572_v15 }
 0x193   : > { %v2774_v57 = vpop.permute.xlu1 %2773  ;;  %v2992_v58 = vpop.permute.xlu0 %2991 }
 0x194   : > { %7824 = vmatmul.mubr.msk.f32.vlgmr.msra.gmra.mrb[8].mxu1 %vm380_vm3, %v1977_v51 }
 0x195   : > { %8218 = vmatpush3.bf16.msra.mxu1 %v8704_v14  ;;  %7844 = vmatprep.mubr.msk.f32.mxu1 %vm8573_vm2, %v8570_v0 }
 0x196   : > { %8219 = vmatprep.subr.bf16.mxu1 %v8572_v15 }
 0x197   : > { %v2849_v59 = vpop.permute.xlu1 %2848  ;;  %v3067_v60 = vpop.permute.xlu0 %3066 }
 0x198   : > { %7838 = vmatmul.mubr.msk.f32.vlgmr.msra.gmra.mrb[14].mxu0 %vm380_vm3, %v2195_v52  ;;  %7845 = vmatmul.mubr.msk.f32.vlgmr.msra.gmra.mrb[10].mxu1 %vm380_vm3, %v2338_v53 }
 0x199   : > { %8221 = vmatpush3.bf16.msra.mxu1 %v8726_v22  ;;  %8224 = vmatpush3.bf16.msra.mxu0 %v8704_v14 }
 0x19a   : > { %7858 = vmatprep.mubr.msk.f32.mxu0 %vm8573_vm2, %v8570_v0  ;;  %7851 = vmatprep.mubr.msk.f32.mxu1 %vm8573_vm2, %v8570_v0 }
 0x19b   : > { %8228 = vmatprep.subr.bf16.mxu1 %v8572_v15  ;;  %8225 = vmatprep.subr.bf16.mxu0 %v8572_v15  ;;  %v3210_v61 = vpop.permute.xlu1 %3209  ;;  %v3428_v62 = vpop.permute.xlu0 %3427 }
 0x19c   : > { %7859 = vmatmul.mubr.msk.f32.vlgmr.msra.gmra.mrb[16].mxu0 %vm380_vm3, %v2556_v54 }
 0x19d   : > { %8227 = vmatpush3.bf16.msra.mxu0 %v8726_v22  ;;  %7865 = vmatprep.mubr.msk.f32.mxu0 %vm8573_vm2, %v8570_v0 }
 0x19e   : > { %8234 = vmatprep.subr.bf16.mxu0 %v8572_v15 }
 0x19f   : > { %v3285_v63 = vpop.permute.xlu1 %3284  ;;  %v3503_v1 = vpop.permute.xlu0 %3502 }
 0x1a0   : > { %7852 = vmatmul.mubr.msk.f32.vlgmr.msra.gmra.mrb[10].mxu1 %vm380_vm3, %v2413_v55 }
 0x1a1   : > { %8230 = vmatpush3.bf16.msra.mxu1 %v8704_v14  ;;  %7872 = vmatprep.mubr.msk.f32.mxu1 %vm8573_vm2, %v8570_v0 }
 0x1a2   : > { %8231 = vmatprep.subr.bf16.mxu1 %v8572_v15 }
 0x1a3   : > { %v3646_v2 = vpop.permute.xlu1 %3645  ;;  %v4292_v7 = vpop.permute.xlu0 %4291 }
 0x1a4   : > { %7866 = vmatmul.mubr.msk.f32.vlgmr.msra.gmra.mrb[16].mxu0 %vm380_vm3, %v2631_v56  ;;  %7873 = vmatmul.mubr.msk.f32.vlgmr.msra.gmra.mrb[12].mxu1 %vm380_vm3, %v2774_v57 }
 0x1a5   : > { %8233 = vmatpush3.bf16.msra.mxu1 %v8726_v22  ;;  %8236 = vmatpush3.bf16.msra.mxu0 %v8704_v14 }
 0x1a6   : > { %7886 = vmatprep.mubr.msk.f32.mxu0 %vm8573_vm2, %v8570_v0  ;;  %7879 = vmatprep.mubr.msk.f32.mxu1 %vm8573_vm2, %v8570_v0 }
 0x1a7   : > { %8240 = vmatprep.subr.bf16.mxu1 %v8572_v15  ;;  %8237 = vmatprep.subr.bf16.mxu0 %v8572_v15  ;;  %v3721_v3 = vpop.permute.xlu1 %3720  ;;  %v4367_v10 = vpop.permute.xlu0 %4366 }
 0x1a8   : > { %7887 = vmatmul.mubr.msk.f32.vlgmr.msra.gmra.mrb[18].mxu0 %vm380_vm3, %v2992_v58 }
 0x1a9   : > { %8239 = vmatpush3.bf16.msra.mxu0 %v8726_v22  ;;  %7893 = vmatprep.mubr.msk.f32.mxu0 %vm8573_vm2, %v8570_v0 }
 0x1aa   : > { %8246 = vmatprep.subr.bf16.mxu0 %v8572_v15 }
 0x1ab   : > { %v4510_v12 = vpop.permute.xlu1 %4509  ;;  %v4728_v19 = vpop.permute.xlu0 %4727 }
 0x1ac   : > { %7880 = vmatmul.mubr.msk.f32.vlgmr.msra.gmra.mrb[12].mxu1 %vm380_vm3, %v2849_v59 }
 0x1ad   : > { %8242 = vmatpush3.bf16.msra.mxu1 %v8704_v14  ;;  %7900 = vmatprep.mubr.msk.f32.mxu1 %vm8573_vm2, %v8570_v0 }
 0x1ae   : > { %8243 = vmatprep.subr.bf16.mxu1 %v8572_v15 }
 0x1af   : > { %v4585_v24 = vpop.permute.xlu1 %4584  ;;  %v4803_v32 = vpop.permute.xlu0 %4802 }
 0x1b0   : > { %7894 = vmatmul.mubr.msk.f32.vlgmr.msra.gmra.mrb[18].mxu0 %vm380_vm3, %v3067_v60  ;;  %7901 = vmatmul.mubr.msk.f32.vlgmr.msra.gmra.mrb[14].mxu1 %vm380_vm3, %v3210_v61 }
 0x1b1   : > { %8245 = vmatpush3.bf16.msra.mxu1 %v8726_v22  ;;  %8248 = vmatpush3.bf16.msra.mxu0 %v8704_v14 }
 0x1b2   : > { %7914 = vmatprep.mubr.msk.f32.mxu0 %vm8573_vm2, %v8570_v0  ;;  %7907 = vmatprep.mubr.msk.f32.mxu1 %vm8573_vm2, %v8570_v0 }
 0x1b3   : > { %8252 = vmatprep.subr.bf16.mxu1 %v8572_v15  ;;  %8249 = vmatprep.subr.bf16.mxu0 %v8572_v15  ;;  %v4946_v34 = vpop.permute.xlu1 %4945  ;;  %v5164_v39 = vpop.permute.xlu0 %5163 }
 0x1b4   : > { %7915 = vmatmul.mubr.msk.f32.vlgmr.msra.gmra.mrb[20].mxu0 %vm380_vm3, %v3428_v62 }
 0x1b5   : > { %8251 = vmatpush3.bf16.msra.mxu0 %v8726_v22  ;;  %7921 = vmatprep.mubr.msk.f32.mxu0 %vm8573_vm2, %v8570_v0 }
 0x1b6   : > { %8258 = vmatprep.subr.bf16.mxu0 %v8572_v15 }
 0x1b7   : > { %v5021_v43 = vpop.permute.xlu1 %5020  ;;  %v5239_v51 = vpop.permute.xlu0 %5238 }
 0x1b8   : > { %7908 = vmatmul.mubr.msk.f32.vlgmr.msra.gmra.mrb[14].mxu1 %vm380_vm3, %v3285_v63 }
 0x1b9   : > { %8254 = vmatpush3.bf16.msra.mxu1 %v8704_v14  ;;  %7928 = vmatprep.mubr.msk.f32.mxu1 %vm8573_vm2, %v8570_v0 }
 0x1ba   : > { %8255 = vmatprep.subr.bf16.mxu1 %v8572_v15 }
 0x1bb   : > { %v5382_v53 = vpop.permute.xlu1 %5381  ;;  %v5600_v54 = vpop.permute.xlu0 %5599 }
 0x1bc   : > { %7922 = vmatmul.mubr.msk.f32.vlgmr.msra.gmra.mrb[20].mxu0 %vm380_vm3, %v3503_v1  ;;  %7929 = vmatmul.mubr.msk.f32.vlgmr.msra.gmra.mrb[16].mxu1 %vm380_vm3, %v3646_v2 }
 0x1bd   : > { %8257 = vmatpush3.bf16.msra.mxu1 %v8726_v22  ;;  %8260 = vmatpush3.bf16.msra.mxu0 %v8704_v14 }
 0x1be   : > { %7942 = vmatprep.mubr.msk.f32.mxu0 %vm8573_vm2, %v8570_v0  ;;  %7935 = vmatprep.mubr.msk.f32.mxu1 %vm8573_vm2, %v8570_v0 }
 0x1bf   : > { %8264 = vmatprep.subr.bf16.mxu1 %v8572_v15  ;;  %8261 = vmatprep.subr.bf16.mxu0 %v8572_v15  ;;  %v5457_v55 = vpop.permute.xlu1 %5456  ;;  %v5675_v56 = vpop.permute.xlu0 %5674 }
 0x1c0   : > { %7943 = vmatmul.mubr.msk.f32.vlgmr.msra.gmra.mrb[22].mxu0 %vm380_vm3, %v8776_v35 }
 0x1c1   : > { %8263 = vmatpush3.bf16.msra.mxu0 %v8726_v22  ;;  %7949 = vmatprep.mubr.msk.f32.mxu0 %vm8573_vm2, %v8570_v0 }
 0x1c2   : > { %8270 = vmatprep.subr.bf16.mxu0 %v8572_v15 }
 0x1c3   : > { %v5818_v57 = vpop.permute.xlu1 %5817  ;;  %v6036_v58 = vpop.permute.xlu0 %6035 }
 0x1c4   : > { %7936 = vmatmul.mubr.msk.f32.vlgmr.msra.gmra.mrb[16].mxu1 %vm380_vm3, %v3721_v3 }
 0x1c5   : > { %8266 = vmatpush3.bf16.msra.mxu1 %v8704_v14  ;;  %7956 = vmatprep.mubr.msk.f32.mxu1 %vm8573_vm2, %v8570_v0 }
 0x1c6   : > { %8267 = vmatprep.subr.bf16.mxu1 %v8572_v15 }
 0x1c7   : > { %v5893_v59 = vpop.permute.xlu1 %5892  ;;  %v6111_v60 = vpop.permute.xlu0 %6110 }
 0x1c8   : > { %7950 = vmatmul.mubr.msk.f32.vlgmr.msra.gmra.mrb[22].mxu0 %vm380_vm3, %v8782_v36  ;;  %7957 = vmatmul.mubr.msk.f32.vlgmr.msra.gmra.mrb[18].mxu1 %vm380_vm3, %v8787_v37 }
 0x1c9   : > { %8269 = vmatpush3.bf16.msra.mxu1 %v8726_v22  ;;  %8272 = vmatpush3.bf16.msra.mxu0 %v8704_v14 }
 0x1ca   : > { %7970 = vmatprep.mubr.msk.f32.mxu0 %vm8573_vm2, %v8570_v0  ;;  %7963 = vmatprep.mubr.msk.f32.mxu1 %vm8573_vm2, %v8570_v0 }
 0x1cb   : > { %8276 = vmatprep.subr.bf16.mxu1 %v8572_v15  ;;  %8273 = vmatprep.subr.bf16.mxu0 %v8572_v15  ;;  %v6254_v61 = vpop.permute.xlu1 %6253  ;;  %v6472_v62 = vpop.permute.xlu0 %6471 }
 0x1cc   : > { %7971 = vmatmul.mubr.msk.f32.vlgmr.msra.gmra.mrb[24].mxu0 %vm380_vm3, %v4292_v7 }
 0x1cd   : > { %8275 = vmatpush3.bf16.msra.mxu0 %v8726_v22  ;;  %7977 = vmatprep.mubr.msk.f32.mxu0 %vm8573_vm2, %v8570_v0 }
 0x1ce   : > { %8282 = vmatprep.subr.bf16.mxu0 %v8572_v15 }
 0x1cf   : > { %v6329_v63 = vpop.permute.xlu1 %6328  ;;  %v6547_v1 = vpop.permute.xlu0 %6546 }
 0x1d0   : > { %7964 = vmatmul.mubr.msk.f32.vlgmr.msra.gmra.mrb[18].mxu1 %vm380_vm3, %v8793_v38 }
 0x1d1   : > { %8278 = vmatpush3.bf16.msra.mxu1 %v8704_v14  ;;  %7984 = vmatprep.mubr.msk.f32.mxu1 %vm8573_vm2, %v8570_v0 }
 0x1d2   : > { %8279 = vmatprep.subr.bf16.mxu1 %v8572_v15 }
 0x1d3   : > { %v6690_v2 = vpop.permute.xlu1 %6689  ;;  %v6908_v3 = vpop.permute.xlu0 %6907 }
 0x1d4   : > { %7978 = vmatmul.mubr.msk.f32.vlgmr.msra.gmra.mrb[24].mxu0 %vm380_vm3, %v4367_v10  ;;  %7985 = vmatmul.mubr.msk.f32.vlgmr.msra.gmra.mrb[20].mxu1 %vm380_vm3, %v4510_v12 }
 0x1d5   : > { %v523_v13 = vpop.f32.mrb[0].mxu1  ;;  %8281 = vmatpush3.bf16.msra.mxu1 %v8726_v22  ;;  %8284 = vmatpush3.bf16.msra.mxu0 %v8704_v14 }
 0x1d6   : > { %v528_v16 = vcombine.high %v523_v13, %v523_v13  ;;  %v535_v17 = vrot.slane %v523_v13, %v9013_v11  ;;  %v7727_v18 = vpop.f32.mrb[1].mxu1  ;;  %7998 = vmatprep.mubr.msk.f32.mxu0 %vm8573_vm2, %v8570_v0  ;;  %7991 = vmatprep.mubr.msk.f32.mxu1 %vm8573_vm2, %v8570_v0 }
 0x1d7   : > { %8288 = vmatprep.subr.bf16.mxu1 %v8572_v15  ;;  %8285 = vmatprep.subr.bf16.mxu0 %v8572_v15  ;;  %v6765_v4 = vpop.permute.xlu1 %6764  ;;  %v6983_v5 = vpop.permute.xlu0 %6982 }
 0x1d8   : > { %v542_v20 = vrot.slane %v528_v16, %v9013_v11  ;;  %v543_v21 = vcombine.high %v535_v17, %v535_v17  ;;  %v551_v23 = vrot.slane %v535_v17, %v9013_v11  ;;  %7999 = vmatmul.mubr.msk.f32.vlgmr.msra.gmra.mrb[26].mxu0 %vm380_vm3, %v4728_v19 }
 0x1d9   : > { %8287 = vmatpush3.bf16.msra.mxu0 %v8726_v22  ;;  %8005 = vmatprep.mubr.msk.f32.mxu0 %vm8573_vm2, %v8570_v0 }
 0x1da   : > { %v544_v25 = vcombine.high %v542_v20, %v542_v20  ;;  %v558_v26 = vrot.slane %v542_v20, %v9013_v11  ;;  %v565_v27 = vrot.slane %v543_v21, %v9013_v11  ;;  %v573_v28 = vcombine.high %v551_v23, %v551_v23  ;;  %586 = vst.msk [vmem:[%s9036_s9] sm:$0x1] %vm585_vm4, %v551_v23 }
 0x1db   : > { %8294 = vmatprep.subr.bf16.mxu0 %v8572_v15  ;;  %v7126_v6 = vpop.permute.xlu1 %7125 }
 0x1dc   : > { %v572_v29 = vrot.slane %v544_v25, %v9013_v11  ;;  %v574_v30 = vcombine.high %v558_v26, %v558_v26  ;;  %v575_v31 = vcombine.high %v565_v27, %v565_v27  ;;  %587 = vst.msk [vmem:[%s9036_s9 + $0x20] sm:$0x1] %vm585_vm4, %v565_v27  ;;  %588 = vst.msk [vmem:[%s9036_s9 + $0x40] sm:$0x1] %vm585_vm4, %v573_v28  ;;  %7992 = vmatmul.mubr.msk.f32.vlgmr.msra.gmra.mrb[20].mxu1 %vm380_vm3, %v4585_v24 }
 0x1dd   : > { %590 = vst.msk [vmem:[%s9036_s9 + $0x80] sm:$0x1] %vm585_vm4, %v558_v26  ;;  %8290 = vmatpush3.bf16.msra.mxu1 %v8704_v14  ;;  %8012 = vmatprep.mubr.msk.f32.mxu1 %vm8573_vm2, %v8570_v0 }
 0x1de   : > { %v576_v33 = vcombine.high %v572_v29, %v572_v29  ;;  %589 = vst.msk [vmem:[%s9036_s9 + $0x60] sm:$0x1] %vm585_vm4, %v575_v31  ;;  %591 = vst.msk [vmem:[%s9036_s9 + $0xa0] sm:$0x1] %vm585_vm4, %v572_v29  ;;  %8291 = vmatprep.subr.bf16.mxu1 %v8572_v15 }
 0x1df   : > { %592 = vst.msk [vmem:[%s9036_s9 + $0xc0] sm:$0x1] %vm585_vm4, %v574_v30  ;;  %v7201_v7 = vpop.permute.xlu1 %7200 }
 0x1e0   : > { %593 = vst.msk [vmem:[%s9036_s9 + $0xe0] sm:$0x1] %vm585_vm4, %v576_v33  ;;  %8006 = vmatmul.mubr.msk.f32.vlgmr.msra.gmra.mrb[26].mxu0 %vm380_vm3, %v4803_v32  ;;  %8013 = vmatmul.mubr.msk.f32.vlgmr.msra.gmra.mrb[22].mxu1 %vm380_vm3, %v4946_v34 }
 0x1e1   : > { %v738_v35 = vpop.f32.mrb[2].mxu1  ;;  %8293 = vmatpush3.bf16.msra.mxu1 %v8726_v22  ;;  %8296 = vmatpush3.bf16.msra.mxu0 %v8704_v14 }
 0x1e2   : > { %v743_v36 = vcombine.high %v738_v35, %v738_v35  ;;  %v750_v37 = vrot.slane %v738_v35, %v9013_v11  ;;  %v7741_v38 = vpop.f32.mrb[3].mxu1  ;;  %8026 = vmatprep.mubr.msk.f32.mxu0 %vm8573_vm2, %v8570_v0  ;;  %8019 = vmatprep.mubr.msk.f32.mxu1 %vm8573_vm2, %v8570_v0 }
 0x1e3   : > { %8300 = vmatprep.subr.bf16.mxu1 %v8572_v15  ;;  %8297 = vmatprep.subr.bf16.mxu0 %v8572_v15 }
 0x1e4   : > { %v757_v40 = vrot.slane %v743_v36, %v9013_v11  ;;  %v758_v41 = vcombine.high %v750_v37, %v750_v37  ;;  %v766_v42 = vrot.slane %v750_v37, %v9013_v11  ;;  %8027 = vmatmul.mubr.msk.f32.vlgmr.msra.gmra.mrb[28].mxu0 %vm380_vm3, %v5164_v39 }
 0x1e5   : > { %8299 = vmatpush3.bf16.msra.mxu0 %v8726_v22  ;;  %8033 = vmatprep.mubr.msk.f32.mxu0 %vm8573_vm2, %v8570_v0 }
 0x1e6   : > { %v759_v44 = vcombine.high %v757_v40, %v757_v40  ;;  %v773_v45 = vrot.slane %v757_v40, %v9013_v11  ;;  %v780_v46 = vrot.slane %v758_v41, %v9013_v11  ;;  %v788_v47 = vcombine.high %v766_v42, %v766_v42  ;;  %800 = vst.msk [vmem:[%s9036_s9 + $0x1] sm:$0x1] %vm585_vm4, %v766_v42 }
 0x1e7   : > { %8306 = vmatprep.subr.bf16.mxu0 %v8572_v15 }
 0x1e8   : > { %v787_v48 = vrot.slane %v759_v44, %v9013_v11  ;;  %v789_v49 = vcombine.high %v773_v45, %v773_v45  ;;  %v790_v50 = vcombine.high %v780_v46, %v780_v46  ;;  %801 = vst.msk [vmem:[%s9036_s9 + $0x21] sm:$0x1] %vm585_vm4, %v780_v46  ;;  %802 = vst.msk [vmem:[%s9036_s9 + $0x41] sm:$0x1] %vm585_vm4, %v788_v47  ;;  %8020 = vmatmul.mubr.msk.f32.vlgmr.msra.gmra.mrb[22].mxu1 %vm380_vm3, %v5021_v43 }
 0x1e9   : > { %804 = vst.msk [vmem:[%s9036_s9 + $0x81] sm:$0x1] %vm585_vm4, %v773_v45  ;;  %8302 = vmatpush3.bf16.msra.mxu1 %v8704_v14  ;;  %8040 = vmatprep.mubr.msk.f32.mxu1 %vm8573_vm2, %v8570_v0 }
 0x1ea   : > { %v791_v52 = vcombine.high %v787_v48, %v787_v48  ;;  %803 = vst.msk [vmem:[%s9036_s9 + $0x61] sm:$0x1] %vm585_vm4, %v790_v50  ;;  %805 = vst.msk [vmem:[%s9036_s9 + $0xa1] sm:$0x1] %vm585_vm4, %v787_v48  ;;  %8303 = vmatprep.subr.bf16.mxu1 %v8572_v15 }
 0x1eb   : > { %806 = vst.msk [vmem:[%s9036_s9 + $0xc1] sm:$0x1] %vm585_vm4, %v789_v49 }
 0x1ec   : > { %807 = vst.msk [vmem:[%s9036_s9 + $0xe1] sm:$0x1] %vm585_vm4, %v791_v52  ;;  %8034 = vmatmul.mubr.msk.f32.vlgmr.msra.gmra.mrb[28].mxu0 %vm380_vm3, %v5239_v51  ;;  %8041 = vmatmul.mubr.msk.f32.vlgmr.msra.gmra.mrb[24].mxu1 %vm380_vm3, %v5382_v53 }
 0x1ed   : > { %8305 = vmatpush3.bf16.msra.mxu1 %v8726_v22  ;;  %8308 = vmatpush3.bf16.msra.mxu0 %v8704_v14 }
 0x1ee   : > { %8054 = vmatprep.mubr.msk.f32.mxu0 %vm8573_vm2, %v8570_v0  ;;  %8047 = vmatprep.mubr.msk.f32.mxu1 %vm8573_vm2, %v8570_v0 }
 0x1ef   : > { %8312 = vmatprep.subr.bf16.mxu1 %v8572_v15  ;;  %8309 = vmatprep.subr.bf16.mxu0 %v8572_v15 }
 0x1f0   : > { %8055 = vmatmul.mubr.msk.f32.vlgmr.msra.gmra.mrb[30].mxu0 %vm380_vm3, %v5600_v54 }
 0x1f1   : > { %8311 = vmatpush3.bf16.msra.mxu0 %v8726_v22  ;;  %8061 = vmatprep.mubr.msk.f32.mxu0 %vm8573_vm2, %v8570_v0 }
 0x1f2   : > { %8318 = vmatprep.subr.bf16.mxu0 %v8572_v15 }
 0x1f4   : > { %8048 = vmatmul.mubr.msk.f32.vlgmr.msra.gmra.mrb[24].mxu1 %vm380_vm3, %v5457_v55 }
 0x1f5   : > { %8314 = vmatpush3.bf16.msra.mxu1 %v8704_v14  ;;  %8068 = vmatprep.mubr.msk.f32.mxu1 %vm8573_vm2, %v8570_v0 }
 0x1f6   : > { %8315 = vmatprep.subr.bf16.mxu1 %v8572_v15 }
 0x1f8   : > { %8062 = vmatmul.mubr.msk.f32.vlgmr.msra.gmra.mrb[30].mxu0 %vm380_vm3, %v5675_v56  ;;  %8069 = vmatmul.mubr.msk.f32.vlgmr.msra.gmra.mrb[26].mxu1 %vm380_vm3, %v5818_v57 }
 0x1f9   : > { %8317 = vmatpush3.bf16.msra.mxu1 %v8726_v22  ;;  %8320 = vmatpush3.bf16.msra.mxu0 %v8704_v14 }
 0x1fa   : > { %8082 = vmatprep.mubr.msk.f32.mxu0 %vm8573_vm2, %v8570_v0  ;;  %8075 = vmatprep.mubr.msk.f32.mxu1 %vm8573_vm2, %v8570_v0 }
 0x1fb   : > { %8324 = vmatprep.subr.bf16.mxu1 %v8572_v15  ;;  %8321 = vmatprep.subr.bf16.mxu0 %v8572_v15 }
 0x1fc   : > { %8083 = vmatmul.mubr.msk.f32.vlgmr.msra.gmra.mrb[32].mxu0 %vm380_vm3, %v6036_v58 }
 0x1fd   : > { %8323 = vmatpush3.bf16.msra.mxu0 %v8726_v22  ;;  %8089 = vmatprep.mubr.msk.f32.mxu0 %vm8573_vm2, %v8570_v0 }
 0x1fe   : > { %8330 = vmatprep.subr.bf16.mxu0 %v8572_v15 }
 0x200   : > { %8076 = vmatmul.mubr.msk.f32.vlgmr.msra.gmra.mrb[26].mxu1 %vm380_vm3, %v5893_v59 }
 0x201   : > { %8326 = vmatpush3.bf16.msra.mxu1 %v8704_v14  ;;  %8096 = vmatprep.mubr.msk.f32.mxu1 %vm8573_vm2, %v8570_v0 }
 0x202   : > { %8327 = vmatprep.subr.bf16.mxu1 %v8572_v15 }
 0x204   : > { %8090 = vmatmul.mubr.msk.f32.vlgmr.msra.gmra.mrb[32].mxu0 %vm380_vm3, %v6111_v60  ;;  %8097 = vmatmul.mubr.msk.f32.vlgmr.msra.gmra.mrb[28].mxu1 %vm380_vm3, %v6254_v61 }
 0x205   : > { %8329 = vmatpush3.bf16.msra.mxu1 %v8726_v22  ;;  %8332 = vmatpush3.bf16.msra.mxu0 %v8704_v14 }
 0x206   : > { %8110 = vmatprep.mubr.msk.f32.mxu0 %vm8573_vm2, %v8570_v0  ;;  %8103 = vmatprep.mubr.msk.f32.mxu1 %vm8573_vm2, %v8570_v0 }
 0x207   : > { %8336 = vmatprep.subr.bf16.mxu1 %v8572_v15  ;;  %8333 = vmatprep.subr.bf16.mxu0 %v8572_v15 }
 0x208   : > { %8111 = vmatmul.mubr.msk.f32.vlgmr.msra.gmra.mrb[34].mxu0 %vm380_vm3, %v6472_v62 }
 0x209   : > { %8335 = vmatpush3.bf16.msra.mxu0 %v8726_v22  ;;  %8117 = vmatprep.mubr.msk.f32.mxu0 %vm8573_vm2, %v8570_v0 }
 0x20a   : > { %8342 = vmatprep.subr.bf16.mxu0 %v8572_v15 }
 0x20c   : > { %8104 = vmatmul.mubr.msk.f32.vlgmr.msra.gmra.mrb[28].mxu1 %vm380_vm3, %v6329_v63 }
 0x20d   : > { %8338 = vmatpush3.bf16.msra.mxu1 %v8704_v14  ;;  %8124 = vmatprep.mubr.msk.f32.mxu1 %vm8573_vm2, %v8570_v0 }
 0x20e   : > { %8339 = vmatprep.subr.bf16.mxu1 %v8572_v15 }
 0x210   : > { %8118 = vmatmul.mubr.msk.f32.vlgmr.msra.gmra.mrb[34].mxu0 %vm380_vm3, %v6547_v1  ;;  %8125 = vmatmul.mubr.msk.f32.vlgmr.msra.gmra.mrb[30].mxu1 %vm380_vm3, %v6690_v2 }
 0x211   : > { %8341 = vmatpush3.bf16.msra.mxu1 %v8726_v22  ;;  %8344 = vmatpush3.bf16.msra.mxu0 %v8704_v14 }
 0x212   : > { %8138 = vmatprep.mubr.msk.f32.mxu0 %vm8573_vm2, %v8570_v0  ;;  %8131 = vmatprep.mubr.msk.f32.mxu1 %vm8573_vm2, %v8570_v0 }
 0x213   : > { %8348 = vmatprep.subr.bf16.mxu1 %v8572_v15  ;;  %8345 = vmatprep.subr.bf16.mxu0 %v8572_v15 }
 0x214   : > { %8139 = vmatmul.mubr.msk.f32.vlgmr.msra.gmra.mrb[36].mxu0 %vm380_vm3, %v6908_v3 }
 0x215   : > { %8347 = vmatpush3.bf16.msra.mxu0 %v8726_v22  ;;  %8145 = vmatprep.mubr.msk.f32.mxu0 %vm8573_vm2, %v8570_v0 }
 0x218   : > { %8132 = vmatmul.mubr.msk.f32.vlgmr.msra.gmra.mrb[30].mxu1 %vm380_vm3, %v6765_v4 }
 0x219   : > { %8350 = vmatpush3.bf16.msra.mxu1 %v8704_v14  ;;  %8152 = vmatprep.mubr.msk.f32.mxu1 %vm8573_vm2, %v8570_v0 }
 0x21a   : > { %8351 = vmatprep.subr.bf16.mxu1 %v8572_v15 }
 0x21c   : > { %8146 = vmatmul.mubr.msk.f32.vlgmr.msra.gmra.mrb[36].mxu0 %vm380_vm3, %v6983_v5  ;;  %8153 = vmatmul.mubr.msk.f32.vlgmr.msra.gmra.mrb[32].mxu1 %vm380_vm3, %v7126_v6 }
 0x21d   : > { %8353 = vmatpush3.bf16.msra.mxu1 %v8726_v22  ;;  %8159 = vmatprep.mubr.msk.f32.mxu1 %vm8573_vm2, %v8570_v0 }
 0x224   : > { %8160 = vmatmul.mubr.msk.f32.vlgmr.msra.gmra.mrb[32].mxu1 %vm380_vm3, %v7201_v7 }
 0x247   : > { %v956_v14 = vpop.f32.mrb[8].mxu0 }
 0x248   : > { %v961_v8 = vcombine.high %v956_v14, %v956_v14  ;;  %v968_v15 = vrot.slane %v956_v14, %v9013_v11  ;;  %v7755_v9 = vpop.f32.mrb[9].mxu0 }
 0x24a   : > { %v975_v10 = vrot.slane %v961_v8, %v9013_v11  ;;  %v976_v12 = vcombine.high %v968_v15, %v968_v15  ;;  %v984_v22 = vrot.slane %v968_v15, %v9013_v11 }
 0x24c   : > { %v977_v0 = vcombine.high %v975_v10, %v975_v10  ;;  %v991_v13 = vrot.slane %v975_v10, %v9013_v11  ;;  %v998_v16 = vrot.slane %v976_v12, %v9013_v11  ;;  %v1006_v17 = vcombine.high %v984_v22, %v984_v22  ;;  %1018 = vst.msk [vmem:[%s9036_s9 + $0x2] sm:$0x1] %vm585_vm4, %v984_v22 }
 0x24e   : > { %v1005_v18 = vrot.slane %v977_v0, %v9013_v11  ;;  %v1007_v19 = vcombine.high %v991_v13, %v991_v13  ;;  %v1008_v20 = vcombine.high %v998_v16, %v998_v16  ;;  %1019 = vst.msk [vmem:[%s9036_s9 + $0x22] sm:$0x1] %vm585_vm4, %v998_v16  ;;  %1020 = vst.msk [vmem:[%s9036_s9 + $0x42] sm:$0x1] %vm585_vm4, %v1006_v17 }
 0x24f   : > { %1022 = vst.msk [vmem:[%s9036_s9 + $0x82] sm:$0x1] %vm585_vm4, %v991_v13  ;;  %v1174_v21 = vpop.f32.mrb[4].mxu1 }
 0x250   : > { %v1009_v23 = vcombine.high %v1005_v18, %v1005_v18  ;;  %1021 = vst.msk [vmem:[%s9036_s9 + $0x62] sm:$0x1] %vm585_vm4, %v1008_v20  ;;  %1023 = vst.msk [vmem:[%s9036_s9 + $0xa2] sm:$0x1] %vm585_vm4, %v1005_v18  ;;  %v1179_v24 = vcombine.high %v1174_v21, %v1174_v21  ;;  %v1186_v25 = vrot.slane %v1174_v21, %v9013_v11  ;;  %v7769_v26 = vpop.f32.mrb[5].mxu1 }
 0x251   : > { %1024 = vst.msk [vmem:[%s9036_s9 + $0xc2] sm:$0x1] %vm585_vm4, %v1007_v19 }
 0x252   : > { %1025 = vst.msk [vmem:[%s9036_s9 + $0xe2] sm:$0x1] %vm585_vm4, %v1009_v23  ;;  %v1193_v27 = vrot.slane %v1179_v24, %v9013_v11  ;;  %v1194_v28 = vcombine.high %v1186_v25, %v1186_v25  ;;  %v1202_v29 = vrot.slane %v1186_v25, %v9013_v11 }
 0x253   : > { %v1392_v30 = vpop.f32.mrb[10].mxu0 }
 0x254   : > { %v1195_v31 = vcombine.high %v1193_v27, %v1193_v27  ;;  %v1209_v32 = vrot.slane %v1193_v27, %v9013_v11  ;;  %v1216_v33 = vrot.slane %v1194_v28, %v9013_v11  ;;  %v1224_v34 = vcombine.high %v1202_v29, %v1202_v29  ;;  %1236 = vst.msk [vmem:[%s9036_s9 + $0x3] sm:$0x1] %vm585_vm4, %v1202_v29  ;;  %v7783_v35 = vpop.f32.mrb[11].mxu0 }
 0x255   : > { %v1397_v36 = vcombine.high %v1392_v30, %v1392_v30  ;;  %v1404_v37 = vrot.slane %v1392_v30, %v9013_v11 }
 0x256   : > { %v1223_v38 = vrot.slane %v1195_v31, %v9013_v11  ;;  %v1225_v39 = vcombine.high %v1209_v32, %v1209_v32  ;;  %v1226_v40 = vcombine.high %v1216_v33, %v1216_v33  ;;  %1237 = vst.msk [vmem:[%s9036_s9 + $0x23] sm:$0x1] %vm585_vm4, %v1216_v33  ;;  %1238 = vst.msk [vmem:[%s9036_s9 + $0x43] sm:$0x1] %vm585_vm4, %v1224_v34 }
 0x257   : > { %1240 = vst.msk [vmem:[%s9036_s9 + $0x83] sm:$0x1] %vm585_vm4, %v1209_v32  ;;  %v1411_v41 = vrot.slane %v1397_v36, %v9013_v11  ;;  %v1412_v42 = vcombine.high %v1404_v37, %v1404_v37  ;;  %v1420_v43 = vrot.slane %v1404_v37, %v9013_v11 }
 0x258   : > { %v1227_v44 = vcombine.high %v1223_v38, %v1223_v38  ;;  %1239 = vst.msk [vmem:[%s9036_s9 + $0x63] sm:$0x1] %vm585_vm4, %v1226_v40  ;;  %1241 = vst.msk [vmem:[%s9036_s9 + $0xa3] sm:$0x1] %vm585_vm4, %v1223_v38 }
 0x259   : > { %1242 = vst.msk [vmem:[%s9036_s9 + $0xc3] sm:$0x1] %vm585_vm4, %v1225_v39  ;;  %v1413_v45 = vcombine.high %v1411_v41, %v1411_v41  ;;  %v1427_v46 = vrot.slane %v1411_v41, %v9013_v11  ;;  %v1434_v47 = vrot.slane %v1412_v42, %v9013_v11  ;;  %v1442_v48 = vcombine.high %v1420_v43, %v1420_v43 }
 0x25a   : > { %1454 = vst.msk [vmem:[%s9036_s9 + $0x4] sm:$0x1] %vm585_vm4, %v1420_v43  ;;  %1243 = vst.msk [vmem:[%s9036_s9 + $0xe3] sm:$0x1] %vm585_vm4, %v1227_v44 }
 0x25b   : > { %v1441_v49 = vrot.slane %v1413_v45, %v9013_v11  ;;  %v1443_v50 = vcombine.high %v1427_v46, %v1427_v46  ;;  %v1444_v51 = vcombine.high %v1434_v47, %v1434_v47  ;;  %1455 = vst.msk [vmem:[%s9036_s9 + $0x24] sm:$0x1] %vm585_vm4, %v1434_v47  ;;  %1456 = vst.msk [vmem:[%s9036_s9 + $0x44] sm:$0x1] %vm585_vm4, %v1442_v48  ;;  %v1610_v52 = vpop.f32.mrb[6].mxu1 }
 0x25c   : > { %1458 = vst.msk [vmem:[%s9036_s9 + $0x84] sm:$0x1] %vm585_vm4, %v1427_v46  ;;  %v1615_v53 = vcombine.high %v1610_v52, %v1610_v52  ;;  %v1622_v54 = vrot.slane %v1610_v52, %v9013_v11  ;;  %v7797_v55 = vpop.f32.mrb[7].mxu1 }
 0x25d   : > { %v1445_v56 = vcombine.high %v1441_v49, %v1441_v49  ;;  %1457 = vst.msk [vmem:[%s9036_s9 + $0x64] sm:$0x1] %vm585_vm4, %v1444_v51  ;;  %1459 = vst.msk [vmem:[%s9036_s9 + $0xa4] sm:$0x1] %vm585_vm4, %v1441_v49 }
 0x25e   : > { %1460 = vst.msk [vmem:[%s9036_s9 + $0xc4] sm:$0x1] %vm585_vm4, %v1443_v50  ;;  %v1629_v57 = vrot.slane %v1615_v53, %v9013_v11  ;;  %v1630_v58 = vcombine.high %v1622_v54, %v1622_v54  ;;  %v1638_v59 = vrot.slane %v1622_v54, %v9013_v11 }
 0x25f   : > { %1461 = vst.msk [vmem:[%s9036_s9 + $0xe4] sm:$0x1] %vm585_vm4, %v1445_v56  ;;  %v1828_v60 = vpop.f32.mrb[12].mxu0 }
 0x260   : > { %v1631_v61 = vcombine.high %v1629_v57, %v1629_v57  ;;  %v1645_v62 = vrot.slane %v1629_v57, %v9013_v11  ;;  %v1652_v63 = vrot.slane %v1630_v58, %v9013_v11  ;;  %v1660_v1 = vcombine.high %v1638_v59, %v1638_v59  ;;  %1672 = vst.msk [vmem:[%s9036_s9 + $0x5] sm:$0x1] %vm585_vm4, %v1638_v59  ;;  %v7811_v2 = vpop.f32.mrb[13].mxu0 }
 0x261   : > { %v1833_v3 = vcombine.high %v1828_v60, %v1828_v60  ;;  %v1840_v4 = vrot.slane %v1828_v60, %v9013_v11 }
 0x262   : > { %v1659_v5 = vrot.slane %v1631_v61, %v9013_v11  ;;  %v1661_v6 = vcombine.high %v1645_v62, %v1645_v62  ;;  %v1662_v7 = vcombine.high %v1652_v63, %v1652_v63  ;;  %1673 = vst.msk [vmem:[%s9036_s9 + $0x25] sm:$0x1] %vm585_vm4, %v1652_v63  ;;  %1674 = vst.msk [vmem:[%s9036_s9 + $0x45] sm:$0x1] %vm585_vm4, %v1660_v1 }
 0x263   : > { %1676 = vst.msk [vmem:[%s9036_s9 + $0x85] sm:$0x1] %vm585_vm4, %v1645_v62  ;;  %v1847_v14 = vrot.slane %v1833_v3, %v9013_v11  ;;  %v1848_v8 = vcombine.high %v1840_v4, %v1840_v4  ;;  %v1856_v15 = vrot.slane %v1840_v4, %v9013_v11 }
 0x264   : > { %v1663_v9 = vcombine.high %v1659_v5, %v1659_v5  ;;  %1675 = vst.msk [vmem:[%s9036_s9 + $0x65] sm:$0x1] %vm585_vm4, %v1662_v7  ;;  %1677 = vst.msk [vmem:[%s9036_s9 + $0xa5] sm:$0x1] %vm585_vm4, %v1659_v5 }
 0x265   : > { %1678 = vst.msk [vmem:[%s9036_s9 + $0xc5] sm:$0x1] %vm585_vm4, %v1661_v6  ;;  %v1849_v10 = vcombine.high %v1847_v14, %v1847_v14  ;;  %v1863_v12 = vrot.slane %v1847_v14, %v9013_v11  ;;  %v1870_v22 = vrot.slane %v1848_v8, %v9013_v11  ;;  %v1878_v0 = vcombine.high %v1856_v15, %v1856_v15 }
 0x266   : > { %1890 = vst.msk [vmem:[%s9036_s9 + $0x6] sm:$0x1] %vm585_vm4, %v1856_v15  ;;  %1679 = vst.msk [vmem:[%s9036_s9 + $0xe5] sm:$0x1] %vm585_vm4, %v1663_v9 }
 0x267   : > { %v1877_v13 = vrot.slane %v1849_v10, %v9013_v11  ;;  %v1879_v16 = vcombine.high %v1863_v12, %v1863_v12  ;;  %v1880_v17 = vcombine.high %v1870_v22, %v1870_v22  ;;  %1891 = vst.msk [vmem:[%s9036_s9 + $0x26] sm:$0x1] %vm585_vm4, %v1870_v22  ;;  %1892 = vst.msk [vmem:[%s9036_s9 + $0x46] sm:$0x1] %vm585_vm4, %v1878_v0  ;;  %v2046_v18 = vpop.f32.mrb[8].mxu1 }
 0x268   : > { %1894 = vst.msk [vmem:[%s9036_s9 + $0x86] sm:$0x1] %vm585_vm4, %v1863_v12  ;;  %v2051_v19 = vcombine.high %v2046_v18, %v2046_v18  ;;  %v2058_v20 = vrot.slane %v2046_v18, %v9013_v11  ;;  %v7825_v21 = vpop.f32.mrb[9].mxu1 }
 0x269   : > { %v1881_v23 = vcombine.high %v1877_v13, %v1877_v13  ;;  %1893 = vst.msk [vmem:[%s9036_s9 + $0x66] sm:$0x1] %vm585_vm4, %v1880_v17  ;;  %1895 = vst.msk [vmem:[%s9036_s9 + $0xa6] sm:$0x1] %vm585_vm4, %v1877_v13 }
 0x26a   : > { %1896 = vst.msk [vmem:[%s9036_s9 + $0xc6] sm:$0x1] %vm585_vm4, %v1879_v16  ;;  %v2065_v24 = vrot.slane %v2051_v19, %v9013_v11  ;;  %v2066_v25 = vcombine.high %v2058_v20, %v2058_v20  ;;  %v2074_v26 = vrot.slane %v2058_v20, %v9013_v11 }
 0x26b   : > { %1897 = vst.msk [vmem:[%s9036_s9 + $0xe6] sm:$0x1] %vm585_vm4, %v1881_v23  ;;  %v2264_v27 = vpop.f32.mrb[14].mxu0 }
 0x26c   : > { %v2067_v28 = vcombine.high %v2065_v24, %v2065_v24  ;;  %v2081_v29 = vrot.slane %v2065_v24, %v9013_v11  ;;  %v2088_v30 = vrot.slane %v2066_v25, %v9013_v11  ;;  %v2096_v31 = vcombine.high %v2074_v26, %v2074_v26  ;;  %2108 = vst.msk [vmem:[%s9036_s9 + $0x7] sm:$0x1] %vm585_vm4, %v2074_v26  ;;  %v7839_v32 = vpop.f32.mrb[15].mxu0 }
 0x26d   : > { %v2269_v33 = vcombine.high %v2264_v27, %v2264_v27  ;;  %v2276_v34 = vrot.slane %v2264_v27, %v9013_v11 }
 0x26e   : > { %v2095_v35 = vrot.slane %v2067_v28, %v9013_v11  ;;  %v2097_v36 = vcombine.high %v2081_v29, %v2081_v29  ;;  %v2098_v37 = vcombine.high %v2088_v30, %v2088_v30  ;;  %2109 = vst.msk [vmem:[%s9036_s9 + $0x27] sm:$0x1] %vm585_vm4, %v2088_v30  ;;  %2110 = vst.msk [vmem:[%s9036_s9 + $0x47] sm:$0x1] %vm585_vm4, %v2096_v31 }
 0x26f   : > { %2112 = vst.msk [vmem:[%s9036_s9 + $0x87] sm:$0x1] %vm585_vm4, %v2081_v29  ;;  %v2283_v38 = vrot.slane %v2269_v33, %v9013_v11  ;;  %v2284_v39 = vcombine.high %v2276_v34, %v2276_v34  ;;  %v2292_v40 = vrot.slane %v2276_v34, %v9013_v11 }
 0x270   : > { %v2099_v41 = vcombine.high %v2095_v35, %v2095_v35  ;;  %2111 = vst.msk [vmem:[%s9036_s9 + $0x67] sm:$0x1] %vm585_vm4, %v2098_v37  ;;  %2113 = vst.msk [vmem:[%s9036_s9 + $0xa7] sm:$0x1] %vm585_vm4, %v2095_v35 }
 0x271   : > { %2114 = vst.msk [vmem:[%s9036_s9 + $0xc7] sm:$0x1] %vm585_vm4, %v2097_v36  ;;  %v2285_v42 = vcombine.high %v2283_v38, %v2283_v38  ;;  %v2299_v43 = vrot.slane %v2283_v38, %v9013_v11  ;;  %v2306_v44 = vrot.slane %v2284_v39, %v9013_v11  ;;  %v2314_v45 = vcombine.high %v2292_v40, %v2292_v40 }
 0x272   : > { %2326 = vst.msk [vmem:[%s9036_s9 + $0x8] sm:$0x1] %vm585_vm4, %v2292_v40  ;;  %2115 = vst.msk [vmem:[%s9036_s9 + $0xe7] sm:$0x1] %vm585_vm4, %v2099_v41 }
 0x273   : > { %v2313_v46 = vrot.slane %v2285_v42, %v9013_v11  ;;  %v2315_v47 = vcombine.high %v2299_v43, %v2299_v43  ;;  %v2316_v48 = vcombine.high %v2306_v44, %v2306_v44  ;;  %2327 = vst.msk [vmem:[%s9036_s9 + $0x28] sm:$0x1] %vm585_vm4, %v2306_v44  ;;  %2328 = vst.msk [vmem:[%s9036_s9 + $0x48] sm:$0x1] %vm585_vm4, %v2314_v45  ;;  %v2482_v49 = vpop.f32.mrb[10].mxu1 }
 0x274   : > { %2330 = vst.msk [vmem:[%s9036_s9 + $0x88] sm:$0x1] %vm585_vm4, %v2299_v43  ;;  %v2487_v50 = vcombine.high %v2482_v49, %v2482_v49  ;;  %v2494_v51 = vrot.slane %v2482_v49, %v9013_v11  ;;  %v7853_v52 = vpop.f32.mrb[11].mxu1 }
 0x275   : > { %v2317_v53 = vcombine.high %v2313_v46, %v2313_v46  ;;  %2329 = vst.msk [vmem:[%s9036_s9 + $0x68] sm:$0x1] %vm585_vm4, %v2316_v48  ;;  %2331 = vst.msk [vmem:[%s9036_s9 + $0xa8] sm:$0x1] %vm585_vm4, %v2313_v46 }
 0x276   : > { %2332 = vst.msk [vmem:[%s9036_s9 + $0xc8] sm:$0x1] %vm585_vm4, %v2315_v47  ;;  %v2501_v54 = vrot.slane %v2487_v50, %v9013_v11  ;;  %v2502_v55 = vcombine.high %v2494_v51, %v2494_v51  ;;  %v2510_v56 = vrot.slane %v2494_v51, %v9013_v11 }
 0x277   : > { %2333 = vst.msk [vmem:[%s9036_s9 + $0xe8] sm:$0x1] %vm585_vm4, %v2317_v53  ;;  %v2700_v57 = vpop.f32.mrb[16].mxu0 }
 0x278   : > { %v2503_v58 = vcombine.high %v2501_v54, %v2501_v54  ;;  %v2517_v59 = vrot.slane %v2501_v54, %v9013_v11  ;;  %v2524_v60 = vrot.slane %v2502_v55, %v9013_v11  ;;  %v2532_v61 = vcombine.high %v2510_v56, %v2510_v56  ;;  %2544 = vst.msk [vmem:[%s9036_s9 + $0x9] sm:$0x1] %vm585_vm4, %v2510_v56  ;;  %v7867_v62 = vpop.f32.mrb[17].mxu0 }
 0x279   : > { %v2705_v63 = vcombine.high %v2700_v57, %v2700_v57  ;;  %v2712_v1 = vrot.slane %v2700_v57, %v9013_v11 }
 0x27a   : > { %v2531_v2 = vrot.slane %v2503_v58, %v9013_v11  ;;  %v2533_v3 = vcombine.high %v2517_v59, %v2517_v59  ;;  %v2534_v4 = vcombine.high %v2524_v60, %v2524_v60  ;;  %2545 = vst.msk [vmem:[%s9036_s9 + $0x29] sm:$0x1] %vm585_vm4, %v2524_v60  ;;  %2546 = vst.msk [vmem:[%s9036_s9 + $0x49] sm:$0x1] %vm585_vm4, %v2532_v61 }
 0x27b   : > { %2548 = vst.msk [vmem:[%s9036_s9 + $0x89] sm:$0x1] %vm585_vm4, %v2517_v59  ;;  %v2719_v5 = vrot.slane %v2705_v63, %v9013_v11  ;;  %v2720_v6 = vcombine.high %v2712_v1, %v2712_v1  ;;  %v2728_v7 = vrot.slane %v2712_v1, %v9013_v11 }
 0x27c   : > { %v2535_v14 = vcombine.high %v2531_v2, %v2531_v2  ;;  %2547 = vst.msk [vmem:[%s9036_s9 + $0x69] sm:$0x1] %vm585_vm4, %v2534_v4  ;;  %2549 = vst.msk [vmem:[%s9036_s9 + $0xa9] sm:$0x1] %vm585_vm4, %v2531_v2 }
 0x27d   : > { %2550 = vst.msk [vmem:[%s9036_s9 + $0xc9] sm:$0x1] %vm585_vm4, %v2533_v3  ;;  %v2721_v8 = vcombine.high %v2719_v5, %v2719_v5  ;;  %v2735_v15 = vrot.slane %v2719_v5, %v9013_v11  ;;  %v2742_v9 = vrot.slane %v2720_v6, %v9013_v11  ;;  %v2750_v10 = vcombine.high %v2728_v7, %v2728_v7 }
 0x27e   : > { %2762 = vst.msk [vmem:[%s9036_s9 + $0xa] sm:$0x1] %vm585_vm4, %v2728_v7  ;;  %2551 = vst.msk [vmem:[%s9036_s9 + $0xe9] sm:$0x1] %vm585_vm4, %v2535_v14 }
 0x27f   : > { %v2749_v12 = vrot.slane %v2721_v8, %v9013_v11  ;;  %v2751_v22 = vcombine.high %v2735_v15, %v2735_v15  ;;  %v2752_v0 = vcombine.high %v2742_v9, %v2742_v9  ;;  %2763 = vst.msk [vmem:[%s9036_s9 + $0x2a] sm:$0x1] %vm585_vm4, %v2742_v9  ;;  %2764 = vst.msk [vmem:[%s9036_s9 + $0x4a] sm:$0x1] %vm585_vm4, %v2750_v10  ;;  %v2918_v13 = vpop.f32.mrb[12].mxu1 }
 0x280   : > { %2766 = vst.msk [vmem:[%s9036_s9 + $0x8a] sm:$0x1] %vm585_vm4, %v2735_v15  ;;  %v2923_v16 = vcombine.high %v2918_v13, %v2918_v13  ;;  %v2930_v17 = vrot.slane %v2918_v13, %v9013_v11  ;;  %v7881_v18 = vpop.f32.mrb[13].mxu1 }
 0x281   : > { %v2753_v19 = vcombine.high %v2749_v12, %v2749_v12  ;;  %2765 = vst.msk [vmem:[%s9036_s9 + $0x6a] sm:$0x1] %vm585_vm4, %v2752_v0  ;;  %2767 = vst.msk [vmem:[%s9036_s9 + $0xaa] sm:$0x1] %vm585_vm4, %v2749_v12 }
 0x282   : > { %2768 = vst.msk [vmem:[%s9036_s9 + $0xca] sm:$0x1] %vm585_vm4, %v2751_v22  ;;  %v2937_v20 = vrot.slane %v2923_v16, %v9013_v11  ;;  %v2938_v21 = vcombine.high %v2930_v17, %v2930_v17  ;;  %v2946_v23 = vrot.slane %v2930_v17, %v9013_v11 }
 0x283   : > { %2769 = vst.msk [vmem:[%s9036_s9 + $0xea] sm:$0x1] %vm585_vm4, %v2753_v19  ;;  %v3136_v24 = vpop.f32.mrb[18].mxu0 }
 0x284   : > { %v2939_v25 = vcombine.high %v2937_v20, %v2937_v20  ;;  %v2953_v26 = vrot.slane %v2937_v20, %v9013_v11  ;;  %v2960_v27 = vrot.slane %v2938_v21, %v9013_v11  ;;  %v2968_v28 = vcombine.high %v2946_v23, %v2946_v23  ;;  %2980 = vst.msk [vmem:[%s9036_s9 + $0xb] sm:$0x1] %vm585_vm4, %v2946_v23  ;;  %v7895_v29 = vpop.f32.mrb[19].mxu0 }
 0x285   : > { %v3141_v30 = vcombine.high %v3136_v24, %v3136_v24  ;;  %v3148_v31 = vrot.slane %v3136_v24, %v9013_v11 }
 0x286   : > { %v2967_v32 = vrot.slane %v2939_v25, %v9013_v11  ;;  %v2969_v33 = vcombine.high %v2953_v26, %v2953_v26  ;;  %v2970_v34 = vcombine.high %v2960_v27, %v2960_v27  ;;  %2981 = vst.msk [vmem:[%s9036_s9 + $0x2b] sm:$0x1] %vm585_vm4, %v2960_v27  ;;  %2982 = vst.msk [vmem:[%s9036_s9 + $0x4b] sm:$0x1] %vm585_vm4, %v2968_v28 }
 0x287   : > { %2984 = vst.msk [vmem:[%s9036_s9 + $0x8b] sm:$0x1] %vm585_vm4, %v2953_v26  ;;  %v3155_v35 = vrot.slane %v3141_v30, %v9013_v11  ;;  %v3156_v36 = vcombine.high %v3148_v31, %v3148_v31  ;;  %v3164_v37 = vrot.slane %v3148_v31, %v9013_v11 }
 0x288   : > { %v2971_v38 = vcombine.high %v2967_v32, %v2967_v32  ;;  %2983 = vst.msk [vmem:[%s9036_s9 + $0x6b] sm:$0x1] %vm585_vm4, %v2970_v34  ;;  %2985 = vst.msk [vmem:[%s9036_s9 + $0xab] sm:$0x1] %vm585_vm4, %v2967_v32 }
 0x289   : > { %2986 = vst.msk [vmem:[%s9036_s9 + $0xcb] sm:$0x1] %vm585_vm4, %v2969_v33  ;;  %v3157_v39 = vcombine.high %v3155_v35, %v3155_v35  ;;  %v3171_v40 = vrot.slane %v3155_v35, %v9013_v11  ;;  %v3178_v41 = vrot.slane %v3156_v36, %v9013_v11  ;;  %v3186_v42 = vcombine.high %v3164_v37, %v3164_v37 }
 0x28a   : > { %3198 = vst.msk [vmem:[%s9036_s9 + $0xc] sm:$0x1] %vm585_vm4, %v3164_v37  ;;  %2987 = vst.msk [vmem:[%s9036_s9 + $0xeb] sm:$0x1] %vm585_vm4, %v2971_v38 }
 0x28b   : > { %v3185_v43 = vrot.slane %v3157_v39, %v9013_v11  ;;  %v3187_v44 = vcombine.high %v3171_v40, %v3171_v40  ;;  %v3188_v45 = vcombine.high %v3178_v41, %v3178_v41  ;;  %3199 = vst.msk [vmem:[%s9036_s9 + $0x2c] sm:$0x1] %vm585_vm4, %v3178_v41  ;;  %3200 = vst.msk [vmem:[%s9036_s9 + $0x4c] sm:$0x1] %vm585_vm4, %v3186_v42  ;;  %v3354_v46 = vpop.f32.mrb[14].mxu1 }
 0x28c   : > { %3202 = vst.msk [vmem:[%s9036_s9 + $0x8c] sm:$0x1] %vm585_vm4, %v3171_v40  ;;  %v3359_v47 = vcombine.high %v3354_v46, %v3354_v46  ;;  %v3366_v48 = vrot.slane %v3354_v46, %v9013_v11  ;;  %v7909_v49 = vpop.f32.mrb[15].mxu1 }
 0x28d   : > { %v3189_v50 = vcombine.high %v3185_v43, %v3185_v43  ;;  %3201 = vst.msk [vmem:[%s9036_s9 + $0x6c] sm:$0x1] %vm585_vm4, %v3188_v45  ;;  %3203 = vst.msk [vmem:[%s9036_s9 + $0xac] sm:$0x1] %vm585_vm4, %v3185_v43 }
 0x28e   : > { %3204 = vst.msk [vmem:[%s9036_s9 + $0xcc] sm:$0x1] %vm585_vm4, %v3187_v44  ;;  %v3373_v51 = vrot.slane %v3359_v47, %v9013_v11  ;;  %v3374_v52 = vcombine.high %v3366_v48, %v3366_v48  ;;  %v3382_v53 = vrot.slane %v3366_v48, %v9013_v11 }
 0x28f   : > { %3205 = vst.msk [vmem:[%s9036_s9 + $0xec] sm:$0x1] %vm585_vm4, %v3189_v50  ;;  %v3572_v54 = vpop.f32.mrb[20].mxu0 }
 0x290   : > { %v3375_v55 = vcombine.high %v3373_v51, %v3373_v51  ;;  %v3389_v56 = vrot.slane %v3373_v51, %v9013_v11  ;;  %v3396_v57 = vrot.slane %v3374_v52, %v9013_v11  ;;  %v3404_v58 = vcombine.high %v3382_v53, %v3382_v53  ;;  %3416 = vst.msk [vmem:[%s9036_s9 + $0xd] sm:$0x1] %vm585_vm4, %v3382_v53  ;;  %v7923_v59 = vpop.f32.mrb[21].mxu0 }
 0x291   : > { %v3577_v60 = vcombine.high %v3572_v54, %v3572_v54  ;;  %v3584_v61 = vrot.slane %v3572_v54, %v9013_v11 }
 0x292   : > { %v3403_v62 = vrot.slane %v3375_v55, %v9013_v11  ;;  %v3405_v63 = vcombine.high %v3389_v56, %v3389_v56  ;;  %v3406_v1 = vcombine.high %v3396_v57, %v3396_v57  ;;  %3417 = vst.msk [vmem:[%s9036_s9 + $0x2d] sm:$0x1] %vm585_vm4, %v3396_v57  ;;  %3418 = vst.msk [vmem:[%s9036_s9 + $0x4d] sm:$0x1] %vm585_vm4, %v3404_v58 }
 0x293   : > { %3420 = vst.msk [vmem:[%s9036_s9 + $0x8d] sm:$0x1] %vm585_vm4, %v3389_v56  ;;  %v3591_v2 = vrot.slane %v3577_v60, %v9013_v11  ;;  %v3592_v3 = vcombine.high %v3584_v61, %v3584_v61  ;;  %v3600_v4 = vrot.slane %v3584_v61, %v9013_v11 }
 0x294   : > { %v3407_v5 = vcombine.high %v3403_v62, %v3403_v62  ;;  %3419 = vst.msk [vmem:[%s9036_s9 + $0x6d] sm:$0x1] %vm585_vm4, %v3406_v1  ;;  %3421 = vst.msk [vmem:[%s9036_s9 + $0xad] sm:$0x1] %vm585_vm4, %v3403_v62 }
 0x295   : > { %3422 = vst.msk [vmem:[%s9036_s9 + $0xcd] sm:$0x1] %vm585_vm4, %v3405_v63  ;;  %v3593_v6 = vcombine.high %v3591_v2, %v3591_v2  ;;  %v3607_v7 = vrot.slane %v3591_v2, %v9013_v11  ;;  %v3614_v14 = vrot.slane %v3592_v3, %v9013_v11  ;;  %v3622_v8 = vcombine.high %v3600_v4, %v3600_v4 }
 0x296   : > { %3634 = vst.msk [vmem:[%s9036_s9 + $0xe] sm:$0x1] %vm585_vm4, %v3600_v4  ;;  %3423 = vst.msk [vmem:[%s9036_s9 + $0xed] sm:$0x1] %vm585_vm4, %v3407_v5 }
 0x297   : > { %v3621_v15 = vrot.slane %v3593_v6, %v9013_v11  ;;  %v3623_v9 = vcombine.high %v3607_v7, %v3607_v7  ;;  %v3624_v10 = vcombine.high %v3614_v14, %v3614_v14  ;;  %3635 = vst.msk [vmem:[%s9036_s9 + $0x2e] sm:$0x1] %vm585_vm4, %v3614_v14  ;;  %3636 = vst.msk [vmem:[%s9036_s9 + $0x4e] sm:$0x1] %vm585_vm4, %v3622_v8  ;;  %v3790_v12 = vpop.f32.mrb[16].mxu1 }
 0x298   : > { %3638 = vst.msk [vmem:[%s9036_s9 + $0x8e] sm:$0x1] %vm585_vm4, %v3607_v7  ;;  %v3795_v22 = vcombine.high %v3790_v12, %v3790_v12  ;;  %v3802_v0 = vrot.slane %v3790_v12, %v9013_v11  ;;  %v7937_v13 = vpop.f32.mrb[17].mxu1 }
 0x299   : > { %v3625_v16 = vcombine.high %v3621_v15, %v3621_v15  ;;  %3637 = vst.msk [vmem:[%s9036_s9 + $0x6e] sm:$0x1] %vm585_vm4, %v3624_v10  ;;  %3639 = vst.msk [vmem:[%s9036_s9 + $0xae] sm:$0x1] %vm585_vm4, %v3621_v15 }
 0x29a   : > { %3640 = vst.msk [vmem:[%s9036_s9 + $0xce] sm:$0x1] %vm585_vm4, %v3623_v9  ;;  %v3809_v17 = vrot.slane %v3795_v22, %v9013_v11  ;;  %v3810_v18 = vcombine.high %v3802_v0, %v3802_v0  ;;  %v3818_v19 = vrot.slane %v3802_v0, %v9013_v11 }
 0x29b   : > { %3641 = vst.msk [vmem:[%s9036_s9 + $0xee] sm:$0x1] %vm585_vm4, %v3625_v16  ;;  %v4004_v20 = vpop.f32.mrb[22].mxu0 }
 0x29c   : > { %v3811_v21 = vcombine.high %v3809_v17, %v3809_v17  ;;  %v3825_v23 = vrot.slane %v3809_v17, %v9013_v11  ;;  %v3832_v24 = vrot.slane %v3810_v18, %v9013_v11  ;;  %v3840_v25 = vcombine.high %v3818_v19, %v3818_v19  ;;  %3852 = vst.msk [vmem:[%s9036_s9 + $0xf] sm:$0x1] %vm585_vm4, %v3818_v19  ;;  %v7951_v26 = vpop.f32.mrb[23].mxu0 }
 0x29d   : > { %v4009_v27 = vcombine.high %v4004_v20, %v4004_v20  ;;  %v4016_v28 = vrot.slane %v4004_v20, %v9013_v11 }
 0x29e   : > { %v3839_v29 = vrot.slane %v3811_v21, %v9013_v11  ;;  %v3841_v30 = vcombine.high %v3825_v23, %v3825_v23  ;;  %v3842_v31 = vcombine.high %v3832_v24, %v3832_v24  ;;  %3853 = vst.msk [vmem:[%s9036_s9 + $0x2f] sm:$0x1] %vm585_vm4, %v3832_v24  ;;  %3854 = vst.msk [vmem:[%s9036_s9 + $0x4f] sm:$0x1] %vm585_vm4, %v3840_v25 }
 0x29f   : > { %3856 = vst.msk [vmem:[%s9036_s9 + $0x8f] sm:$0x1] %vm585_vm4, %v3825_v23  ;;  %v4023_v32 = vrot.slane %v4009_v27, %v9013_v11  ;;  %v4024_v33 = vcombine.high %v4016_v28, %v4016_v28  ;;  %v4032_v34 = vrot.slane %v4016_v28, %v9013_v11 }
 0x2a0   : > { %v3843_v35 = vcombine.high %v3839_v29, %v3839_v29  ;;  %3855 = vst.msk [vmem:[%s9036_s9 + $0x6f] sm:$0x1] %vm585_vm4, %v3842_v31  ;;  %3857 = vst.msk [vmem:[%s9036_s9 + $0xaf] sm:$0x1] %vm585_vm4, %v3839_v29 }
 0x2a1   : > { %3858 = vst.msk [vmem:[%s9036_s9 + $0xcf] sm:$0x1] %vm585_vm4, %v3841_v30  ;;  %v4025_v36 = vcombine.high %v4023_v32, %v4023_v32  ;;  %v4039_v37 = vrot.slane %v4023_v32, %v9013_v11  ;;  %v4046_v38 = vrot.slane %v4024_v33, %v9013_v11  ;;  %v4054_v39 = vcombine.high %v4032_v34, %v4032_v34 }
 0x2a2   : > { %4066 = vst.msk [vmem:[%s9036_s9 + $0x10] sm:$0x1] %vm585_vm4, %v4032_v34  ;;  %3859 = vst.msk [vmem:[%s9036_s9 + $0xef] sm:$0x1] %vm585_vm4, %v3843_v35 }
 0x2a3   : > { %v4053_v40 = vrot.slane %v4025_v36, %v9013_v11  ;;  %v4055_v41 = vcombine.high %v4039_v37, %v4039_v37  ;;  %v4056_v42 = vcombine.high %v4046_v38, %v4046_v38  ;;  %4067 = vst.msk [vmem:[%s9036_s9 + $0x30] sm:$0x1] %vm585_vm4, %v4046_v38  ;;  %4068 = vst.msk [vmem:[%s9036_s9 + $0x50] sm:$0x1] %vm585_vm4, %v4054_v39  ;;  %v4218_v43 = vpop.f32.mrb[18].mxu1 }
 0x2a4   : > { %4070 = vst.msk [vmem:[%s9036_s9 + $0x90] sm:$0x1] %vm585_vm4, %v4039_v37  ;;  %v4223_v44 = vcombine.high %v4218_v43, %v4218_v43  ;;  %v4230_v45 = vrot.slane %v4218_v43, %v9013_v11  ;;  %v7965_v46 = vpop.f32.mrb[19].mxu1 }
 0x2a5   : > { %v4057_v47 = vcombine.high %v4053_v40, %v4053_v40  ;;  %4069 = vst.msk [vmem:[%s9036_s9 + $0x70] sm:$0x1] %vm585_vm4, %v4056_v42  ;;  %4071 = vst.msk [vmem:[%s9036_s9 + $0xb0] sm:$0x1] %vm585_vm4, %v4053_v40 }
 0x2a6   : > { %4072 = vst.msk [vmem:[%s9036_s9 + $0xd0] sm:$0x1] %vm585_vm4, %v4055_v41  ;;  %v4237_v48 = vrot.slane %v4223_v44, %v9013_v11  ;;  %v4238_v49 = vcombine.high %v4230_v45, %v4230_v45  ;;  %v4246_v50 = vrot.slane %v4230_v45, %v9013_v11 }
 0x2a7   : > { %4073 = vst.msk [vmem:[%s9036_s9 + $0xf0] sm:$0x1] %vm585_vm4, %v4057_v47  ;;  %v4436_v51 = vpop.f32.mrb[24].mxu0 }
 0x2a8   : > { %v4239_v52 = vcombine.high %v4237_v48, %v4237_v48  ;;  %v4253_v53 = vrot.slane %v4237_v48, %v9013_v11  ;;  %v4260_v54 = vrot.slane %v4238_v49, %v9013_v11  ;;  %v4268_v55 = vcombine.high %v4246_v50, %v4246_v50  ;;  %4280 = vst.msk [vmem:[%s9036_s9 + $0x11] sm:$0x1] %vm585_vm4, %v4246_v50  ;;  %v7979_v56 = vpop.f32.mrb[25].mxu0 }
 0x2a9   : > { %v4441_v57 = vcombine.high %v4436_v51, %v4436_v51  ;;  %v4448_v58 = vrot.slane %v4436_v51, %v9013_v11 }
 0x2aa   : > { %v4267_v59 = vrot.slane %v4239_v52, %v9013_v11  ;;  %v4269_v60 = vcombine.high %v4253_v53, %v4253_v53  ;;  %v4270_v61 = vcombine.high %v4260_v54, %v4260_v54  ;;  %4281 = vst.msk [vmem:[%s9036_s9 + $0x31] sm:$0x1] %vm585_vm4, %v4260_v54  ;;  %4282 = vst.msk [vmem:[%s9036_s9 + $0x51] sm:$0x1] %vm585_vm4, %v4268_v55 }
 0x2ab   : > { %4284 = vst.msk [vmem:[%s9036_s9 + $0x91] sm:$0x1] %vm585_vm4, %v4253_v53  ;;  %v4455_v62 = vrot.slane %v4441_v57, %v9013_v11  ;;  %v4456_v63 = vcombine.high %v4448_v58, %v4448_v58  ;;  %v4464_v1 = vrot.slane %v4448_v58, %v9013_v11 }
 0x2ac   : > { %v4271_v2 = vcombine.high %v4267_v59, %v4267_v59  ;;  %4283 = vst.msk [vmem:[%s9036_s9 + $0x71] sm:$0x1] %vm585_vm4, %v4270_v61  ;;  %4285 = vst.msk [vmem:[%s9036_s9 + $0xb1] sm:$0x1] %vm585_vm4, %v4267_v59 }
 0x2ad   : > { %4286 = vst.msk [vmem:[%s9036_s9 + $0xd1] sm:$0x1] %vm585_vm4, %v4269_v60  ;;  %v4457_v3 = vcombine.high %v4455_v62, %v4455_v62  ;;  %v4471_v4 = vrot.slane %v4455_v62, %v9013_v11  ;;  %v4478_v5 = vrot.slane %v4456_v63, %v9013_v11  ;;  %v4486_v6 = vcombine.high %v4464_v1, %v4464_v1 }
 0x2ae   : > { %4498 = vst.msk [vmem:[%s9036_s9 + $0x12] sm:$0x1] %vm585_vm4, %v4464_v1  ;;  %4287 = vst.msk [vmem:[%s9036_s9 + $0xf1] sm:$0x1] %vm585_vm4, %v4271_v2 }
 0x2af   : > { %v4485_v7 = vrot.slane %v4457_v3, %v9013_v11  ;;  %v4487_v14 = vcombine.high %v4471_v4, %v4471_v4  ;;  %v4488_v8 = vcombine.high %v4478_v5, %v4478_v5  ;;  %4499 = vst.msk [vmem:[%s9036_s9 + $0x32] sm:$0x1] %vm585_vm4, %v4478_v5  ;;  %4500 = vst.msk [vmem:[%s9036_s9 + $0x52] sm:$0x1] %vm585_vm4, %v4486_v6  ;;  %v4654_v15 = vpop.f32.mrb[20].mxu1 }
 0x2b0   : > { %4502 = vst.msk [vmem:[%s9036_s9 + $0x92] sm:$0x1] %vm585_vm4, %v4471_v4  ;;  %v4659_v9 = vcombine.high %v4654_v15, %v4654_v15  ;;  %v4666_v10 = vrot.slane %v4654_v15, %v9013_v11  ;;  %v7993_v12 = vpop.f32.mrb[21].mxu1 }
 0x2b1   : > { %v4489_v22 = vcombine.high %v4485_v7, %v4485_v7  ;;  %4501 = vst.msk [vmem:[%s9036_s9 + $0x72] sm:$0x1] %vm585_vm4, %v4488_v8  ;;  %4503 = vst.msk [vmem:[%s9036_s9 + $0xb2] sm:$0x1] %vm585_vm4, %v4485_v7 }
 0x2b2   : > { %4504 = vst.msk [vmem:[%s9036_s9 + $0xd2] sm:$0x1] %vm585_vm4, %v4487_v14  ;;  %v4673_v0 = vrot.slane %v4659_v9, %v9013_v11  ;;  %v4674_v13 = vcombine.high %v4666_v10, %v4666_v10  ;;  %v4682_v16 = vrot.slane %v4666_v10, %v9013_v11 }
 0x2b3   : > { %4505 = vst.msk [vmem:[%s9036_s9 + $0xf2] sm:$0x1] %vm585_vm4, %v4489_v22  ;;  %v4872_v17 = vpop.f32.mrb[26].mxu0 }
 0x2b4   : > { %v4675_v18 = vcombine.high %v4673_v0, %v4673_v0  ;;  %v4689_v19 = vrot.slane %v4673_v0, %v9013_v11  ;;  %v4696_v20 = vrot.slane %v4674_v13, %v9013_v11  ;;  %v4704_v21 = vcombine.high %v4682_v16, %v4682_v16  ;;  %4716 = vst.msk [vmem:[%s9036_s9 + $0x13] sm:$0x1] %vm585_vm4, %v4682_v16  ;;  %v8007_v23 = vpop.f32.mrb[27].mxu0 }
 0x2b5   : > { %v4877_v24 = vcombine.high %v4872_v17, %v4872_v17  ;;  %v4884_v25 = vrot.slane %v4872_v17, %v9013_v11 }
 0x2b6   : > { %v4703_v26 = vrot.slane %v4675_v18, %v9013_v11  ;;  %v4705_v27 = vcombine.high %v4689_v19, %v4689_v19  ;;  %v4706_v28 = vcombine.high %v4696_v20, %v4696_v20  ;;  %4717 = vst.msk [vmem:[%s9036_s9 + $0x33] sm:$0x1] %vm585_vm4, %v4696_v20  ;;  %4718 = vst.msk [vmem:[%s9036_s9 + $0x53] sm:$0x1] %vm585_vm4, %v4704_v21 }
 0x2b7   : > { %4720 = vst.msk [vmem:[%s9036_s9 + $0x93] sm:$0x1] %vm585_vm4, %v4689_v19  ;;  %v4891_v29 = vrot.slane %v4877_v24, %v9013_v11  ;;  %v4892_v30 = vcombine.high %v4884_v25, %v4884_v25  ;;  %v4900_v31 = vrot.slane %v4884_v25, %v9013_v11 }
 0x2b8   : > { %v4707_v32 = vcombine.high %v4703_v26, %v4703_v26  ;;  %4719 = vst.msk [vmem:[%s9036_s9 + $0x73] sm:$0x1] %vm585_vm4, %v4706_v28  ;;  %4721 = vst.msk [vmem:[%s9036_s9 + $0xb3] sm:$0x1] %vm585_vm4, %v4703_v26 }
 0x2b9   : > { %4722 = vst.msk [vmem:[%s9036_s9 + $0xd3] sm:$0x1] %vm585_vm4, %v4705_v27  ;;  %v4893_v33 = vcombine.high %v4891_v29, %v4891_v29  ;;  %v4907_v34 = vrot.slane %v4891_v29, %v9013_v11  ;;  %v4914_v35 = vrot.slane %v4892_v30, %v9013_v11  ;;  %v4922_v36 = vcombine.high %v4900_v31, %v4900_v31 }
 0x2ba   : > { %4934 = vst.msk [vmem:[%s9036_s9 + $0x14] sm:$0x1] %vm585_vm4, %v4900_v31  ;;  %4723 = vst.msk [vmem:[%s9036_s9 + $0xf3] sm:$0x1] %vm585_vm4, %v4707_v32 }
 0x2bb   : > { %v4921_v37 = vrot.slane %v4893_v33, %v9013_v11  ;;  %v4923_v38 = vcombine.high %v4907_v34, %v4907_v34  ;;  %v4924_v39 = vcombine.high %v4914_v35, %v4914_v35  ;;  %4935 = vst.msk [vmem:[%s9036_s9 + $0x34] sm:$0x1] %vm585_vm4, %v4914_v35  ;;  %4936 = vst.msk [vmem:[%s9036_s9 + $0x54] sm:$0x1] %vm585_vm4, %v4922_v36  ;;  %v5090_v40 = vpop.f32.mrb[22].mxu1 }
 0x2bc   : > { %4938 = vst.msk [vmem:[%s9036_s9 + $0x94] sm:$0x1] %vm585_vm4, %v4907_v34  ;;  %v5095_v41 = vcombine.high %v5090_v40, %v5090_v40  ;;  %v5102_v42 = vrot.slane %v5090_v40, %v9013_v11  ;;  %v8021_v43 = vpop.f32.mrb[23].mxu1 }
 0x2bd   : > { %v4925_v44 = vcombine.high %v4921_v37, %v4921_v37  ;;  %4937 = vst.msk [vmem:[%s9036_s9 + $0x74] sm:$0x1] %vm585_vm4, %v4924_v39  ;;  %4939 = vst.msk [vmem:[%s9036_s9 + $0xb4] sm:$0x1] %vm585_vm4, %v4921_v37 }
 0x2be   : > { %4940 = vst.msk [vmem:[%s9036_s9 + $0xd4] sm:$0x1] %vm585_vm4, %v4923_v38  ;;  %v5109_v45 = vrot.slane %v5095_v41, %v9013_v11  ;;  %v5110_v46 = vcombine.high %v5102_v42, %v5102_v42  ;;  %v5118_v47 = vrot.slane %v5102_v42, %v9013_v11 }
 0x2bf   : > { %4941 = vst.msk [vmem:[%s9036_s9 + $0xf4] sm:$0x1] %vm585_vm4, %v4925_v44  ;;  %v5308_v48 = vpop.f32.mrb[28].mxu0 }
 0x2c0   : > { %v5111_v49 = vcombine.high %v5109_v45, %v5109_v45  ;;  %v5125_v50 = vrot.slane %v5109_v45, %v9013_v11  ;;  %v5132_v51 = vrot.slane %v5110_v46, %v9013_v11  ;;  %v5140_v52 = vcombine.high %v5118_v47, %v5118_v47  ;;  %5152 = vst.msk [vmem:[%s9036_s9 + $0x15] sm:$0x1] %vm585_vm4, %v5118_v47  ;;  %v8035_v53 = vpop.f32.mrb[29].mxu0 }
 0x2c1   : > { %v5313_v54 = vcombine.high %v5308_v48, %v5308_v48  ;;  %v5320_v55 = vrot.slane %v5308_v48, %v9013_v11 }
 0x2c2   : > { %v5139_v56 = vrot.slane %v5111_v49, %v9013_v11  ;;  %v5141_v57 = vcombine.high %v5125_v50, %v5125_v50  ;;  %v5142_v58 = vcombine.high %v5132_v51, %v5132_v51  ;;  %5153 = vst.msk [vmem:[%s9036_s9 + $0x35] sm:$0x1] %vm585_vm4, %v5132_v51  ;;  %5154 = vst.msk [vmem:[%s9036_s9 + $0x55] sm:$0x1] %vm585_vm4, %v5140_v52 }
 0x2c3   : > { %5156 = vst.msk [vmem:[%s9036_s9 + $0x95] sm:$0x1] %vm585_vm4, %v5125_v50  ;;  %v5327_v59 = vrot.slane %v5313_v54, %v9013_v11  ;;  %v5328_v60 = vcombine.high %v5320_v55, %v5320_v55  ;;  %v5336_v61 = vrot.slane %v5320_v55, %v9013_v11 }
 0x2c4   : > { %v5143_v62 = vcombine.high %v5139_v56, %v5139_v56  ;;  %5155 = vst.msk [vmem:[%s9036_s9 + $0x75] sm:$0x1] %vm585_vm4, %v5142_v58  ;;  %5157 = vst.msk [vmem:[%s9036_s9 + $0xb5] sm:$0x1] %vm585_vm4, %v5139_v56 }
 0x2c5   : > { %5158 = vst.msk [vmem:[%s9036_s9 + $0xd5] sm:$0x1] %vm585_vm4, %v5141_v57  ;;  %v5329_v63 = vcombine.high %v5327_v59, %v5327_v59  ;;  %v5343_v1 = vrot.slane %v5327_v59, %v9013_v11  ;;  %v5350_v2 = vrot.slane %v5328_v60, %v9013_v11  ;;  %v5358_v3 = vcombine.high %v5336_v61, %v5336_v61 }
 0x2c6   : > { %5370 = vst.msk [vmem:[%s9036_s9 + $0x16] sm:$0x1] %vm585_vm4, %v5336_v61  ;;  %5159 = vst.msk [vmem:[%s9036_s9 + $0xf5] sm:$0x1] %vm585_vm4, %v5143_v62 }
 0x2c7   : > { %v5357_v4 = vrot.slane %v5329_v63, %v9013_v11  ;;  %v5359_v5 = vcombine.high %v5343_v1, %v5343_v1  ;;  %v5360_v6 = vcombine.high %v5350_v2, %v5350_v2  ;;  %5371 = vst.msk [vmem:[%s9036_s9 + $0x36] sm:$0x1] %vm585_vm4, %v5350_v2  ;;  %5372 = vst.msk [vmem:[%s9036_s9 + $0x56] sm:$0x1] %vm585_vm4, %v5358_v3  ;;  %v5526_v7 = vpop.f32.mrb[24].mxu1 }
 0x2c8   : > { %5374 = vst.msk [vmem:[%s9036_s9 + $0x96] sm:$0x1] %vm585_vm4, %v5343_v1  ;;  %v5531_v14 = vcombine.high %v5526_v7, %v5526_v7  ;;  %v5538_v8 = vrot.slane %v5526_v7, %v9013_v11  ;;  %v8049_v15 = vpop.f32.mrb[25].mxu1 }
 0x2c9   : > { %v5361_v9 = vcombine.high %v5357_v4, %v5357_v4  ;;  %5373 = vst.msk [vmem:[%s9036_s9 + $0x76] sm:$0x1] %vm585_vm4, %v5360_v6  ;;  %5375 = vst.msk [vmem:[%s9036_s9 + $0xb6] sm:$0x1] %vm585_vm4, %v5357_v4 }
 0x2ca   : > { %5376 = vst.msk [vmem:[%s9036_s9 + $0xd6] sm:$0x1] %vm585_vm4, %v5359_v5  ;;  %v5545_v10 = vrot.slane %v5531_v14, %v9013_v11  ;;  %v5546_v12 = vcombine.high %v5538_v8, %v5538_v8  ;;  %v5554_v22 = vrot.slane %v5538_v8, %v9013_v11 }
 0x2cb   : > { %5377 = vst.msk [vmem:[%s9036_s9 + $0xf6] sm:$0x1] %vm585_vm4, %v5361_v9  ;;  %v5744_v0 = vpop.f32.mrb[30].mxu0 }
 0x2cc   : > { %v5547_v13 = vcombine.high %v5545_v10, %v5545_v10  ;;  %v5561_v16 = vrot.slane %v5545_v10, %v9013_v11  ;;  %v5568_v17 = vrot.slane %v5546_v12, %v9013_v11  ;;  %v5576_v18 = vcombine.high %v5554_v22, %v5554_v22  ;;  %5588 = vst.msk [vmem:[%s9036_s9 + $0x17] sm:$0x1] %vm585_vm4, %v5554_v22  ;;  %v8063_v19 = vpop.f32.mrb[31].mxu0 }
 0x2cd   : > { %v5749_v20 = vcombine.high %v5744_v0, %v5744_v0  ;;  %v5756_v21 = vrot.slane %v5744_v0, %v9013_v11 }
 0x2ce   : > { %v5575_v23 = vrot.slane %v5547_v13, %v9013_v11  ;;  %v5577_v24 = vcombine.high %v5561_v16, %v5561_v16  ;;  %v5578_v25 = vcombine.high %v5568_v17, %v5568_v17  ;;  %5589 = vst.msk [vmem:[%s9036_s9 + $0x37] sm:$0x1] %vm585_vm4, %v5568_v17  ;;  %5590 = vst.msk [vmem:[%s9036_s9 + $0x57] sm:$0x1] %vm585_vm4, %v5576_v18 }
 0x2cf   : > { %5592 = vst.msk [vmem:[%s9036_s9 + $0x97] sm:$0x1] %vm585_vm4, %v5561_v16  ;;  %v5763_v26 = vrot.slane %v5749_v20, %v9013_v11  ;;  %v5764_v27 = vcombine.high %v5756_v21, %v5756_v21  ;;  %v5772_v28 = vrot.slane %v5756_v21, %v9013_v11 }
 0x2d0   : > { %v5579_v29 = vcombine.high %v5575_v23, %v5575_v23  ;;  %5591 = vst.msk [vmem:[%s9036_s9 + $0x77] sm:$0x1] %vm585_vm4, %v5578_v25  ;;  %5593 = vst.msk [vmem:[%s9036_s9 + $0xb7] sm:$0x1] %vm585_vm4, %v5575_v23 }
 0x2d1   : > { %5594 = vst.msk [vmem:[%s9036_s9 + $0xd7] sm:$0x1] %vm585_vm4, %v5577_v24  ;;  %v5765_v30 = vcombine.high %v5763_v26, %v5763_v26  ;;  %v5779_v31 = vrot.slane %v5763_v26, %v9013_v11  ;;  %v5786_v32 = vrot.slane %v5764_v27, %v9013_v11  ;;  %v5794_v33 = vcombine.high %v5772_v28, %v5772_v28 }
 0x2d2   : > { %5806 = vst.msk [vmem:[%s9036_s9 + $0x18] sm:$0x1] %vm585_vm4, %v5772_v28  ;;  %5595 = vst.msk [vmem:[%s9036_s9 + $0xf7] sm:$0x1] %vm585_vm4, %v5579_v29 }
 0x2d3   : > { %v5793_v34 = vrot.slane %v5765_v30, %v9013_v11  ;;  %v5795_v35 = vcombine.high %v5779_v31, %v5779_v31  ;;  %v5796_v36 = vcombine.high %v5786_v32, %v5786_v32  ;;  %5807 = vst.msk [vmem:[%s9036_s9 + $0x38] sm:$0x1] %vm585_vm4, %v5786_v32  ;;  %5808 = vst.msk [vmem:[%s9036_s9 + $0x58] sm:$0x1] %vm585_vm4, %v5794_v33  ;;  %v5962_v37 = vpop.f32.mrb[26].mxu1 }
 0x2d4   : > { %5810 = vst.msk [vmem:[%s9036_s9 + $0x98] sm:$0x1] %vm585_vm4, %v5779_v31  ;;  %v5967_v38 = vcombine.high %v5962_v37, %v5962_v37  ;;  %v5974_v39 = vrot.slane %v5962_v37, %v9013_v11  ;;  %v8077_v40 = vpop.f32.mrb[27].mxu1 }
 0x2d5   : > { %v5797_v41 = vcombine.high %v5793_v34, %v5793_v34  ;;  %5809 = vst.msk [vmem:[%s9036_s9 + $0x78] sm:$0x1] %vm585_vm4, %v5796_v36  ;;  %5811 = vst.msk [vmem:[%s9036_s9 + $0xb8] sm:$0x1] %vm585_vm4, %v5793_v34 }
 0x2d6   : > { %5812 = vst.msk [vmem:[%s9036_s9 + $0xd8] sm:$0x1] %vm585_vm4, %v5795_v35  ;;  %v5981_v42 = vrot.slane %v5967_v38, %v9013_v11  ;;  %v5982_v43 = vcombine.high %v5974_v39, %v5974_v39  ;;  %v5990_v44 = vrot.slane %v5974_v39, %v9013_v11 }
 0x2d7   : > { %5813 = vst.msk [vmem:[%s9036_s9 + $0xf8] sm:$0x1] %vm585_vm4, %v5797_v41  ;;  %v6180_v45 = vpop.f32.mrb[32].mxu0 }
 0x2d8   : > { %v5983_v46 = vcombine.high %v5981_v42, %v5981_v42  ;;  %v5997_v47 = vrot.slane %v5981_v42, %v9013_v11  ;;  %v6004_v48 = vrot.slane %v5982_v43, %v9013_v11  ;;  %v6012_v49 = vcombine.high %v5990_v44, %v5990_v44  ;;  %6024 = vst.msk [vmem:[%s9036_s9 + $0x19] sm:$0x1] %vm585_vm4, %v5990_v44  ;;  %v8091_v50 = vpop.f32.mrb[33].mxu0 }
 0x2d9   : > { %v6185_v51 = vcombine.high %v6180_v45, %v6180_v45  ;;  %v6192_v52 = vrot.slane %v6180_v45, %v9013_v11 }
 0x2da   : > { %v6011_v53 = vrot.slane %v5983_v46, %v9013_v11  ;;  %v6013_v54 = vcombine.high %v5997_v47, %v5997_v47  ;;  %v6014_v55 = vcombine.high %v6004_v48, %v6004_v48  ;;  %6025 = vst.msk [vmem:[%s9036_s9 + $0x39] sm:$0x1] %vm585_vm4, %v6004_v48  ;;  %6026 = vst.msk [vmem:[%s9036_s9 + $0x59] sm:$0x1] %vm585_vm4, %v6012_v49 }
 0x2db   : > { %6028 = vst.msk [vmem:[%s9036_s9 + $0x99] sm:$0x1] %vm585_vm4, %v5997_v47  ;;  %v6199_v56 = vrot.slane %v6185_v51, %v9013_v11  ;;  %v6200_v57 = vcombine.high %v6192_v52, %v6192_v52  ;;  %v6208_v58 = vrot.slane %v6192_v52, %v9013_v11 }
 0x2dc   : > { %v6015_v59 = vcombine.high %v6011_v53, %v6011_v53  ;;  %6027 = vst.msk [vmem:[%s9036_s9 + $0x79] sm:$0x1] %vm585_vm4, %v6014_v55  ;;  %6029 = vst.msk [vmem:[%s9036_s9 + $0xb9] sm:$0x1] %vm585_vm4, %v6011_v53 }
 0x2dd   : > { %6030 = vst.msk [vmem:[%s9036_s9 + $0xd9] sm:$0x1] %vm585_vm4, %v6013_v54  ;;  %v6201_v60 = vcombine.high %v6199_v56, %v6199_v56  ;;  %v6215_v61 = vrot.slane %v6199_v56, %v9013_v11  ;;  %v6222_v62 = vrot.slane %v6200_v57, %v9013_v11  ;;  %v6230_v63 = vcombine.high %v6208_v58, %v6208_v58 }
 0x2de   : > { %6242 = vst.msk [vmem:[%s9036_s9 + $0x1a] sm:$0x1] %vm585_vm4, %v6208_v58  ;;  %6031 = vst.msk [vmem:[%s9036_s9 + $0xf9] sm:$0x1] %vm585_vm4, %v6015_v59 }
 0x2df   : > { %v6229_v1 = vrot.slane %v6201_v60, %v9013_v11  ;;  %v6231_v2 = vcombine.high %v6215_v61, %v6215_v61  ;;  %v6232_v3 = vcombine.high %v6222_v62, %v6222_v62  ;;  %6243 = vst.msk [vmem:[%s9036_s9 + $0x3a] sm:$0x1] %vm585_vm4, %v6222_v62  ;;  %6244 = vst.msk [vmem:[%s9036_s9 + $0x5a] sm:$0x1] %vm585_vm4, %v6230_v63  ;;  %v6398_v4 = vpop.f32.mrb[28].mxu1 }
 0x2e0   : > { %6246 = vst.msk [vmem:[%s9036_s9 + $0x9a] sm:$0x1] %vm585_vm4, %v6215_v61  ;;  %v6403_v5 = vcombine.high %v6398_v4, %v6398_v4  ;;  %v6410_v6 = vrot.slane %v6398_v4, %v9013_v11  ;;  %v8105_v7 = vpop.f32.mrb[29].mxu1 }
 0x2e1   : > { %v6233_v14 = vcombine.high %v6229_v1, %v6229_v1  ;;  %6245 = vst.msk [vmem:[%s9036_s9 + $0x7a] sm:$0x1] %vm585_vm4, %v6232_v3  ;;  %6247 = vst.msk [vmem:[%s9036_s9 + $0xba] sm:$0x1] %vm585_vm4, %v6229_v1 }
 0x2e2   : > { %6248 = vst.msk [vmem:[%s9036_s9 + $0xda] sm:$0x1] %vm585_vm4, %v6231_v2  ;;  %v6417_v8 = vrot.slane %v6403_v5, %v9013_v11  ;;  %v6418_v15 = vcombine.high %v6410_v6, %v6410_v6  ;;  %v6426_v9 = vrot.slane %v6410_v6, %v9013_v11 }
 0x2e3   : > { %6249 = vst.msk [vmem:[%s9036_s9 + $0xfa] sm:$0x1] %vm585_vm4, %v6233_v14  ;;  %v6616_v10 = vpop.f32.mrb[34].mxu0 }
 0x2e4   : > { %v6419_v12 = vcombine.high %v6417_v8, %v6417_v8  ;;  %v6433_v22 = vrot.slane %v6417_v8, %v9013_v11  ;;  %v6440_v0 = vrot.slane %v6418_v15, %v9013_v11  ;;  %v6448_v13 = vcombine.high %v6426_v9, %v6426_v9  ;;  %6460 = vst.msk [vmem:[%s9036_s9 + $0x1b] sm:$0x1] %vm585_vm4, %v6426_v9  ;;  %v8119_v16 = vpop.f32.mrb[35].mxu0 }
 0x2e5   : > { %v6621_v17 = vcombine.high %v6616_v10, %v6616_v10  ;;  %v6628_v18 = vrot.slane %v6616_v10, %v9013_v11 }
 0x2e6   : > { %v6447_v19 = vrot.slane %v6419_v12, %v9013_v11  ;;  %v6449_v20 = vcombine.high %v6433_v22, %v6433_v22  ;;  %v6450_v21 = vcombine.high %v6440_v0, %v6440_v0  ;;  %6461 = vst.msk [vmem:[%s9036_s9 + $0x3b] sm:$0x1] %vm585_vm4, %v6440_v0  ;;  %6462 = vst.msk [vmem:[%s9036_s9 + $0x5b] sm:$0x1] %vm585_vm4, %v6448_v13 }
 0x2e7   : > { %6464 = vst.msk [vmem:[%s9036_s9 + $0x9b] sm:$0x1] %vm585_vm4, %v6433_v22  ;;  %v6635_v23 = vrot.slane %v6621_v17, %v9013_v11  ;;  %v6636_v24 = vcombine.high %v6628_v18, %v6628_v18  ;;  %v6644_v25 = vrot.slane %v6628_v18, %v9013_v11 }
 0x2e8   : > { %v6451_v26 = vcombine.high %v6447_v19, %v6447_v19  ;;  %6463 = vst.msk [vmem:[%s9036_s9 + $0x7b] sm:$0x1] %vm585_vm4, %v6450_v21  ;;  %6465 = vst.msk [vmem:[%s9036_s9 + $0xbb] sm:$0x1] %vm585_vm4, %v6447_v19 }
 0x2e9   : > { %6466 = vst.msk [vmem:[%s9036_s9 + $0xdb] sm:$0x1] %vm585_vm4, %v6449_v20  ;;  %v6637_v27 = vcombine.high %v6635_v23, %v6635_v23  ;;  %v6651_v28 = vrot.slane %v6635_v23, %v9013_v11  ;;  %v6658_v29 = vrot.slane %v6636_v24, %v9013_v11  ;;  %v6666_v30 = vcombine.high %v6644_v25, %v6644_v25 }
 0x2ea   : > { %6678 = vst.msk [vmem:[%s9036_s9 + $0x1c] sm:$0x1] %vm585_vm4, %v6644_v25  ;;  %6467 = vst.msk [vmem:[%s9036_s9 + $0xfb] sm:$0x1] %vm585_vm4, %v6451_v26 }
 0x2eb   : > { %v6665_v31 = vrot.slane %v6637_v27, %v9013_v11  ;;  %v6667_v32 = vcombine.high %v6651_v28, %v6651_v28  ;;  %v6668_v33 = vcombine.high %v6658_v29, %v6658_v29  ;;  %6679 = vst.msk [vmem:[%s9036_s9 + $0x3c] sm:$0x1] %vm585_vm4, %v6658_v29  ;;  %6680 = vst.msk [vmem:[%s9036_s9 + $0x5c] sm:$0x1] %vm585_vm4, %v6666_v30  ;;  %v6834_v34 = vpop.f32.mrb[30].mxu1 }
 0x2ec   : > { %6682 = vst.msk [vmem:[%s9036_s9 + $0x9c] sm:$0x1] %vm585_vm4, %v6651_v28  ;;  %v6839_v35 = vcombine.high %v6834_v34, %v6834_v34  ;;  %v6846_v36 = vrot.slane %v6834_v34, %v9013_v11  ;;  %v8133_v37 = vpop.f32.mrb[31].mxu1 }
 0x2ed   : > { %v6669_v38 = vcombine.high %v6665_v31, %v6665_v31  ;;  %6681 = vst.msk [vmem:[%s9036_s9 + $0x7c] sm:$0x1] %vm585_vm4, %v6668_v33  ;;  %6683 = vst.msk [vmem:[%s9036_s9 + $0xbc] sm:$0x1] %vm585_vm4, %v6665_v31 }
 0x2ee   : > { %6684 = vst.msk [vmem:[%s9036_s9 + $0xdc] sm:$0x1] %vm585_vm4, %v6667_v32  ;;  %v6853_v39 = vrot.slane %v6839_v35, %v9013_v11  ;;  %v6854_v40 = vcombine.high %v6846_v36, %v6846_v36  ;;  %v6862_v41 = vrot.slane %v6846_v36, %v9013_v11 }
 0x2ef   : > { %6685 = vst.msk [vmem:[%s9036_s9 + $0xfc] sm:$0x1] %vm585_vm4, %v6669_v38  ;;  %v7052_v42 = vpop.f32.mrb[36].mxu0 }
 0x2f0   : > { %v6855_v43 = vcombine.high %v6853_v39, %v6853_v39  ;;  %v6869_v44 = vrot.slane %v6853_v39, %v9013_v11  ;;  %v6876_v45 = vrot.slane %v6854_v40, %v9013_v11  ;;  %v6884_v46 = vcombine.high %v6862_v41, %v6862_v41  ;;  %6896 = vst.msk [vmem:[%s9036_s9 + $0x1d] sm:$0x1] %vm585_vm4, %v6862_v41  ;;  %v8147_v47 = vpop.f32.mrb[37].mxu0 }
 0x2f1   : > { %v7057_v48 = vcombine.high %v7052_v42, %v7052_v42  ;;  %v7064_v49 = vrot.slane %v7052_v42, %v9013_v11 }
 0x2f2   : > { %v6883_v50 = vrot.slane %v6855_v43, %v9013_v11  ;;  %v6885_v51 = vcombine.high %v6869_v44, %v6869_v44  ;;  %v6886_v52 = vcombine.high %v6876_v45, %v6876_v45  ;;  %6897 = vst.msk [vmem:[%s9036_s9 + $0x3d] sm:$0x1] %vm585_vm4, %v6876_v45  ;;  %6898 = vst.msk [vmem:[%s9036_s9 + $0x5d] sm:$0x1] %vm585_vm4, %v6884_v46 }
 0x2f3   : > { %6900 = vst.msk [vmem:[%s9036_s9 + $0x9d] sm:$0x1] %vm585_vm4, %v6869_v44  ;;  %v7071_v53 = vrot.slane %v7057_v48, %v9013_v11  ;;  %v7072_v54 = vcombine.high %v7064_v49, %v7064_v49  ;;  %v7080_v55 = vrot.slane %v7064_v49, %v9013_v11 }
 0x2f4   : > { %v6887_v56 = vcombine.high %v6883_v50, %v6883_v50  ;;  %6899 = vst.msk [vmem:[%s9036_s9 + $0x7d] sm:$0x1] %vm585_vm4, %v6886_v52  ;;  %6901 = vst.msk [vmem:[%s9036_s9 + $0xbd] sm:$0x1] %vm585_vm4, %v6883_v50 }
 0x2f5   : > { %6902 = vst.msk [vmem:[%s9036_s9 + $0xdd] sm:$0x1] %vm585_vm4, %v6885_v51  ;;  %v7073_v57 = vcombine.high %v7071_v53, %v7071_v53  ;;  %v7087_v58 = vrot.slane %v7071_v53, %v9013_v11  ;;  %v7094_v59 = vrot.slane %v7072_v54, %v9013_v11  ;;  %v7102_v60 = vcombine.high %v7080_v55, %v7080_v55 }
 0x2f6   : > { %7114 = vst.msk [vmem:[%s9036_s9 + $0x1e] sm:$0x1] %vm585_vm4, %v7080_v55  ;;  %6903 = vst.msk [vmem:[%s9036_s9 + $0xfd] sm:$0x1] %vm585_vm4, %v6887_v56 }
 0x2f7   : > { %v7101_v61 = vrot.slane %v7073_v57, %v9013_v11  ;;  %v7103_v62 = vcombine.high %v7087_v58, %v7087_v58  ;;  %v7104_v63 = vcombine.high %v7094_v59, %v7094_v59  ;;  %7115 = vst.msk [vmem:[%s9036_s9 + $0x3e] sm:$0x1] %vm585_vm4, %v7094_v59  ;;  %7116 = vst.msk [vmem:[%s9036_s9 + $0x5e] sm:$0x1] %vm585_vm4, %v7102_v60  ;;  %v7270_v1 = vpop.f32.mrb[32].mxu1 }
 0x2f8   : > { %7118 = vst.msk [vmem:[%s9036_s9 + $0x9e] sm:$0x1] %vm585_vm4, %v7087_v58  ;;  %v7275_v2 = vcombine.high %v7270_v1, %v7270_v1  ;;  %v7282_v3 = vrot.slane %v7270_v1, %v9013_v11  ;;  %v8161_v4 = vpop.f32.mrb[33].mxu1 }
 0x2f9   : > { %v7105_v5 = vcombine.high %v7101_v61, %v7101_v61  ;;  %7117 = vst.msk [vmem:[%s9036_s9 + $0x7e] sm:$0x1] %vm585_vm4, %v7104_v63  ;;  %7119 = vst.msk [vmem:[%s9036_s9 + $0xbe] sm:$0x1] %vm585_vm4, %v7101_v61 }
 0x2fa   : > { %7120 = vst.msk [vmem:[%s9036_s9 + $0xde] sm:$0x1] %vm585_vm4, %v7103_v62  ;;  %v7289_v6 = vrot.slane %v7275_v2, %v9013_v11  ;;  %v7290_v7 = vcombine.high %v7282_v3, %v7282_v3  ;;  %v7298_v14 = vrot.slane %v7282_v3, %v9013_v11 }
 0x2fb   : > { %7121 = vst.msk [vmem:[%s9036_s9 + $0xfe] sm:$0x1] %vm585_vm4, %v7105_v5 }
 0x2fc   : > { %v7291_v8 = vcombine.high %v7289_v6, %v7289_v6  ;;  %v7305_v15 = vrot.slane %v7289_v6, %v9013_v11  ;;  %v7312_v9 = vrot.slane %v7290_v7, %v9013_v11  ;;  %v7320_v10 = vcombine.high %v7298_v14, %v7298_v14  ;;  %7332 = vst.msk [vmem:[%s9036_s9 + $0x1f] sm:$0x1] %vm585_vm4, %v7298_v14 }
 0x2fe   : > { %v7319_v12 = vrot.slane %v7291_v8, %v9013_v11  ;;  %v7321_v22 = vcombine.high %v7305_v15, %v7305_v15  ;;  %v7322_v0 = vcombine.high %v7312_v9, %v7312_v9  ;;  %7333 = vst.msk [vmem:[%s9036_s9 + $0x3f] sm:$0x1] %vm585_vm4, %v7312_v9  ;;  %7334 = vst.msk [vmem:[%s9036_s9 + $0x5f] sm:$0x1] %vm585_vm4, %v7320_v10 }
 0x2ff   : > { %7336 = vst.msk [vmem:[%s9036_s9 + $0x9f] sm:$0x1] %vm585_vm4, %v7305_v15 }
 0x300   : > { %v7323_v11 = vcombine.high %v7319_v12, %v7319_v12  ;;  %7335 = vst.msk [vmem:[%s9036_s9 + $0x7f] sm:$0x1] %vm585_vm4, %v7322_v0  ;;  %7337 = vst.msk [vmem:[%s9036_s9 + $0xbf] sm:$0x1] %vm585_vm4, %v7319_v12 }
 0x301   : > { %7338 = vst.msk [vmem:[%s9036_s9 + $0xdf] sm:$0x1] %vm585_vm4, %v7321_v22 }
 0x302   : > { %7339 = vst.msk [vmem:[%s9036_s9 + $0xff] sm:$0x1] %vm585_vm4, %v7323_v11 }
 0x303   : > { %8503 = shalt.err (!%p8500_p5)
}
 0x304   : > { %s8504_s29 = scalar_lea.hbm %s9845_s14, 4096  ;;  %s8508_s6 = scalar_lea.hbm %s9909_s4, 8192 }
 0x305   : > { %p8505_p6 = scmp.ne.s32.totalorder %s9845_s14, %s8504_s29  ;;  %p8509_p10 = scmp.lt.u32.totalorder %s9845_s14, %s9909_s4 }
 0x306   : > { %p8510_p11 = scmp.lt.u32.totalorder %s8508_s6, %s8504_s29  ;;  %p8512_p13 = scmp.lt.u32.totalorder %s8504_s29, %s9845_s14 }
 0x307   : > { %p8506_p7 = pnand %p8505_p6, %p8650_p4 }
 0x308   : > { %p8511_p12 = por %p8510_p11, %p8509_p10 }
 0x309   : > { %p8507_p9 = pneg %p8506_p7 }
 0x30a   : > { %p8513_p0 = por %p8512_p13, %p8511_p12 }
 0x30c   : > { %p8514_p1 = pnand %p8513_p0, %p8507_p9 }
 0x30e   : > { %8517 = shalt.err (!%p8514_p1)
}
 0x30f   : > { %s8583_s9 = smov 128   ;;  %s8584_s10 = smov 8  }
 0x310   : > { %8418 = dma.vmem_to_hbm [thread:$0]  (%p8650_p4), %s9847_s11, 4096, %s9845_s14, %s9859_s18, %s8583_s9, %s8583_s9, %s8584_s10  }
 0x311 PF: > { %p8424_p2 = scmp.ge.s32.totalorder %s8568_s20, 2  ;;  %s7371_s12 = sand.u32 1, %s8548_s15  }
 0x312   : > { %s7372_s13 = scalar_lea.sflag [#allocation4], %s7371_s12 }
 0x313   : > { %p8421_p3 = pnand %p8424_p2, %p8657_p8 }
 0x315   : > { %8543 = dma.done.wait (!%p8421_p3), %s7372_s13, 4096  }
 0x316   : > { %8545 = vsyncadd (!%p8421_p3), %s7372_s13, 4294963200  ;;  %s17_s20 = sadd.s32 1, %s8568_s20   ;;  %s9912_s15 = smov %s8552_s16 }
 0x317   : > { %p14_p5 = scmp.ge.s32.totalorder %s17_s20, 4   ;;  %s9913_s16 = smov %s8556_s17 }
 0x318   : > { %s9914_s17 = smov %s8663_s28  ;;  %s9915_s18 = smov %s8564_s19 }
 0x319   : > { %s9916_s19 = smov %s9918_s23  ;;  %16 = sbr.rel (!%p14_p5) target bundleno = 4 (0x4), region = 72 }
 0x320   :  { %7377 = vsyncpa [#allocation4], 1 }
 0x321   :  { %7379 = vsyncpa [#allocation4 + $0x1], 1 }

</bundles_post_ra>
